<compile_context>
chip_gen: v5e
topology: v5e:2x2
jax: 0.10.0
libtpu: 0.0.40
codegen_flags: <defaults>
</compile_context>

<pallas_src>
import functools

import jax
import jax.numpy as jnp
from jax import lax
from jax.experimental import pallas as pl
from jax.experimental.pallas import tpu as pltpu

BLOCK_SIZE = 256        # positional table size (max sequence length)
EMBEDDING_SIZE = 128
DROPOUT = 0.3
N_HEAD = 8
N_LAYER = 4
VOCAB_SIZE = 32         # stand-in for len(set(alarms)) (data-dependent in the original)
VOCAB_PAD = ((VOCAB_SIZE + 127) // 128) * 128   # lane-dense lm_head output width

# Row tile for the final LN + lm_head kernel (B*T tokens).  Per-block-kernel VMEM use
# is tiny (per-batch activations + ~0.4 MB bf16 weights), so 32 MiB scoped VMEM is safe
# on v5e/v6e (128 MiB) and v7x (64 MiB) alike.
TILE_M = 1024
_VMEM_LIMIT = 32 * 1024 * 1024


def _cparams(n_axes):
    # Parallel grid axes -> megacore sharding on v7x (2 TCs); harmless on v5e/v6e.
    return pltpu.CompilerParams(
        dimension_semantics=("parallel",) * n_axes,
        vmem_limit_bytes=_VMEM_LIMIT,
    )


# ---------------------------------------------------------------------------
# In-kernel dropout: deterministic integer-hash Bernoulli(1-p) keep mask.
# ---------------------------------------------------------------------------
def _keep_mask(shape, seed_i32, salt, base_i32, p):
    """keep[i,j] ~ Bernoulli(1-p); distinct stream per (seed, salt, global element id)."""
    rows = lax.broadcasted_iota(jnp.int32, shape, 0)
    cols = lax.broadcasted_iota(jnp.int32, shape, 1)
    idx = (base_i32 + rows * shape[1] + cols).astype(jnp.uint32)
    # One Weyl multiply + one xorshift-multiply round (cut from full lowbias32).
    x = idx * jnp.uint32(0x9E3779B9)
    x = x ^ (seed_i32.astype(jnp.uint32) * jnp.uint32(0x85EBCA6B)
             + jnp.uint32((salt * 0xC2B2AE35) & 0xFFFFFFFF))
    x = x ^ (x >> 16)
    x = x * jnp.uint32(0x7FEB352D)
    x = x ^ (x >> 15)
    r24 = (x >> 8).astype(jnp.int32)                 # uniform integer in [0, 2^24)
    return r24 >= jnp.int32(int(p * (1 << 24)))      # integer threshold: P(keep) = 1 - p


def _apply_dropout(y, keep, p):
    # Inverted dropout, single select + scale.
    return jnp.where(keep, y * (1.0 / (1.0 - p)), 0.0)


def _ln(x, g, b):
    # nn.LayerNorm: biased variance, eps=1e-5.
    mu = jnp.mean(x, axis=-1, keepdims=True)
    xc = x - mu
    var = jnp.mean(xc * xc, axis=-1, keepdims=True)
    return xc * lax.rsqrt(var + 1e-5) * g + b


# ---------------------------------------------------------------------------
# Fused transformer block kernel (one grid step per batch element)
#   LN1 -> QKV -> per-head causal attention -> proj (+dropout) + residual
#   -> LN2 -> FFN (+dropout) + residual
# ---------------------------------------------------------------------------
def _block_kernel(seed_ref, x_ref,
                  ln1g_ref, ln1b_ref, wqkv_ref,
                  wproj_ref, bproj_ref,
                  ln2g_ref, ln2b_ref, w1_ref, b1_ref, w2_ref, b2_ref,
                  o_ref, *, training, salt, n_head):
    T = x_ref.shape[1]
    E = x_ref.shape[2]
    hs = E // n_head
    scale = float(hs) ** -0.5
    b_idx = pl.program_id(0)
    seed = seed_ref[0]

    x = x_ref[0].astype(jnp.float32)                           # (T, E) residual stream

    # --- LN1 + QKV projection (no bias in the original Head linears) ---
    xn = _ln(x, ln1g_ref[...], ln1b_ref[...])
    qkv = jnp.dot(xn.astype(jnp.bfloat16), wqkv_ref[...],
                  preferred_element_type=jnp.float32)          # (T, 3E)

    # Fold 1/sqrt(hs) into q once (16x fewer multiplies than scaling the TxT scores).
    q_all = qkv[:, :E] * scale
    k_all = qkv[:, E:2 * E]
    v_all = qkv[:, 2 * E:]

    # Causal mask shared by all heads.
    row = lax.broadcasted_iota(jnp.int32, (T, T), 0)
    col = lax.broadcasted_iota(jnp.int32, (T, T), 1)
    causal = col <= row

    ctx_parts = []
    for h in range(n_head):                                    # static unroll, H = 8
        sl = slice(h * hs, (h + 1) * hs)
        qh = q_all[:, sl].astype(jnp.bfloat16)                 # (T, hs) bf16 MXU inputs
        kh = k_all[:, sl].astype(jnp.bfloat16)
        vh = v_all[:, sl].astype(jnp.bfloat16)
        s = lax.dot_general(qh, kh, (((1,), (1,)), ((), ())),  # q @ k.T
                            preferred_element_type=jnp.float32)
        s = jnp.where(causal, s, -jnp.inf)
        m = jnp.max(s, axis=-1, keepdims=True)
        e = jnp.exp(s - m)
        p = e * pl.reciprocal(jnp.sum(e, axis=-1, keepdims=True), approx=True)
        if training:                                           # dropout on attn weights
            base = (b_idx * n_head + h) * (T * T)
            p = _apply_dropout(p, _keep_mask((T, T), seed, salt * 16 + 1, base, DROPOUT),
                               DROPOUT)
        ctx_parts.append(jnp.dot(p.astype(jnp.bfloat16), vh,
                                 preferred_element_type=jnp.float32))   # (T, hs)
    ctx = jnp.concatenate(ctx_parts, axis=-1)                  # (T, E), head-concat

    # --- attention output projection + dropout + residual ---
    y = jnp.dot(ctx.astype(jnp.bfloat16), wproj_ref[...],
                preferred_element_type=jnp.float32) + bproj_ref[...]
    if training:
        base = b_idx * (T * E)
        y = _apply_dropout(y, _keep_mask((T, E), seed, salt * 16 + 2, base, DROPOUT),
                           DROPOUT)
    x = x + y

    # --- LN2 + FFN (Linear -> ReLU -> Linear -> Dropout) + residual ---
    xn = _ln(x, ln2g_ref[...], ln2b_ref[...])
    hmid = jnp.dot(xn.astype(jnp.bfloat16), w1_ref[...],
                   preferred_element_type=jnp.float32) + b1_ref[...]
    hmid = jnp.maximum(hmid, 0.0)
    y = jnp.dot(hmid.astype(jnp.bfloat16), w2_ref[...],
                preferred_element_type=jnp.float32) + b2_ref[...]
    if training:
        base = b_idx * (T * E)
        y = _apply_dropout(y, _keep_mask((T, E), seed, salt * 16 + 3, base, DROPOUT),
                           DROPOUT)

    o_ref[0] = (x + y).astype(o_ref.dtype)


def transformer_block(x, blk, seed_arr, *, salt, training):
    B, T, E = x.shape
    H4 = 4 * E
    kernel = functools.partial(_block_kernel, training=training, salt=salt,
                               n_head=N_HEAD)

    def wspec(shape):
        return pl.BlockSpec(shape, lambda b, s: (0,) * len(shape))   # VMEM-resident

    act_spec = pl.BlockSpec((1, T, E), lambda b, s: (b, 0, 0))
    return pl.pallas_call(
        kernel,
        out_shape=jax.ShapeDtypeStruct((B, T, E), jnp.float32),
        grid_spec=pltpu.PrefetchScalarGridSpec(
            num_scalar_prefetch=1,                  # dropout seed in SMEM
            grid=(B,),
            in_specs=[
                act_spec,                           # x: streamed per batch element
                wspec((1, E)), wspec((1, E)),       # ln1 gamma/beta
                wspec((E, 3 * E)),                  # Wqkv (bf16, resident)
                wspec((E, E)), wspec((1, E)),       # Wproj, bproj
                wspec((1, E)), wspec((1, E)),       # ln2 gamma/beta
                wspec((E, H4)), wspec((1, H4)),     # W1, b1
                wspec((H4, E)), wspec((1, E)),      # W2, b2
            ],
            out_specs=act_spec,
        ),
        compiler_params=_cparams(1),
    )(seed_arr, x,
      blk["ln1_g"], blk["ln1_b"], blk["wqkv"],
      blk["wproj"], blk["bproj"],
      blk["ln2_g"], blk["ln2_b"], blk["w1"], blk["b1"], blk["w2"], blk["b2"])


# ---------------------------------------------------------------------------
# Fused final LayerNorm + lm_head (lane-dense padded output, M-tiled)
# ---------------------------------------------------------------------------
def _final_kernel(x_ref, g_ref, b_ref, w_ref, bb_ref, o_ref):
    x = x_ref[...].astype(jnp.float32)
    xn = _ln(x, g_ref[...], b_ref[...])
    y = jnp.dot(xn.astype(jnp.bfloat16), w_ref[...],
                preferred_element_type=jnp.float32) + bb_ref[...]
    o_ref[...] = y.astype(o_ref.dtype)


def final_ln_lm_head(x2d, g, b, w_pad, b_pad):
    M, E = x2d.shape
    VP = w_pad.shape[1]
    tm = min(TILE_M, M)
    return pl.pallas_call(
        _final_kernel,
        out_shape=jax.ShapeDtypeStruct((M, VP), jnp.float32),
        grid=(pl.cdiv(M, tm),),
        in_specs=[
            pl.BlockSpec((tm, E), lambda i: (i, 0)),
            pl.BlockSpec((1, E), lambda i: (0, 0)),
            pl.BlockSpec((1, E), lambda i: (0, 0)),
            pl.BlockSpec((E, VP), lambda i: (0, 0)),
            pl.BlockSpec((1, VP), lambda i: (0, 0)),
        ],
        out_specs=pl.BlockSpec((tm, VP), lambda i: (i, 0)),
        compiler_params=_cparams(1),
    )(x2d, g, b, w_pad, b_pad)


# ---------------------------------------------------------------------------
# Parameters (mirrors DecoderOnly._init_weights: N(0, 0.02), zero biases)
# ---------------------------------------------------------------------------
def init_params(key):
    E, H4 = EMBEDDING_SIZE, 4 * EMBEDDING_SIZE

    def nrm(k, shape):
        return (0.02 * jax.random.normal(k, shape)).astype(jnp.float32)

    k_tok, k_pos, k_blocks, k_lm = jax.random.split(key, 4)
    blocks = []
    for bk in jax.random.split(k_blocks, N_LAYER):
        k1, k2, k3, k4 = jax.random.split(bk, 4)
        blocks.append(dict(
            ln1_g=jnp.ones((E,), jnp.float32), ln1_b=jnp.zeros((E,), jnp.float32),
            ln2_g=jnp.ones((E,), jnp.float32), ln2_b=jnp.zeros((E,), jnp.float32),
            # per-head key/query/value projections packed as [Wq | Wk | Wv], no bias
            wqkv=nrm(k1, (E, 3 * E)),
            wproj=nrm(k2, (E, E)), bproj=jnp.zeros((E,), jnp.float32),
            w1=nrm(k3, (E, H4)), b1=jnp.zeros((H4,), jnp.float32),
            w2=nrm(k4, (H4, E)), b2=jnp.zeros((E,), jnp.float32),
        ))
    return dict(
        tok_emb=nrm(k_tok, (VOCAB_SIZE, E)),
        pos_emb=nrm(k_pos, (BLOCK_SIZE, E)),
        blocks=blocks,
        lnf_g=jnp.ones((E,), jnp.float32), lnf_b=jnp.zeros((E,), jnp.float32),
        w_lm=nrm(k_lm, (E, VOCAB_SIZE)), b_lm=jnp.zeros((VOCAB_SIZE,), jnp.float32),
    )


def prepare_params(params):
    """Kernel-ready parameter tree: bf16 weights (cast once, outside the jit),
    (1, N) biases/LN params, lane-dense padded lm_head."""
    E, H4 = EMBEDDING_SIZE, 4 * EMBEDDING_SIZE
    blocks = []
    for blk in params["blocks"]:
        blocks.append(dict(
            ln1_g=blk["ln1_g"].reshape(1, E), ln1_b=blk["ln1_b"].reshape(1, E),
            ln2_g=blk["ln2_g"].reshape(1, E), ln2_b=blk["ln2_b"].reshape(1, E),
            wqkv=blk["wqkv"].astype(jnp.bfloat16),
            wproj=blk["wproj"].astype(jnp.bfloat16),
            bproj=blk["bproj"].reshape(1, E),
            w1=blk["w1"].astype(jnp.bfloat16), b1=blk["b1"].reshape(1, H4),
            w2=blk["w2"].astype(jnp.bfloat16), b2=blk["b2"].reshape(1, E),
        ))
    w_lm_pad = jnp.zeros((E, VOCAB_PAD), jnp.float32)
    w_lm_pad = w_lm_pad.at[:, :VOCAB_SIZE].set(params["w_lm"]).astype(jnp.bfloat16)
    b_lm_pad = jnp.zeros((1, VOCAB_PAD), jnp.float32)
    b_lm_pad = b_lm_pad.at[:, :VOCAB_SIZE].set(params["b_lm"])
    return dict(
        tok_emb=params["tok_emb"], pos_emb=params["pos_emb"], blocks=blocks,
        lnf_g=params["lnf_g"].reshape(1, E), lnf_b=params["lnf_b"].reshape(1, E),
        w_lm_pad=w_lm_pad, b_lm_pad=b_lm_pad,
    )


# ---------------------------------------------------------------------------
# DecoderOnly.forward(idx, targets=None) -> logits
# ---------------------------------------------------------------------------
@functools.partial(jax.jit, static_argnames=("training",))
def decoder_forward(prep, idx, seed, *, training=False):
    B, T = idx.shape
    E = EMBEDDING_SIZE
    seed_arr = jnp.reshape(jnp.asarray(seed, jnp.int32), (1,))

    # TODO(synk): nn.Embedding lookups stay as XLA gathers (no clean rectangular
    # BlockSpec equivalent at this size).
    tok = jnp.take(prep["tok_emb"], idx, axis=0)              # (B, T, E)
    pos = prep["pos_emb"][:T]                                  # (T, E)
    x = tok + pos[None, :, :]

    for li, blk in enumerate(prep["blocks"]):
        x = transformer_block(x, blk, seed_arr, salt=li + 1, training=training)

    logits_pad = final_ln_lm_head(x.reshape(B * T, E),
                                  prep["lnf_g"], prep["lnf_b"],
                                  prep["w_lm_pad"], prep["b_lm_pad"])
    # TODO(synk): targets branch (F.cross_entropy + sklearn accuracy/precision/recall/f1)
    # is host-side bookkeeping and is not implemented here.
    return logits_pad[:, :VOCAB_SIZE].reshape(B, T, VOCAB_SIZE)


# ---------------------------------------------------------------------------
# Pure-JAX f32 reference (eval mode: dropout = identity) for correctness check
# ---------------------------------------------------------------------------
def _layernorm_ref(x, g, b):
    mu = x.mean(-1, keepdims=True)
    var = ((x - mu) ** 2).mean(-1, keepdims=True)
    return (x - mu) / jnp.sqrt(var + 1e-5) * g + b


def decoder_forward_ref(params, idx):
    B, T = idx.shape
    E, H = EMBEDDING_SIZE, N_HEAD
    hs = E // H
    x = jnp.take(params["tok_emb"], idx, axis=0) + params["pos_emb"][:T][None]
    mask = jnp.tril(jnp.ones((T, T), bool))
    for blk in params["blocks"]:
        xn = _layernorm_ref(x, blk["ln1_g"], blk["ln1_b"])
        qkv = (xn @ blk["wqkv"]).reshape(B, T, 3, H, hs).transpose(2, 0, 3, 1, 4)
        q, k, v = qkv[0], qkv[1], qkv[2]
        s = jnp.einsum("bhqd,bhkd->bhqk", q, k) * float(hs) ** -0.5
        s = jnp.where(mask, s, -jnp.inf)
        w = jax.nn.softmax(s, axis=-1)
        ctx = jnp.einsum("bhqk,bhkd->bhqd", w, v).transpose(0, 2, 1, 3).reshape(B, T, E)
        x = x + (ctx @ blk["wproj"] + blk["bproj"])
        xn = _layernorm_ref(x, blk["ln2_g"], blk["ln2_b"])
        x = x + (jnp.maximum(xn @ blk["w1"] + blk["b1"], 0.0) @ blk["w2"] + blk["b2"])
    x = _layernorm_ref(x, params["lnf_g"], params["lnf_b"])
    return x @ params["w_lm"] + params["b_lm"]


if __name__ == "__main__":
    key = jax.random.PRNGKey(0)
    k_idx, k_par = jax.random.split(key)

    B, T = 2, 8                                               # small demo shapes
    idx = jax.random.randint(k_idx, (B, T), 0, VOCAB_SIZE, dtype=jnp.int32)
    params = init_params(k_par)
    prep = prepare_params(params)                             # bf16 weights, cast once

    # Eval-mode forward (dropout = identity): check against the pure-JAX f32 reference
    # (tolerance accounts for bf16 MXU inputs and the approx softmax reciprocal).
    logits = jax.block_until_ready(decoder_forward(prep, idx, 0, training=False))
    assert logits.shape == (B, T, VOCAB_SIZE)
    ref = decoder_forward_ref(params, idx)
    max_err = float(jnp.max(jnp.abs(logits - ref)))
    assert bool(jnp.allclose(logits, ref, atol=5e-2, rtol=5e-2)), f"max abs err {max_err}"

    # Training-mode forward: in-kernel dropout on attention weights, attention output
    # projection and FFN output, deterministic given the seed.
    logits_tr = jax.block_until_ready(decoder_forward(prep, idx, 42, training=True))
    assert logits_tr.shape == (B, T, VOCAB_SIZE)
    assert bool(jnp.all(jnp.isfinite(logits_tr)))

    print("KERNEL_OK")
</pallas_src>

<mosaic_0001>
module attributes {stable_mosaic.version = 11 : i64} {
  func.func @_final_kernel(%arg0: i32, %arg1: memref<16x128xf32, #tpu.memory_space<vmem>>, %arg2: memref<1x128xf32, #tpu.memory_space<vmem>>, %arg3: memref<1x128xf32, #tpu.memory_space<vmem>>, %arg4: memref<128x128xbf16, #tpu.memory_space<vmem>>, %arg5: memref<1x128xf32, #tpu.memory_space<vmem>>, %arg6: memref<16x128xf32, #tpu.memory_space<vmem>>) attributes {dimension_semantics = [#tpu.dimension_semantics<parallel>], iteration_bounds = array<i64: 1>, scalar_prefetch = 0 : i64, scratch_operands = 0 : i64, tpu.core_type = #tpu.core_type<tc>, window_params = [{transform_indices = @transform_0, window_bounds = array<i64: 16, 128>}, {pipeline_mode = #tpu.pipeline_mode<synchronous>, transform_indices = @transform_1, window_bounds = array<i64: 1, 128>}, {pipeline_mode = #tpu.pipeline_mode<synchronous>, transform_indices = @transform_2, window_bounds = array<i64: 1, 128>}, {pipeline_mode = #tpu.pipeline_mode<synchronous>, transform_indices = @transform_3, window_bounds = array<i64: 128, 128>}, {pipeline_mode = #tpu.pipeline_mode<synchronous>, transform_indices = @transform_4, window_bounds = array<i64: 1, 128>}, {transform_indices = @transform_5, window_bounds = array<i64: 16, 128>}]} {
    %c0 = arith.constant 0 : index
    %c0_0 = arith.constant 0 : index
    %0 = vector.load %arg1[%c0, %c0_0] : memref<16x128xf32, #tpu.memory_space<vmem>>, vector<16x128xf32>
    %c0_1 = arith.constant 0 : index
    %c0_2 = arith.constant 0 : index
    %1 = vector.load %arg2[%c0_1, %c0_2] : memref<1x128xf32, #tpu.memory_space<vmem>>, vector<1x128xf32>
    %c0_3 = arith.constant 0 : index
    %c0_4 = arith.constant 0 : index
    %2 = vector.load %arg3[%c0_3, %c0_4] : memref<1x128xf32, #tpu.memory_space<vmem>>, vector<1x128xf32>
    %cst = arith.constant dense<0.000000e+00> : vector<16xf32>
    %3 = vector.multi_reduction <add>, %0, %cst [1] : vector<16x128xf32> to vector<16xf32>
    %4 = vector.shape_cast %3 : vector<16xf32> to vector<16x1xf32>
    %cst_5 = arith.constant 1.280000e+02 : f32
    %5 = vector.broadcast %cst_5 : f32 to vector<16x1xf32>
    %6 = arith.divf %4, %5 : vector<16x1xf32>
    %7 = vector.broadcast %6 : vector<16x1xf32> to vector<16x128xf32>
    %8 = arith.subf %0, %7 : vector<16x128xf32>
    %9 = arith.mulf %8, %8 : vector<16x128xf32>
    %cst_6 = arith.constant dense<0.000000e+00> : vector<16xf32>
    %10 = vector.multi_reduction <add>, %9, %cst_6 [1] : vector<16x128xf32> to vector<16xf32>
    %11 = vector.shape_cast %10 : vector<16xf32> to vector<16x1xf32>
    %cst_7 = arith.constant 1.280000e+02 : f32
    %12 = vector.broadcast %cst_7 : f32 to vector<16x1xf32>
    %13 = arith.divf %11, %12 : vector<16x1xf32>
    %cst_8 = arith.constant 9.99999974E-6 : f32
    %14 = vector.broadcast %cst_8 : f32 to vector<16x1xf32>
    %15 = arith.addf %13, %14 : vector<16x1xf32>
    %16 = math.rsqrt %15 : vector<16x1xf32>
    %17 = vector.broadcast %16 : vector<16x1xf32> to vector<16x128xf32>
    %18 = arith.mulf %8, %17 : vector<16x128xf32>
    %19 = vector.broadcast %1 : vector<1x128xf32> to vector<16x128xf32>
    %20 = arith.mulf %18, %19 : vector<16x128xf32>
    %21 = vector.broadcast %2 : vector<1x128xf32> to vector<16x128xf32>
    %22 = arith.addf %20, %21 : vector<16x128xf32>
    %23 = arith.truncf %22 : vector<16x128xf32> to vector<16x128xbf16>
    %c0_9 = arith.constant 0 : index
    %c0_10 = arith.constant 0 : index
    %24 = vector.load %arg4[%c0_9, %c0_10] : memref<128x128xbf16, #tpu.memory_space<vmem>>, vector<128x128xbf16>
    %cst_11 = arith.constant dense<0.000000e+00> : vector<16x128xf32>
    %25 = tpu.matmul %23, %24, %cst_11 {dimension_numbers = #tpu.dot_dimension_numbers<[1], [0], [0], [1], [0, 0, 1, 1], [], []>} : vector<16x128xbf16>, vector<128x128xbf16>, vector<16x128xf32> -> vector<16x128xf32>
    %c0_12 = arith.constant 0 : index
    %c0_13 = arith.constant 0 : index
    %26 = vector.load %arg5[%c0_12, %c0_13] : memref<1x128xf32, #tpu.memory_space<vmem>>, vector<1x128xf32>
    %27 = vector.broadcast %26 : vector<1x128xf32> to vector<16x128xf32>
    %28 = arith.addf %25, %27 : vector<16x128xf32>
    %c0_14 = arith.constant 0 : index
    %c0_15 = arith.constant 0 : index
    %29 = vector.load %arg6[%c0_14, %c0_15] : memref<16x128xf32, #tpu.memory_space<vmem>>, vector<16x128xf32>
    tpu.vector_store %arg6[%c0_14, %c0_15], %28 {strides = array<i32>} : memref<16x128xf32, #tpu.memory_space<vmem>>, vector<16x128xf32>,
    return
  }
  func.func @transform_0(%arg0: i32) -> (i32, i32) {
    %c0_i32 = arith.constant 0 : i32
    %c0_i32_0 = arith.constant 0 : i32
    return %arg0, %c0_i32 : i32, i32
  }
  func.func @transform_1(%arg0: i32) -> (i32, i32) {
    %c0_i32 = arith.constant 0 : i32
    %c0_i32_0 = arith.constant 0 : i32
    %c0_i32_1 = arith.constant 0 : i32
    return %c0_i32, %c0_i32_0 : i32, i32
  }
  func.func @transform_2(%arg0: i32) -> (i32, i32) {
    %c0_i32 = arith.constant 0 : i32
    %c0_i32_0 = arith.constant 0 : i32
    %c0_i32_1 = arith.constant 0 : i32
    return %c0_i32, %c0_i32_0 : i32, i32
  }
  func.func @transform_3(%arg0: i32) -> (i32, i32) {
    %c0_i32 = arith.constant 0 : i32
    %c0_i32_0 = arith.constant 0 : i32
    %c0_i32_1 = arith.constant 0 : i32
    return %c0_i32, %c0_i32_0 : i32, i32
  }
  func.func @transform_4(%arg0: i32) -> (i32, i32) {
    %c0_i32 = arith.constant 0 : i32
    %c0_i32_0 = arith.constant 0 : i32
    %c0_i32_1 = arith.constant 0 : i32
    return %c0_i32, %c0_i32_0 : i32, i32
  }
  func.func @transform_5(%arg0: i32) -> (i32, i32) {
    %c0_i32 = arith.constant 0 : i32
    %c0_i32_0 = arith.constant 0 : i32
    return %arg0, %c0_i32 : i32, i32
  }
}

module attributes {stable_mosaic.version = 11 : i64} {
  func.func @_block_kernel(%arg0: i32, %arg1: memref<1xi32, #tpu.memory_space<smem>>, %arg2: memref<1x8x128xf32, #tpu.memory_space<vmem>>, %arg3: memref<1x128xf32, #tpu.memory_space<vmem>>, %arg4: memref<1x128xf32, #tpu.memory_space<vmem>>, %arg5: memref<128x384xbf16, #tpu.memory_space<vmem>>, %arg6: memref<128x128xbf16, #tpu.memory_space<vmem>>, %arg7: memref<1x128xf32, #tpu.memory_space<vmem>>, %arg8: memref<1x128xf32, #tpu.memory_space<vmem>>, %arg9: memref<1x128xf32, #tpu.memory_space<vmem>>, %arg10: memref<128x512xbf16, #tpu.memory_space<vmem>>, %arg11: memref<1x512xf32, #tpu.memory_space<vmem>>, %arg12: memref<512x128xbf16, #tpu.memory_space<vmem>>, %arg13: memref<1x128xf32, #tpu.memory_space<vmem>>, %arg14: memref<1x8x128xf32, #tpu.memory_space<vmem>>) attributes {dimension_semantics = [#tpu.dimension_semantics<parallel>], iteration_bounds = array<i64: 2>, scalar_prefetch = 1 : i64, scratch_operands = 0 : i64, tpu.core_type = #tpu.core_type<tc>, window_params = [{transform_indices = @transform_0, window_bounds = array<i64: 1, 8, 128>}, {pipeline_mode = #tpu.pipeline_mode<synchronous>, transform_indices = @transform_1, window_bounds = array<i64: 1, 128>}, {pipeline_mode = #tpu.pipeline_mode<synchronous>, transform_indices = @transform_2, window_bounds = array<i64: 1, 128>}, {pipeline_mode = #tpu.pipeline_mode<synchronous>, transform_indices = @transform_3, window_bounds = array<i64: 128, 384>}, {pipeline_mode = #tpu.pipeline_mode<synchronous>, transform_indices = @transform_4, window_bounds = array<i64: 128, 128>}, {pipeline_mode = #tpu.pipeline_mode<synchronous>, transform_indices = @transform_5, window_bounds = array<i64: 1, 128>}, {pipeline_mode = #tpu.pipeline_mode<synchronous>, transform_indices = @transform_6, window_bounds = array<i64: 1, 128>}, {pipeline_mode = #tpu.pipeline_mode<synchronous>, transform_indices = @transform_7, window_bounds = array<i64: 1, 128>}, {pipeline_mode = #tpu.pipeline_mode<synchronous>, transform_indices = @transform_8, window_bounds = array<i64: 128, 512>}, {pipeline_mode = #tpu.pipeline_mode<synchronous>, transform_indices = @transform_9, window_bounds = array<i64: 1, 512>}, {pipeline_mode = #tpu.pipeline_mode<synchronous>, transform_indices = @transform_10, window_bounds = array<i64: 512, 128>}, {pipeline_mode = #tpu.pipeline_mode<synchronous>, transform_indices = @transform_11, window_bounds = array<i64: 1, 128>}, {transform_indices = @transform_12, window_bounds = array<i64: 1, 8, 128>}]} {
    %c0 = arith.constant 0 : index
    %c0_0 = arith.constant 0 : index
    %c0_1 = arith.constant 0 : index
    %0 = vector.load %arg2[%c0, %c0_0, %c0_1] : memref<1x8x128xf32, #tpu.memory_space<vmem>>, vector<1x8x128xf32>
    %1 = vector.shape_cast %0 : vector<1x8x128xf32> to vector<8x128xf32>
    %c0_2 = arith.constant 0 : index
    %c0_3 = arith.constant 0 : index
    %2 = vector.load %arg3[%c0_2, %c0_3] : memref<1x128xf32, #tpu.memory_space<vmem>>, vector<1x128xf32>
    %c0_4 = arith.constant 0 : index
    %c0_5 = arith.constant 0 : index
    %3 = vector.load %arg4[%c0_4, %c0_5] : memref<1x128xf32, #tpu.memory_space<vmem>>, vector<1x128xf32>
    %cst = arith.constant dense<0.000000e+00> : vector<8xf32>
    %4 = vector.multi_reduction <add>, %1, %cst [1] : vector<8x128xf32> to vector<8xf32>
    %5 = vector.shape_cast %4 : vector<8xf32> to vector<8x1xf32>
    %cst_6 = arith.constant 1.280000e+02 : f32
    %6 = vector.broadcast %cst_6 : f32 to vector<8x1xf32>
    %7 = arith.divf %5, %6 : vector<8x1xf32>
    %8 = vector.broadcast %7 : vector<8x1xf32> to vector<8x128xf32>
    %9 = arith.subf %1, %8 : vector<8x128xf32>
    %10 = arith.mulf %9, %9 : vector<8x128xf32>
    %cst_7 = arith.constant dense<0.000000e+00> : vector<8xf32>
    %11 = vector.multi_reduction <add>, %10, %cst_7 [1] : vector<8x128xf32> to vector<8xf32>
    %12 = vector.shape_cast %11 : vector<8xf32> to vector<8x1xf32>
    %cst_8 = arith.constant 1.280000e+02 : f32
    %13 = vector.broadcast %cst_8 : f32 to vector<8x1xf32>
    %14 = arith.divf %12, %13 : vector<8x1xf32>
    %cst_9 = arith.constant 9.99999974E-6 : f32
    %15 = vector.broadcast %cst_9 : f32 to vector<8x1xf32>
    %16 = arith.addf %14, %15 : vector<8x1xf32>
    %17 = math.rsqrt %16 : vector<8x1xf32>
    %18 = vector.broadcast %17 : vector<8x1xf32> to vector<8x128xf32>
    %19 = arith.mulf %9, %18 : vector<8x128xf32>
    %20 = vector.broadcast %2 : vector<1x128xf32> to vector<8x128xf32>
    %21 = arith.mulf %19, %20 : vector<8x128xf32>
    %22 = vector.broadcast %3 : vector<1x128xf32> to vector<8x128xf32>
    %23 = arith.addf %21, %22 : vector<8x128xf32>
    %24 = arith.truncf %23 : vector<8x128xf32> to vector<8x128xbf16>
    %c0_10 = arith.constant 0 : index
    %c0_11 = arith.constant 0 : index
    %25 = vector.load %arg5[%c0_10, %c0_11] : memref<128x384xbf16, #tpu.memory_space<vmem>>, vector<128x384xbf16>
    %cst_12 = arith.constant dense<0.000000e+00> : vector<8x384xf32>
    %26 = tpu.matmul %24, %25, %cst_12 {dimension_numbers = #tpu.dot_dimension_numbers<[1], [0], [0], [1], [0, 0, 1, 1], [], []>} : vector<8x128xbf16>, vector<128x384xbf16>, vector<8x384xf32> -> vector<8x384xf32>
    %27 = vector.extract_strided_slice %26 {offsets = [0, 0], sizes = [8, 128], strides = [1, 1]} : vector<8x384xf32> to vector<8x128xf32>
    %cst_13 = arith.constant 2.500000e-01 : f32
    %28 = vector.broadcast %cst_13 : f32 to vector<8x128xf32>
    %29 = arith.mulf %27, %28 : vector<8x128xf32>
    %30 = vector.extract_strided_slice %26 {offsets = [0, 128], sizes = [8, 128], strides = [1, 1]} : vector<8x384xf32> to vector<8x128xf32>
    %31 = vector.extract_strided_slice %26 {offsets = [0, 256], sizes = [8, 128], strides = [1, 1]} : vector<8x384xf32> to vector<8x128xf32>
    %32 = tpu.iota {dimensions = array<i32: 0>} : vector<8x8xi32>
    %33 = tpu.iota {dimensions = array<i32: 1>} : vector<8x8xi32>
    %34 = arith.cmpi sle, %33, %32 : vector<8x8xi32>
    %35 = vector.extract_strided_slice %29 {offsets = [0, 0], sizes = [8, 16], strides = [1, 1]} : vector<8x128xf32> to vector<8x16xf32>
    %36 = arith.truncf %35 : vector<8x16xf32> to vector<8x16xbf16>
    %37 = vector.extract_strided_slice %30 {offsets = [0, 0], sizes = [8, 16], strides = [1, 1]} : vector<8x128xf32> to vector<8x16xf32>
    %38 = arith.truncf %37 : vector<8x16xf32> to vector<8x16xbf16>
    %39 = vector.extract_strided_slice %31 {offsets = [0, 0], sizes = [8, 16], strides = [1, 1]} : vector<8x128xf32> to vector<8x16xf32>
    %40 = arith.truncf %39 : vector<8x16xf32> to vector<8x16xbf16>
    %cst_14 = arith.constant dense<0.000000e+00> : vector<8x8xf32>
    %41 = tpu.matmul %36, %38, %cst_14 {dimension_numbers = #tpu.dot_dimension_numbers<[1], [1], [0], [0], [0, 0, 1, 0], [], []>} : vector<8x16xbf16>, vector<8x16xbf16>, vector<8x8xf32> -> vector<8x8xf32>
    %cst_15 = arith.constant 0xFF800000 : f32
    %42 = vector.broadcast %cst_15 : f32 to vector<8x8xf32>
    %43 = arith.select %34, %41, %42 : vector<8x8xi1>, vector<8x8xf32>
    %cst_16 = arith.constant dense<0xFF800000> : vector<8xf32>
    %44 = vector.multi_reduction <maximumf>, %43, %cst_16 [1] : vector<8x8xf32> to vector<8xf32>
    %45 = vector.shape_cast %44 : vector<8xf32> to vector<8x1xf32>
    %46 = vector.broadcast %45 : vector<8x1xf32> to vector<8x8xf32>
    %47 = arith.subf %43, %46 : vector<8x8xf32>
    %48 = math.exp %47 : vector<8x8xf32>
    %cst_17 = arith.constant dense<0.000000e+00> : vector<8xf32>
    %49 = vector.multi_reduction <add>, %48, %cst_17 [1] : vector<8x8xf32> to vector<8xf32>
    %50 = vector.shape_cast %49 : vector<8xf32> to vector<8x1xf32>
    %51 = tpu.reciprocal %50 {approx = true} : vector<8x1xf32> -> vector<8x1xf32>
    %52 = vector.broadcast %51 : vector<8x1xf32> to vector<8x8xf32>
    %53 = arith.mulf %48, %52 : vector<8x8xf32>
    %54 = arith.truncf %53 : vector<8x8xf32> to vector<8x8xbf16>
    %cst_18 = arith.constant dense<0.000000e+00> : vector<8x16xf32>
    %55 = tpu.matmul %54, %40, %cst_18 {dimension_numbers = #tpu.dot_dimension_numbers<[1], [0], [0], [1], [0, 0, 1, 1], [], []>} : vector<8x8xbf16>, vector<8x16xbf16>, vector<8x16xf32> -> vector<8x16xf32>
    %56 = vector.extract_strided_slice %29 {offsets = [0, 16], sizes = [8, 16], strides = [1, 1]} : vector<8x128xf32> to vector<8x16xf32>
    %57 = arith.truncf %56 : vector<8x16xf32> to vector<8x16xbf16>
    %58 = vector.extract_strided_slice %30 {offsets = [0, 16], sizes = [8, 16], strides = [1, 1]} : vector<8x128xf32> to vector<8x16xf32>
    %59 = arith.truncf %58 : vector<8x16xf32> to vector<8x16xbf16>
    %60 = vector.extract_strided_slice %31 {offsets = [0, 16], sizes = [8, 16], strides = [1, 1]} : vector<8x128xf32> to vector<8x16xf32>
    %61 = arith.truncf %60 : vector<8x16xf32> to vector<8x16xbf16>
    %cst_19 = arith.constant dense<0.000000e+00> : vector<8x8xf32>
    %62 = tpu.matmul %57, %59, %cst_19 {dimension_numbers = #tpu.dot_dimension_numbers<[1], [1], [0], [0], [0, 0, 1, 0], [], []>} : vector<8x16xbf16>, vector<8x16xbf16>, vector<8x8xf32> -> vector<8x8xf32>
    %cst_20 = arith.constant 0xFF800000 : f32
    %63 = vector.broadcast %cst_20 : f32 to vector<8x8xf32>
    %64 = arith.select %34, %62, %63 : vector<8x8xi1>, vector<8x8xf32>
    %cst_21 = arith.constant dense<0xFF800000> : vector<8xf32>
    %65 = vector.multi_reduction <maximumf>, %64, %cst_21 [1] : vector<8x8xf32> to vector<8xf32>
    %66 = vector.shape_cast %65 : vector<8xf32> to vector<8x1xf32>
    %67 = vector.broadcast %66 : vector<8x1xf32> to vector<8x8xf32>
    %68 = arith.subf %64, %67 : vector<8x8xf32>
    %69 = math.exp %68 : vector<8x8xf32>
    %cst_22 = arith.constant dense<0.000000e+00> : vector<8xf32>
    %70 = vector.multi_reduction <add>, %69, %cst_22 [1] : vector<8x8xf32> to vector<8xf32>
    %71 = vector.shape_cast %70 : vector<8xf32> to vector<8x1xf32>
    %72 = tpu.reciprocal %71 {approx = true} : vector<8x1xf32> -> vector<8x1xf32>
    %73 = vector.broadcast %72 : vector<8x1xf32> to vector<8x8xf32>
    %74 = arith.mulf %69, %73 : vector<8x8xf32>
    %75 = arith.truncf %74 : vector<8x8xf32> to vector<8x8xbf16>
    %cst_23 = arith.constant dense<0.000000e+00> : vector<8x16xf32>
    %76 = tpu.matmul %75, %61, %cst_23 {dimension_numbers = #tpu.dot_dimension_numbers<[1], [0], [0], [1], [0, 0, 1, 1], [], []>} : vector<8x8xbf16>, vector<8x16xbf16>, vector<8x16xf32> -> vector<8x16xf32>
    %77 = vector.extract_strided_slice %29 {offsets = [0, 32], sizes = [8, 16], strides = [1, 1]} : vector<8x128xf32> to vector<8x16xf32>
    %78 = arith.truncf %77 : vector<8x16xf32> to vector<8x16xbf16>
    %79 = vector.extract_strided_slice %30 {offsets = [0, 32], sizes = [8, 16], strides = [1, 1]} : vector<8x128xf32> to vector<8x16xf32>
    %80 = arith.truncf %79 : vector<8x16xf32> to vector<8x16xbf16>
    %81 = vector.extract_strided_slice %31 {offsets = [0, 32], sizes = [8, 16], strides = [1, 1]} : vector<8x128xf32> to vector<8x16xf32>
    %82 = arith.truncf %81 : vector<8x16xf32> to vector<8x16xbf16>
    %cst_24 = arith.constant dense<0.000000e+00> : vector<8x8xf32>
    %83 = tpu.matmul %78, %80, %cst_24 {dimension_numbers = #tpu.dot_dimension_numbers<[1], [1], [0], [0], [0, 0, 1, 0], [], []>} : vector<8x16xbf16>, vector<8x16xbf16>, vector<8x8xf32> -> vector<8x8xf32>
    %cst_25 = arith.constant 0xFF800000 : f32
    %84 = vector.broadcast %cst_25 : f32 to vector<8x8xf32>
    %85 = arith.select %34, %83, %84 : vector<8x8xi1>, vector<8x8xf32>
    %cst_26 = arith.constant dense<0xFF800000> : vector<8xf32>
    %86 = vector.multi_reduction <maximumf>, %85, %cst_26 [1] : vector<8x8xf32> to vector<8xf32>
    %87 = vector.shape_cast %86 : vector<8xf32> to vector<8x1xf32>
    %88 = vector.broadcast %87 : vector<8x1xf32> to vector<8x8xf32>
    %89 = arith.subf %85, %88 : vector<8x8xf32>
    %90 = math.exp %89 : vector<8x8xf32>
    %cst_27 = arith.constant dense<0.000000e+00> : vector<8xf32>
    %91 = vector.multi_reduction <add>, %90, %cst_27 [1] : vector<8x8xf32> to vector<8xf32>
    %92 = vector.shape_cast %91 : vector<8xf32> to vector<8x1xf32>
    %93 = tpu.reciprocal %92 {approx = true} : vector<8x1xf32> -> vector<8x1xf32>
    %94 = vector.broadcast %93 : vector<8x1xf32> to vector<8x8xf32>
    %95 = arith.mulf %90, %94 : vector<8x8xf32>
    %96 = arith.truncf %95 : vector<8x8xf32> to vector<8x8xbf16>
    %cst_28 = arith.constant dense<0.000000e+00> : vector<8x16xf32>
    %97 = tpu.matmul %96, %82, %cst_28 {dimension_numbers = #tpu.dot_dimension_numbers<[1], [0], [0], [1], [0, 0, 1, 1], [], []>} : vector<8x8xbf16>, vector<8x16xbf16>, vector<8x16xf32> -> vector<8x16xf32>
    %98 = vector.extract_strided_slice %29 {offsets = [0, 48], sizes = [8, 16], strides = [1, 1]} : vector<8x128xf32> to vector<8x16xf32>
    %99 = arith.truncf %98 : vector<8x16xf32> to vector<8x16xbf16>
    %100 = vector.extract_strided_slice %30 {offsets = [0, 48], sizes = [8, 16], strides = [1, 1]} : vector<8x128xf32> to vector<8x16xf32>
    %101 = arith.truncf %100 : vector<8x16xf32> to vector<8x16xbf16>
    %102 = vector.extract_strided_slice %31 {offsets = [0, 48], sizes = [8, 16], strides = [1, 1]} : vector<8x128xf32> to vector<8x16xf32>
    %103 = arith.truncf %102 : vector<8x16xf32> to vector<8x16xbf16>
    %cst_29 = arith.constant dense<0.000000e+00> : vector<8x8xf32>
    %104 = tpu.matmul %99, %101, %cst_29 {dimension_numbers = #tpu.dot_dimension_numbers<[1], [1], [0], [0], [0, 0, 1, 0], [], []>} : vector<8x16xbf16>, vector<8x16xbf16>, vector<8x8xf32> -> vector<8x8xf32>
    %cst_30 = arith.constant 0xFF800000 : f32
    %105 = vector.broadcast %cst_30 : f32 to vector<8x8xf32>
    %106 = arith.select %34, %104, %105 : vector<8x8xi1>, vector<8x8xf32>
    %cst_31 = arith.constant dense<0xFF800000> : vector<8xf32>
    %107 = vector.multi_reduction <maximumf>, %106, %cst_31 [1] : vector<8x8xf32> to vector<8xf32>
    %108 = vector.shape_cast %107 : vector<8xf32> to vector<8x1xf32>
    %109 = vector.broadcast %108 : vector<8x1xf32> to vector<8x8xf32>
    %110 = arith.subf %106, %109 : vector<8x8xf32>
    %111 = math.exp %110 : vector<8x8xf32>
    %cst_32 = arith.constant dense<0.000000e+00> : vector<8xf32>
    %112 = vector.multi_reduction <add>, %111, %cst_32 [1] : vector<8x8xf32> to vector<8xf32>
    %113 = vector.shape_cast %112 : vector<8xf32> to vector<8x1xf32>
    %114 = tpu.reciprocal %113 {approx = true} : vector<8x1xf32> -> vector<8x1xf32>
    %115 = vector.broadcast %114 : vector<8x1xf32> to vector<8x8xf32>
    %116 = arith.mulf %111, %115 : vector<8x8xf32>
    %117 = arith.truncf %116 : vector<8x8xf32> to vector<8x8xbf16>
    %cst_33 = arith.constant dense<0.000000e+00> : vector<8x16xf32>
    %118 = tpu.matmul %117, %103, %cst_33 {dimension_numbers = #tpu.dot_dimension_numbers<[1], [0], [0], [1], [0, 0, 1, 1], [], []>} : vector<8x8xbf16>, vector<8x16xbf16>, vector<8x16xf32> -> vector<8x16xf32>
    %119 = vector.extract_strided_slice %29 {offsets = [0, 64], sizes = [8, 16], strides = [1, 1]} : vector<8x128xf32> to vector<8x16xf32>
    %120 = arith.truncf %119 : vector<8x16xf32> to vector<8x16xbf16>
    %121 = vector.extract_strided_slice %30 {offsets = [0, 64], sizes = [8, 16], strides = [1, 1]} : vector<8x128xf32> to vector<8x16xf32>
    %122 = arith.truncf %121 : vector<8x16xf32> to vector<8x16xbf16>
    %123 = vector.extract_strided_slice %31 {offsets = [0, 64], sizes = [8, 16], strides = [1, 1]} : vector<8x128xf32> to vector<8x16xf32>
    %124 = arith.truncf %123 : vector<8x16xf32> to vector<8x16xbf16>
    %cst_34 = arith.constant dense<0.000000e+00> : vector<8x8xf32>
    %125 = tpu.matmul %120, %122, %cst_34 {dimension_numbers = #tpu.dot_dimension_numbers<[1], [1], [0], [0], [0, 0, 1, 0], [], []>} : vector<8x16xbf16>, vector<8x16xbf16>, vector<8x8xf32> -> vector<8x8xf32>
    %cst_35 = arith.constant 0xFF800000 : f32
    %126 = vector.broadcast %cst_35 : f32 to vector<8x8xf32>
    %127 = arith.select %34, %125, %126 : vector<8x8xi1>, vector<8x8xf32>
    %cst_36 = arith.constant dense<0xFF800000> : vector<8xf32>
    %128 = vector.multi_reduction <maximumf>, %127, %cst_36 [1] : vector<8x8xf32> to vector<8xf32>
    %129 = vector.shape_cast %128 : vector<8xf32> to vector<8x1xf32>
    %130 = vector.broadcast %129 : vector<8x1xf32> to vector<8x8xf32>
    %131 = arith.subf %127, %130 : vector<8x8xf32>
    %132 = math.exp %131 : vector<8x8xf32>
    %cst_37 = arith.constant dense<0.000000e+00> : vector<8xf32>
    %133 = vector.multi_reduction <add>, %132, %cst_37 [1] : vector<8x8xf32> to vector<8xf32>
    %134 = vector.shape_cast %133 : vector<8xf32> to vector<8x1xf32>
    %135 = tpu.reciprocal %134 {approx = true} : vector<8x1xf32> -> vector<8x1xf32>
    %136 = vector.broadcast %135 : vector<8x1xf32> to vector<8x8xf32>
    %137 = arith.mulf %132, %136 : vector<8x8xf32>
    %138 = arith.truncf %137 : vector<8x8xf32> to vector<8x8xbf16>
    %cst_38 = arith.constant dense<0.000000e+00> : vector<8x16xf32>
    %139 = tpu.matmul %138, %124, %cst_38 {dimension_numbers = #tpu.dot_dimension_numbers<[1], [0], [0], [1], [0, 0, 1, 1], [], []>} : vector<8x8xbf16>, vector<8x16xbf16>, vector<8x16xf32> -> vector<8x16xf32>
    %140 = vector.extract_strided_slice %29 {offsets = [0, 80], sizes = [8, 16], strides = [1, 1]} : vector<8x128xf32> to vector<8x16xf32>
    %141 = arith.truncf %140 : vector<8x16xf32> to vector<8x16xbf16>
    %142 = vector.extract_strided_slice %30 {offsets = [0, 80], sizes = [8, 16], strides = [1, 1]} : vector<8x128xf32> to vector<8x16xf32>
    %143 = arith.truncf %142 : vector<8x16xf32> to vector<8x16xbf16>
    %144 = vector.extract_strided_slice %31 {offsets = [0, 80], sizes = [8, 16], strides = [1, 1]} : vector<8x128xf32> to vector<8x16xf32>
    %145 = arith.truncf %144 : vector<8x16xf32> to vector<8x16xbf16>
    %cst_39 = arith.constant dense<0.000000e+00> : vector<8x8xf32>
    %146 = tpu.matmul %141, %143, %cst_39 {dimension_numbers = #tpu.dot_dimension_numbers<[1], [1], [0], [0], [0, 0, 1, 0], [], []>} : vector<8x16xbf16>, vector<8x16xbf16>, vector<8x8xf32> -> vector<8x8xf32>
    %cst_40 = arith.constant 0xFF800000 : f32
    %147 = vector.broadcast %cst_40 : f32 to vector<8x8xf32>
    %148 = arith.select %34, %146, %147 : vector<8x8xi1>, vector<8x8xf32>
    %cst_41 = arith.constant dense<0xFF800000> : vector<8xf32>
    %149 = vector.multi_reduction <maximumf>, %148, %cst_41 [1] : vector<8x8xf32> to vector<8xf32>
    %150 = vector.shape_cast %149 : vector<8xf32> to vector<8x1xf32>
    %151 = vector.broadcast %150 : vector<8x1xf32> to vector<8x8xf32>
    %152 = arith.subf %148, %151 : vector<8x8xf32>
    %153 = math.exp %152 : vector<8x8xf32>
    %cst_42 = arith.constant dense<0.000000e+00> : vector<8xf32>
    %154 = vector.multi_reduction <add>, %153, %cst_42 [1] : vector<8x8xf32> to vector<8xf32>
    %155 = vector.shape_cast %154 : vector<8xf32> to vector<8x1xf32>
    %156 = tpu.reciprocal %155 {approx = true} : vector<8x1xf32> -> vector<8x1xf32>
    %157 = vector.broadcast %156 : vector<8x1xf32> to vector<8x8xf32>
    %158 = arith.mulf %153, %157 : vector<8x8xf32>
    %159 = arith.truncf %158 : vector<8x8xf32> to vector<8x8xbf16>
    %cst_43 = arith.constant dense<0.000000e+00> : vector<8x16xf32>
    %160 = tpu.matmul %159, %145, %cst_43 {dimension_numbers = #tpu.dot_dimension_numbers<[1], [0], [0], [1], [0, 0, 1, 1], [], []>} : vector<8x8xbf16>, vector<8x16xbf16>, vector<8x16xf32> -> vector<8x16xf32>
    %161 = vector.extract_strided_slice %29 {offsets = [0, 96], sizes = [8, 16], strides = [1, 1]} : vector<8x128xf32> to vector<8x16xf32>
    %162 = arith.truncf %161 : vector<8x16xf32> to vector<8x16xbf16>
    %163 = vector.extract_strided_slice %30 {offsets = [0, 96], sizes = [8, 16], strides = [1, 1]} : vector<8x128xf32> to vector<8x16xf32>
    %164 = arith.truncf %163 : vector<8x16xf32> to vector<8x16xbf16>
    %165 = vector.extract_strided_slice %31 {offsets = [0, 96], sizes = [8, 16], strides = [1, 1]} : vector<8x128xf32> to vector<8x16xf32>
    %166 = arith.truncf %165 : vector<8x16xf32> to vector<8x16xbf16>
    %cst_44 = arith.constant dense<0.000000e+00> : vector<8x8xf32>
    %167 = tpu.matmul %162, %164, %cst_44 {dimension_numbers = #tpu.dot_dimension_numbers<[1], [1], [0], [0], [0, 0, 1, 0], [], []>} : vector<8x16xbf16>, vector<8x16xbf16>, vector<8x8xf32> -> vector<8x8xf32>
    %cst_45 = arith.constant 0xFF800000 : f32
    %168 = vector.broadcast %cst_45 : f32 to vector<8x8xf32>
    %169 = arith.select %34, %167, %168 : vector<8x8xi1>, vector<8x8xf32>
    %cst_46 = arith.constant dense<0xFF800000> : vector<8xf32>
    %170 = vector.multi_reduction <maximumf>, %169, %cst_46 [1] : vector<8x8xf32> to vector<8xf32>
    %171 = vector.shape_cast %170 : vector<8xf32> to vector<8x1xf32>
    %172 = vector.broadcast %171 : vector<8x1xf32> to vector<8x8xf32>
    %173 = arith.subf %169, %172 : vector<8x8xf32>
    %174 = math.exp %173 : vector<8x8xf32>
    %cst_47 = arith.constant dense<0.000000e+00> : vector<8xf32>
    %175 = vector.multi_reduction <add>, %174, %cst_47 [1] : vector<8x8xf32> to vector<8xf32>
    %176 = vector.shape_cast %175 : vector<8xf32> to vector<8x1xf32>
    %177 = tpu.reciprocal %176 {approx = true} : vector<8x1xf32> -> vector<8x1xf32>
    %178 = vector.broadcast %177 : vector<8x1xf32> to vector<8x8xf32>
    %179 = arith.mulf %174, %178 : vector<8x8xf32>
    %180 = arith.truncf %179 : vector<8x8xf32> to vector<8x8xbf16>
    %cst_48 = arith.constant dense<0.000000e+00> : vector<8x16xf32>
    %181 = tpu.matmul %180, %166, %cst_48 {dimension_numbers = #tpu.dot_dimension_numbers<[1], [0], [0], [1], [0, 0, 1, 1], [], []>} : vector<8x8xbf16>, vector<8x16xbf16>, vector<8x16xf32> -> vector<8x16xf32>
    %182 = vector.extract_strided_slice %29 {offsets = [0, 112], sizes = [8, 16], strides = [1, 1]} : vector<8x128xf32> to vector<8x16xf32>
    %183 = arith.truncf %182 : vector<8x16xf32> to vector<8x16xbf16>
    %184 = vector.extract_strided_slice %30 {offsets = [0, 112], sizes = [8, 16], strides = [1, 1]} : vector<8x128xf32> to vector<8x16xf32>
    %185 = arith.truncf %184 : vector<8x16xf32> to vector<8x16xbf16>
    %186 = vector.extract_strided_slice %31 {offsets = [0, 112], sizes = [8, 16], strides = [1, 1]} : vector<8x128xf32> to vector<8x16xf32>
    %187 = arith.truncf %186 : vector<8x16xf32> to vector<8x16xbf16>
    %cst_49 = arith.constant dense<0.000000e+00> : vector<8x8xf32>
    %188 = tpu.matmul %183, %185, %cst_49 {dimension_numbers = #tpu.dot_dimension_numbers<[1], [1], [0], [0], [0, 0, 1, 0], [], []>} : vector<8x16xbf16>, vector<8x16xbf16>, vector<8x8xf32> -> vector<8x8xf32>
    %cst_50 = arith.constant 0xFF800000 : f32
    %189 = vector.broadcast %cst_50 : f32 to vector<8x8xf32>
    %190 = arith.select %34, %188, %189 : vector<8x8xi1>, vector<8x8xf32>
    %cst_51 = arith.constant dense<0xFF800000> : vector<8xf32>
    %191 = vector.multi_reduction <maximumf>, %190, %cst_51 [1] : vector<8x8xf32> to vector<8xf32>
    %192 = vector.shape_cast %191 : vector<8xf32> to vector<8x1xf32>
    %193 = vector.broadcast %192 : vector<8x1xf32> to vector<8x8xf32>
    %194 = arith.subf %190, %193 : vector<8x8xf32>
    %195 = math.exp %194 : vector<8x8xf32>
    %cst_52 = arith.constant dense<0.000000e+00> : vector<8xf32>
    %196 = vector.multi_reduction <add>, %195, %cst_52 [1] : vector<8x8xf32> to vector<8xf32>
    %197 = vector.shape_cast %196 : vector<8xf32> to vector<8x1xf32>
    %198 = tpu.reciprocal %197 {approx = true} : vector<8x1xf32> -> vector<8x1xf32>
    %199 = vector.broadcast %198 : vector<8x1xf32> to vector<8x8xf32>
    %200 = arith.mulf %195, %199 : vector<8x8xf32>
    %201 = arith.truncf %200 : vector<8x8xf32> to vector<8x8xbf16>
    %cst_53 = arith.constant dense<0.000000e+00> : vector<8x16xf32>
    %202 = tpu.matmul %201, %187, %cst_53 {dimension_numbers = #tpu.dot_dimension_numbers<[1], [0], [0], [1], [0, 0, 1, 1], [], []>} : vector<8x8xbf16>, vector<8x16xbf16>, vector<8x16xf32> -> vector<8x16xf32>
    %203 = tpu.concatenate %55, %76, %97, %118, %139, %160, %181, %202 in 1 : vector<8x16xf32>, vector<8x16xf32>, vector<8x16xf32>, vector<8x16xf32>, vector<8x16xf32>, vector<8x16xf32>, vector<8x16xf32>, vector<8x16xf32> -> vector<8x128xf32>
    %204 = arith.truncf %203 : vector<8x128xf32> to vector<8x128xbf16>
    %c0_54 = arith.constant 0 : index
    %c0_55 = arith.constant 0 : index
    %205 = vector.load %arg6[%c0_54, %c0_55] : memref<128x128xbf16, #tpu.memory_space<vmem>>, vector<128x128xbf16>
    %cst_56 = arith.constant dense<0.000000e+00> : vector<8x128xf32>
    %206 = tpu.matmul %204, %205, %cst_56 {dimension_numbers = #tpu.dot_dimension_numbers<[1], [0], [0], [1], [0, 0, 1, 1], [], []>} : vector<8x128xbf16>, vector<128x128xbf16>, vector<8x128xf32> -> vector<8x128xf32>
    %c0_57 = arith.constant 0 : index
    %c0_58 = arith.constant 0 : index
    %207 = vector.load %arg7[%c0_57, %c0_58] : memref<1x128xf32, #tpu.memory_space<vmem>>, vector<1x128xf32>
    %208 = vector.broadcast %207 : vector<1x128xf32> to vector<8x128xf32>
    %209 = arith.addf %206, %208 : vector<8x128xf32>
    %210 = arith.addf %1, %209 : vector<8x128xf32>
    %c0_59 = arith.constant 0 : index
    %c0_60 = arith.constant 0 : index
    %211 = vector.load %arg8[%c0_59, %c0_60] : memref<1x128xf32, #tpu.memory_space<vmem>>, vector<1x128xf32>
    %c0_61 = arith.constant 0 : index
    %c0_62 = arith.constant 0 : index
    %212 = vector.load %arg9[%c0_61, %c0_62] : memref<1x128xf32, #tpu.memory_space<vmem>>, vector<1x128xf32>
    %cst_63 = arith.constant dense<0.000000e+00> : vector<8xf32>
    %213 = vector.multi_reduction <add>, %210, %cst_63 [1] : vector<8x128xf32> to vector<8xf32>
    %214 = vector.shape_cast %213 : vector<8xf32> to vector<8x1xf32>
    %cst_64 = arith.constant 1.280000e+02 : f32
    %215 = vector.broadcast %cst_64 : f32 to vector<8x1xf32>
    %216 = arith.divf %214, %215 : vector<8x1xf32>
    %217 = vector.broadcast %216 : vector<8x1xf32> to vector<8x128xf32>
    %218 = arith.subf %210, %217 : vector<8x128xf32>
    %219 = arith.mulf %218, %218 : vector<8x128xf32>
    %cst_65 = arith.constant dense<0.000000e+00> : vector<8xf32>
    %220 = vector.multi_reduction <add>, %219, %cst_65 [1] : vector<8x128xf32> to vector<8xf32>
    %221 = vector.shape_cast %220 : vector<8xf32> to vector<8x1xf32>
    %cst_66 = arith.constant 1.280000e+02 : f32
    %222 = vector.broadcast %cst_66 : f32 to vector<8x1xf32>
    %223 = arith.divf %221, %222 : vector<8x1xf32>
    %cst_67 = arith.constant 9.99999974E-6 : f32
    %224 = vector.broadcast %cst_67 : f32 to vector<8x1xf32>
    %225 = arith.addf %223, %224 : vector<8x1xf32>
    %226 = math.rsqrt %225 : vector<8x1xf32>
    %227 = vector.broadcast %226 : vector<8x1xf32> to vector<8x128xf32>
    %228 = arith.mulf %218, %227 : vector<8x128xf32>
    %229 = vector.broadcast %211 : vector<1x128xf32> to vector<8x128xf32>
    %230 = arith.mulf %228, %229 : vector<8x128xf32>
    %231 = vector.broadcast %212 : vector<1x128xf32> to vector<8x128xf32>
    %232 = arith.addf %230, %231 : vector<8x128xf32>
    %233 = arith.truncf %232 : vector<8x128xf32> to vector<8x128xbf16>
    %c0_68 = arith.constant 0 : index
    %c0_69 = arith.constant 0 : index
    %234 = vector.load %arg10[%c0_68, %c0_69] : memref<128x512xbf16, #tpu.memory_space<vmem>>, vector<128x512xbf16>
    %cst_70 = arith.constant dense<0.000000e+00> : vector<8x512xf32>
    %235 = tpu.matmul %233, %234, %cst_70 {dimension_numbers = #tpu.dot_dimension_numbers<[1], [0], [0], [1], [0, 0, 1, 1], [], []>} : vector<8x128xbf16>, vector<128x512xbf16>, vector<8x512xf32> -> vector<8x512xf32>
    %c0_71 = arith.constant 0 : index
    %c0_72 = arith.constant 0 : index
    %236 = vector.load %arg11[%c0_71, %c0_72] : memref<1x512xf32, #tpu.memory_space<vmem>>, vector<1x512xf32>
    %237 = vector.broadcast %236 : vector<1x512xf32> to vector<8x512xf32>
    %238 = arith.addf %235, %237 : vector<8x512xf32>
    %cst_73 = arith.constant 0.000000e+00 : f32
    %239 = vector.broadcast %cst_73 : f32 to vector<8x512xf32>
    %240 = arith.maximumf %238, %239 : vector<8x512xf32>
    %241 = arith.truncf %240 : vector<8x512xf32> to vector<8x512xbf16>
    %c0_74 = arith.constant 0 : index
    %c0_75 = arith.constant 0 : index
    %242 = vector.load %arg12[%c0_74, %c0_75] : memref<512x128xbf16, #tpu.memory_space<vmem>>, vector<512x128xbf16>
    %cst_76 = arith.constant dense<0.000000e+00> : vector<8x128xf32>
    %243 = tpu.matmul %241, %242, %cst_76 {dimension_numbers = #tpu.dot_dimension_numbers<[1], [0], [0], [1], [0, 0, 1, 1], [], []>} : vector<8x512xbf16>, vector<512x128xbf16>, vector<8x128xf32> -> vector<8x128xf32>
    %c0_77 = arith.constant 0 : index
    %c0_78 = arith.constant 0 : index
    %244 = vector.load %arg13[%c0_77, %c0_78] : memref<1x128xf32, #tpu.memory_space<vmem>>, vector<1x128xf32>
    %245 = vector.broadcast %244 : vector<1x128xf32> to vector<8x128xf32>
    %246 = arith.addf %243, %245 : vector<8x128xf32>
    %247 = arith.addf %210, %246 : vector<8x128xf32>
    %c0_79 = arith.constant 0 : index
    %c0_80 = arith.constant 0 : index
    %c0_81 = arith.constant 0 : index
    %248 = vector.load %arg14[%c0_79, %c0_80, %c0_81] : memref<1x8x128xf32, #tpu.memory_space<vmem>>, vector<1x8x128xf32>
    %249 = vector.shape_cast %248 : vector<1x8x128xf32> to vector<8x128xf32>
    %250 = vector.shape_cast %247 : vector<8x128xf32> to vector<1x8x128xf32>
    tpu.vector_store %arg14[%c0_79, %c0_80, %c0_81], %250 {strides = array<i32>} : memref<1x8x128xf32, #tpu.memory_space<vmem>>, vector<1x8x128xf32>,
    return
  }
  func.func @transform_0(%arg0: i32, %arg1: memref<1xi32, #tpu.memory_space<smem>>) -> (i32, i32, i32) {
    %c0_i32 = arith.constant 0 : i32
    %c0_i32_0 = arith.constant 0 : i32
    %c0_i32_1 = arith.constant 0 : i32
    return %arg0, %c0_i32, %c0_i32_0 : i32, i32, i32
  }
  func.func @transform_1(%arg0: i32, %arg1: memref<1xi32, #tpu.memory_space<smem>>) -> (i32, i32) {
    %c0_i32 = arith.constant 0 : i32
    %c0_i32_0 = arith.constant 0 : i32
    %c0_i32_1 = arith.constant 0 : i32
    return %c0_i32, %c0_i32_0 : i32, i32
  }
  func.func @transform_2(%arg0: i32, %arg1: memref<1xi32, #tpu.memory_space<smem>>) -> (i32, i32) {
    %c0_i32 = arith.constant 0 : i32
    %c0_i32_0 = arith.constant 0 : i32
    %c0_i32_1 = arith.constant 0 : i32
    return %c0_i32, %c0_i32_0 : i32, i32
  }
  func.func @transform_3(%arg0: i32, %arg1: memref<1xi32, #tpu.memory_space<smem>>) -> (i32, i32) {
    %c0_i32 = arith.constant 0 : i32
    %c0_i32_0 = arith.constant 0 : i32
    %c0_i32_1 = arith.constant 0 : i32
    return %c0_i32, %c0_i32_0 : i32, i32
  }
  func.func @transform_4(%arg0: i32, %arg1: memref<1xi32, #tpu.memory_space<smem>>) -> (i32, i32) {
    %c0_i32 = arith.constant 0 : i32
    %c0_i32_0 = arith.constant 0 : i32
    %c0_i32_1 = arith.constant 0 : i32
    return %c0_i32, %c0_i32_0 : i32, i32
  }
  func.func @transform_5(%arg0: i32, %arg1: memref<1xi32, #tpu.memory_space<smem>>) -> (i32, i32) {
    %c0_i32 = arith.constant 0 : i32
    %c0_i32_0 = arith.constant 0 : i32
    %c0_i32_1 = arith.constant 0 : i32
    return %c0_i32, %c0_i32_0 : i32, i32
  }
  func.func @transform_6(%arg0: i32, %arg1: memref<1xi32, #tpu.memory_space<smem>>) -> (i32, i32) {
    %c0_i32 = arith.constant 0 : i32
    %c0_i32_0 = arith.constant 0 : i32
    %c0_i32_1 = arith.constant 0 : i32
    return %c0_i32, %c0_i32_0 : i32, i32
  }
  func.func @transform_7(%arg0: i32, %arg1: memref<1xi32, #tpu.memory_space<smem>>) -> (i32, i32) {
    %c0_i32 = arith.constant 0 : i32
    %c0_i32_0 = arith.constant 0 : i32
    %c0_i32_1 = arith.constant 0 : i32
    return %c0_i32, %c0_i32_0 : i32, i32
  }
  func.func @transform_8(%arg0: i32, %arg1: memref<1xi32, #tpu.memory_space<smem>>) -> (i32, i32) {
    %c0_i32 = arith.constant 0 : i32
    %c0_i32_0 = arith.constant 0 : i32
    %c0_i32_1 = arith.constant 0 : i32
    return %c0_i32, %c0_i32_0 : i32, i32
  }
  func.func @transform_9(%arg0: i32, %arg1: memref<1xi32, #tpu.memory_space<smem>>) -> (i32, i32) {
    %c0_i32 = arith.constant 0 : i32
    %c0_i32_0 = arith.constant 0 : i32
    %c0_i32_1 = arith.constant 0 : i32
    return %c0_i32, %c0_i32_0 : i32, i32
  }
  func.func @transform_10(%arg0: i32, %arg1: memref<1xi32, #tpu.memory_space<smem>>) -> (i32, i32) {
    %c0_i32 = arith.constant 0 : i32
    %c0_i32_0 = arith.constant 0 : i32
    %c0_i32_1 = arith.constant 0 : i32
    return %c0_i32, %c0_i32_0 : i32, i32
  }
  func.func @transform_11(%arg0: i32, %arg1: memref<1xi32, #tpu.memory_space<smem>>) -> (i32, i32) {
    %c0_i32 = arith.constant 0 : i32
    %c0_i32_0 = arith.constant 0 : i32
    %c0_i32_1 = arith.constant 0 : i32
    return %c0_i32, %c0_i32_0 : i32, i32
  }
  func.func @transform_12(%arg0: i32, %arg1: memref<1xi32, #tpu.memory_space<smem>>) -> (i32, i32, i32) {
    %c0_i32 = arith.constant 0 : i32
    %c0_i32_0 = arith.constant 0 : i32
    %c0_i32_1 = arith.constant 0 : i32
    return %arg0, %c0_i32, %c0_i32_0 : i32, i32, i32
  }
}

module attributes {stable_mosaic.version = 11 : i64} {
  func.func @_block_kernel(%arg0: i32, %arg1: memref<1xi32, #tpu.memory_space<smem>>, %arg2: memref<1x8x128xf32, #tpu.memory_space<vmem>>, %arg3: memref<1x128xf32, #tpu.memory_space<vmem>>, %arg4: memref<1x128xf32, #tpu.memory_space<vmem>>, %arg5: memref<128x384xbf16, #tpu.memory_space<vmem>>, %arg6: memref<128x128xbf16, #tpu.memory_space<vmem>>, %arg7: memref<1x128xf32, #tpu.memory_space<vmem>>, %arg8: memref<1x128xf32, #tpu.memory_space<vmem>>, %arg9: memref<1x128xf32, #tpu.memory_space<vmem>>, %arg10: memref<128x512xbf16, #tpu.memory_space<vmem>>, %arg11: memref<1x512xf32, #tpu.memory_space<vmem>>, %arg12: memref<512x128xbf16, #tpu.memory_space<vmem>>, %arg13: memref<1x128xf32, #tpu.memory_space<vmem>>, %arg14: memref<1x8x128xf32, #tpu.memory_space<vmem>>) attributes {dimension_semantics = [#tpu.dimension_semantics<parallel>], iteration_bounds = array<i64: 2>, scalar_prefetch = 1 : i64, scratch_operands = 0 : i64, tpu.core_type = #tpu.core_type<tc>, window_params = [{transform_indices = @transform_0, window_bounds = array<i64: 1, 8, 128>}, {pipeline_mode = #tpu.pipeline_mode<synchronous>, transform_indices = @transform_1, window_bounds = array<i64: 1, 128>}, {pipeline_mode = #tpu.pipeline_mode<synchronous>, transform_indices = @transform_2, window_bounds = array<i64: 1, 128>}, {pipeline_mode = #tpu.pipeline_mode<synchronous>, transform_indices = @transform_3, window_bounds = array<i64: 128, 384>}, {pipeline_mode = #tpu.pipeline_mode<synchronous>, transform_indices = @transform_4, window_bounds = array<i64: 128, 128>}, {pipeline_mode = #tpu.pipeline_mode<synchronous>, transform_indices = @transform_5, window_bounds = array<i64: 1, 128>}, {pipeline_mode = #tpu.pipeline_mode<synchronous>, transform_indices = @transform_6, window_bounds = array<i64: 1, 128>}, {pipeline_mode = #tpu.pipeline_mode<synchronous>, transform_indices = @transform_7, window_bounds = array<i64: 1, 128>}, {pipeline_mode = #tpu.pipeline_mode<synchronous>, transform_indices = @transform_8, window_bounds = array<i64: 128, 512>}, {pipeline_mode = #tpu.pipeline_mode<synchronous>, transform_indices = @transform_9, window_bounds = array<i64: 1, 512>}, {pipeline_mode = #tpu.pipeline_mode<synchronous>, transform_indices = @transform_10, window_bounds = array<i64: 512, 128>}, {pipeline_mode = #tpu.pipeline_mode<synchronous>, transform_indices = @transform_11, window_bounds = array<i64: 1, 128>}, {transform_indices = @transform_12, window_bounds = array<i64: 1, 8, 128>}]} {
    %c0 = arith.constant 0 : index
    %c0_0 = arith.constant 0 : index
    %c0_1 = arith.constant 0 : index
    %0 = vector.load %arg2[%c0, %c0_0, %c0_1] : memref<1x8x128xf32, #tpu.memory_space<vmem>>, vector<1x8x128xf32>
    %1 = vector.shape_cast %0 : vector<1x8x128xf32> to vector<8x128xf32>
    %c0_2 = arith.constant 0 : index
    %c0_3 = arith.constant 0 : index
    %2 = vector.load %arg3[%c0_2, %c0_3] : memref<1x128xf32, #tpu.memory_space<vmem>>, vector<1x128xf32>
    %c0_4 = arith.constant 0 : index
    %c0_5 = arith.constant 0 : index
    %3 = vector.load %arg4[%c0_4, %c0_5] : memref<1x128xf32, #tpu.memory_space<vmem>>, vector<1x128xf32>
    %cst = arith.constant dense<0.000000e+00> : vector<8xf32>
    %4 = vector.multi_reduction <add>, %1, %cst [1] : vector<8x128xf32> to vector<8xf32>
    %5 = vector.shape_cast %4 : vector<8xf32> to vector<8x1xf32>
    %cst_6 = arith.constant 1.280000e+02 : f32
    %6 = vector.broadcast %cst_6 : f32 to vector<8x1xf32>
    %7 = arith.divf %5, %6 : vector<8x1xf32>
    %8 = vector.broadcast %7 : vector<8x1xf32> to vector<8x128xf32>
    %9 = arith.subf %1, %8 : vector<8x128xf32>
    %10 = arith.mulf %9, %9 : vector<8x128xf32>
    %cst_7 = arith.constant dense<0.000000e+00> : vector<8xf32>
    %11 = vector.multi_reduction <add>, %10, %cst_7 [1] : vector<8x128xf32> to vector<8xf32>
    %12 = vector.shape_cast %11 : vector<8xf32> to vector<8x1xf32>
    %cst_8 = arith.constant 1.280000e+02 : f32
    %13 = vector.broadcast %cst_8 : f32 to vector<8x1xf32>
    %14 = arith.divf %12, %13 : vector<8x1xf32>
    %cst_9 = arith.constant 9.99999974E-6 : f32
    %15 = vector.broadcast %cst_9 : f32 to vector<8x1xf32>
    %16 = arith.addf %14, %15 : vector<8x1xf32>
    %17 = math.rsqrt %16 : vector<8x1xf32>
    %18 = vector.broadcast %17 : vector<8x1xf32> to vector<8x128xf32>
    %19 = arith.mulf %9, %18 : vector<8x128xf32>
    %20 = vector.broadcast %2 : vector<1x128xf32> to vector<8x128xf32>
    %21 = arith.mulf %19, %20 : vector<8x128xf32>
    %22 = vector.broadcast %3 : vector<1x128xf32> to vector<8x128xf32>
    %23 = arith.addf %21, %22 : vector<8x128xf32>
    %24 = arith.truncf %23 : vector<8x128xf32> to vector<8x128xbf16>
    %c0_10 = arith.constant 0 : index
    %c0_11 = arith.constant 0 : index
    %25 = vector.load %arg5[%c0_10, %c0_11] : memref<128x384xbf16, #tpu.memory_space<vmem>>, vector<128x384xbf16>
    %cst_12 = arith.constant dense<0.000000e+00> : vector<8x384xf32>
    %26 = tpu.matmul %24, %25, %cst_12 {dimension_numbers = #tpu.dot_dimension_numbers<[1], [0], [0], [1], [0, 0, 1, 1], [], []>} : vector<8x128xbf16>, vector<128x384xbf16>, vector<8x384xf32> -> vector<8x384xf32>
    %27 = vector.extract_strided_slice %26 {offsets = [0, 0], sizes = [8, 128], strides = [1, 1]} : vector<8x384xf32> to vector<8x128xf32>
    %cst_13 = arith.constant 2.500000e-01 : f32
    %28 = vector.broadcast %cst_13 : f32 to vector<8x128xf32>
    %29 = arith.mulf %27, %28 : vector<8x128xf32>
    %30 = vector.extract_strided_slice %26 {offsets = [0, 128], sizes = [8, 128], strides = [1, 1]} : vector<8x384xf32> to vector<8x128xf32>
    %31 = vector.extract_strided_slice %26 {offsets = [0, 256], sizes = [8, 128], strides = [1, 1]} : vector<8x384xf32> to vector<8x128xf32>
    %32 = tpu.iota {dimensions = array<i32: 0>} : vector<8x8xi32>
    %33 = tpu.iota {dimensions = array<i32: 1>} : vector<8x8xi32>
    %34 = arith.cmpi sle, %33, %32 : vector<8x8xi32>
    %35 = vector.extract_strided_slice %29 {offsets = [0, 0], sizes = [8, 16], strides = [1, 1]} : vector<8x128xf32> to vector<8x16xf32>
    %36 = arith.truncf %35 : vector<8x16xf32> to vector<8x16xbf16>
    %37 = vector.extract_strided_slice %30 {offsets = [0, 0], sizes = [8, 16], strides = [1, 1]} : vector<8x128xf32> to vector<8x16xf32>
    %38 = arith.truncf %37 : vector<8x16xf32> to vector<8x16xbf16>
    %39 = vector.extract_strided_slice %31 {offsets = [0, 0], sizes = [8, 16], strides = [1, 1]} : vector<8x128xf32> to vector<8x16xf32>
    %40 = arith.truncf %39 : vector<8x16xf32> to vector<8x16xbf16>
    %cst_14 = arith.constant dense<0.000000e+00> : vector<8x8xf32>
    %41 = tpu.matmul %36, %38, %cst_14 {dimension_numbers = #tpu.dot_dimension_numbers<[1], [1], [0], [0], [0, 0, 1, 0], [], []>} : vector<8x16xbf16>, vector<8x16xbf16>, vector<8x8xf32> -> vector<8x8xf32>
    %cst_15 = arith.constant 0xFF800000 : f32
    %42 = vector.broadcast %cst_15 : f32 to vector<8x8xf32>
    %43 = arith.select %34, %41, %42 : vector<8x8xi1>, vector<8x8xf32>
    %cst_16 = arith.constant dense<0xFF800000> : vector<8xf32>
    %44 = vector.multi_reduction <maximumf>, %43, %cst_16 [1] : vector<8x8xf32> to vector<8xf32>
    %45 = vector.shape_cast %44 : vector<8xf32> to vector<8x1xf32>
    %46 = vector.broadcast %45 : vector<8x1xf32> to vector<8x8xf32>
    %47 = arith.subf %43, %46 : vector<8x8xf32>
    %48 = math.exp %47 : vector<8x8xf32>
    %cst_17 = arith.constant dense<0.000000e+00> : vector<8xf32>
    %49 = vector.multi_reduction <add>, %48, %cst_17 [1] : vector<8x8xf32> to vector<8xf32>
    %50 = vector.shape_cast %49 : vector<8xf32> to vector<8x1xf32>
    %51 = tpu.reciprocal %50 {approx = true} : vector<8x1xf32> -> vector<8x1xf32>
    %52 = vector.broadcast %51 : vector<8x1xf32> to vector<8x8xf32>
    %53 = arith.mulf %48, %52 : vector<8x8xf32>
    %54 = arith.truncf %53 : vector<8x8xf32> to vector<8x8xbf16>
    %cst_18 = arith.constant dense<0.000000e+00> : vector<8x16xf32>
    %55 = tpu.matmul %54, %40, %cst_18 {dimension_numbers = #tpu.dot_dimension_numbers<[1], [0], [0], [1], [0, 0, 1, 1], [], []>} : vector<8x8xbf16>, vector<8x16xbf16>, vector<8x16xf32> -> vector<8x16xf32>
    %56 = vector.extract_strided_slice %29 {offsets = [0, 16], sizes = [8, 16], strides = [1, 1]} : vector<8x128xf32> to vector<8x16xf32>
    %57 = arith.truncf %56 : vector<8x16xf32> to vector<8x16xbf16>
    %58 = vector.extract_strided_slice %30 {offsets = [0, 16], sizes = [8, 16], strides = [1, 1]} : vector<8x128xf32> to vector<8x16xf32>
    %59 = arith.truncf %58 : vector<8x16xf32> to vector<8x16xbf16>
    %60 = vector.extract_strided_slice %31 {offsets = [0, 16], sizes = [8, 16], strides = [1, 1]} : vector<8x128xf32> to vector<8x16xf32>
    %61 = arith.truncf %60 : vector<8x16xf32> to vector<8x16xbf16>
    %cst_19 = arith.constant dense<0.000000e+00> : vector<8x8xf32>
    %62 = tpu.matmul %57, %59, %cst_19 {dimension_numbers = #tpu.dot_dimension_numbers<[1], [1], [0], [0], [0, 0, 1, 0], [], []>} : vector<8x16xbf16>, vector<8x16xbf16>, vector<8x8xf32> -> vector<8x8xf32>
    %cst_20 = arith.constant 0xFF800000 : f32
    %63 = vector.broadcast %cst_20 : f32 to vector<8x8xf32>
    %64 = arith.select %34, %62, %63 : vector<8x8xi1>, vector<8x8xf32>
    %cst_21 = arith.constant dense<0xFF800000> : vector<8xf32>
    %65 = vector.multi_reduction <maximumf>, %64, %cst_21 [1] : vector<8x8xf32> to vector<8xf32>
    %66 = vector.shape_cast %65 : vector<8xf32> to vector<8x1xf32>
    %67 = vector.broadcast %66 : vector<8x1xf32> to vector<8x8xf32>
    %68 = arith.subf %64, %67 : vector<8x8xf32>
    %69 = math.exp %68 : vector<8x8xf32>
    %cst_22 = arith.constant dense<0.000000e+00> : vector<8xf32>
    %70 = vector.multi_reduction <add>, %69, %cst_22 [1] : vector<8x8xf32> to vector<8xf32>
    %71 = vector.shape_cast %70 : vector<8xf32> to vector<8x1xf32>
    %72 = tpu.reciprocal %71 {approx = true} : vector<8x1xf32> -> vector<8x1xf32>
    %73 = vector.broadcast %72 : vector<8x1xf32> to vector<8x8xf32>
    %74 = arith.mulf %69, %73 : vector<8x8xf32>
    %75 = arith.truncf %74 : vector<8x8xf32> to vector<8x8xbf16>
    %cst_23 = arith.constant dense<0.000000e+00> : vector<8x16xf32>
    %76 = tpu.matmul %75, %61, %cst_23 {dimension_numbers = #tpu.dot_dimension_numbers<[1], [0], [0], [1], [0, 0, 1, 1], [], []>} : vector<8x8xbf16>, vector<8x16xbf16>, vector<8x16xf32> -> vector<8x16xf32>
    %77 = vector.extract_strided_slice %29 {offsets = [0, 32], sizes = [8, 16], strides = [1, 1]} : vector<8x128xf32> to vector<8x16xf32>
    %78 = arith.truncf %77 : vector<8x16xf32> to vector<8x16xbf16>
    %79 = vector.extract_strided_slice %30 {offsets = [0, 32], sizes = [8, 16], strides = [1, 1]} : vector<8x128xf32> to vector<8x16xf32>
    %80 = arith.truncf %79 : vector<8x16xf32> to vector<8x16xbf16>
    %81 = vector.extract_strided_slice %31 {offsets = [0, 32], sizes = [8, 16], strides = [1, 1]} : vector<8x128xf32> to vector<8x16xf32>
    %82 = arith.truncf %81 : vector<8x16xf32> to vector<8x16xbf16>
    %cst_24 = arith.constant dense<0.000000e+00> : vector<8x8xf32>
    %83 = tpu.matmul %78, %80, %cst_24 {dimension_numbers = #tpu.dot_dimension_numbers<[1], [1], [0], [0], [0, 0, 1, 0], [], []>} : vector<8x16xbf16>, vector<8x16xbf16>, vector<8x8xf32> -> vector<8x8xf32>
    %cst_25 = arith.constant 0xFF800000 : f32
    %84 = vector.broadcast %cst_25 : f32 to vector<8x8xf32>
    %85 = arith.select %34, %83, %84 : vector<8x8xi1>, vector<8x8xf32>
    %cst_26 = arith.constant dense<0xFF800000> : vector<8xf32>
    %86 = vector.multi_reduction <maximumf>, %85, %cst_26 [1] : vector<8x8xf32> to vector<8xf32>
    %87 = vector.shape_cast %86 : vector<8xf32> to vector<8x1xf32>
    %88 = vector.broadcast %87 : vector<8x1xf32> to vector<8x8xf32>
    %89 = arith.subf %85, %88 : vector<8x8xf32>
    %90 = math.exp %89 : vector<8x8xf32>
    %cst_27 = arith.constant dense<0.000000e+00> : vector<8xf32>
    %91 = vector.multi_reduction <add>, %90, %cst_27 [1] : vector<8x8xf32> to vector<8xf32>
    %92 = vector.shape_cast %91 : vector<8xf32> to vector<8x1xf32>
    %93 = tpu.reciprocal %92 {approx = true} : vector<8x1xf32> -> vector<8x1xf32>
    %94 = vector.broadcast %93 : vector<8x1xf32> to vector<8x8xf32>
    %95 = arith.mulf %90, %94 : vector<8x8xf32>
    %96 = arith.truncf %95 : vector<8x8xf32> to vector<8x8xbf16>
    %cst_28 = arith.constant dense<0.000000e+00> : vector<8x16xf32>
    %97 = tpu.matmul %96, %82, %cst_28 {dimension_numbers = #tpu.dot_dimension_numbers<[1], [0], [0], [1], [0, 0, 1, 1], [], []>} : vector<8x8xbf16>, vector<8x16xbf16>, vector<8x16xf32> -> vector<8x16xf32>
    %98 = vector.extract_strided_slice %29 {offsets = [0, 48], sizes = [8, 16], strides = [1, 1]} : vector<8x128xf32> to vector<8x16xf32>
    %99 = arith.truncf %98 : vector<8x16xf32> to vector<8x16xbf16>
    %100 = vector.extract_strided_slice %30 {offsets = [0, 48], sizes = [8, 16], strides = [1, 1]} : vector<8x128xf32> to vector<8x16xf32>
    %101 = arith.truncf %100 : vector<8x16xf32> to vector<8x16xbf16>
    %102 = vector.extract_strided_slice %31 {offsets = [0, 48], sizes = [8, 16], strides = [1, 1]} : vector<8x128xf32> to vector<8x16xf32>
    %103 = arith.truncf %102 : vector<8x16xf32> to vector<8x16xbf16>
    %cst_29 = arith.constant dense<0.000000e+00> : vector<8x8xf32>
    %104 = tpu.matmul %99, %101, %cst_29 {dimension_numbers = #tpu.dot_dimension_numbers<[1], [1], [0], [0], [0, 0, 1, 0], [], []>} : vector<8x16xbf16>, vector<8x16xbf16>, vector<8x8xf32> -> vector<8x8xf32>
    %cst_30 = arith.constant 0xFF800000 : f32
    %105 = vector.broadcast %cst_30 : f32 to vector<8x8xf32>
    %106 = arith.select %34, %104, %105 : vector<8x8xi1>, vector<8x8xf32>
    %cst_31 = arith.constant dense<0xFF800000> : vector<8xf32>
    %107 = vector.multi_reduction <maximumf>, %106, %cst_31 [1] : vector<8x8xf32> to vector<8xf32>
    %108 = vector.shape_cast %107 : vector<8xf32> to vector<8x1xf32>
    %109 = vector.broadcast %108 : vector<8x1xf32> to vector<8x8xf32>
    %110 = arith.subf %106, %109 : vector<8x8xf32>
    %111 = math.exp %110 : vector<8x8xf32>
    %cst_32 = arith.constant dense<0.000000e+00> : vector<8xf32>
    %112 = vector.multi_reduction <add>, %111, %cst_32 [1] : vector<8x8xf32> to vector<8xf32>
    %113 = vector.shape_cast %112 : vector<8xf32> to vector<8x1xf32>
    %114 = tpu.reciprocal %113 {approx = true} : vector<8x1xf32> -> vector<8x1xf32>
    %115 = vector.broadcast %114 : vector<8x1xf32> to vector<8x8xf32>
    %116 = arith.mulf %111, %115 : vector<8x8xf32>
    %117 = arith.truncf %116 : vector<8x8xf32> to vector<8x8xbf16>
    %cst_33 = arith.constant dense<0.000000e+00> : vector<8x16xf32>
    %118 = tpu.matmul %117, %103, %cst_33 {dimension_numbers = #tpu.dot_dimension_numbers<[1], [0], [0], [1], [0, 0, 1, 1], [], []>} : vector<8x8xbf16>, vector<8x16xbf16>, vector<8x16xf32> -> vector<8x16xf32>
    %119 = vector.extract_strided_slice %29 {offsets = [0, 64], sizes = [8, 16], strides = [1, 1]} : vector<8x128xf32> to vector<8x16xf32>
    %120 = arith.truncf %119 : vector<8x16xf32> to vector<8x16xbf16>
    %121 = vector.extract_strided_slice %30 {offsets = [0, 64], sizes = [8, 16], strides = [1, 1]} : vector<8x128xf32> to vector<8x16xf32>
    %122 = arith.truncf %121 : vector<8x16xf32> to vector<8x16xbf16>
    %123 = vector.extract_strided_slice %31 {offsets = [0, 64], sizes = [8, 16], strides = [1, 1]} : vector<8x128xf32> to vector<8x16xf32>
    %124 = arith.truncf %123 : vector<8x16xf32> to vector<8x16xbf16>
    %cst_34 = arith.constant dense<0.000000e+00> : vector<8x8xf32>
    %125 = tpu.matmul %120, %122, %cst_34 {dimension_numbers = #tpu.dot_dimension_numbers<[1], [1], [0], [0], [0, 0, 1, 0], [], []>} : vector<8x16xbf16>, vector<8x16xbf16>, vector<8x8xf32> -> vector<8x8xf32>
    %cst_35 = arith.constant 0xFF800000 : f32
    %126 = vector.broadcast %cst_35 : f32 to vector<8x8xf32>
    %127 = arith.select %34, %125, %126 : vector<8x8xi1>, vector<8x8xf32>
    %cst_36 = arith.constant dense<0xFF800000> : vector<8xf32>
    %128 = vector.multi_reduction <maximumf>, %127, %cst_36 [1] : vector<8x8xf32> to vector<8xf32>
    %129 = vector.shape_cast %128 : vector<8xf32> to vector<8x1xf32>
    %130 = vector.broadcast %129 : vector<8x1xf32> to vector<8x8xf32>
    %131 = arith.subf %127, %130 : vector<8x8xf32>
    %132 = math.exp %131 : vector<8x8xf32>
    %cst_37 = arith.constant dense<0.000000e+00> : vector<8xf32>
    %133 = vector.multi_reduction <add>, %132, %cst_37 [1] : vector<8x8xf32> to vector<8xf32>
    %134 = vector.shape_cast %133 : vector<8xf32> to vector<8x1xf32>
    %135 = tpu.reciprocal %134 {approx = true} : vector<8x1xf32> -> vector<8x1xf32>
    %136 = vector.broadcast %135 : vector<8x1xf32> to vector<8x8xf32>
    %137 = arith.mulf %132, %136 : vector<8x8xf32>
    %138 = arith.truncf %137 : vector<8x8xf32> to vector<8x8xbf16>
    %cst_38 = arith.constant dense<0.000000e+00> : vector<8x16xf32>
    %139 = tpu.matmul %138, %124, %cst_38 {dimension_numbers = #tpu.dot_dimension_numbers<[1], [0], [0], [1], [0, 0, 1, 1], [], []>} : vector<8x8xbf16>, vector<8x16xbf16>, vector<8x16xf32> -> vector<8x16xf32>
    %140 = vector.extract_strided_slice %29 {offsets = [0, 80], sizes = [8, 16], strides = [1, 1]} : vector<8x128xf32> to vector<8x16xf32>
    %141 = arith.truncf %140 : vector<8x16xf32> to vector<8x16xbf16>
    %142 = vector.extract_strided_slice %30 {offsets = [0, 80], sizes = [8, 16], strides = [1, 1]} : vector<8x128xf32> to vector<8x16xf32>
    %143 = arith.truncf %142 : vector<8x16xf32> to vector<8x16xbf16>
    %144 = vector.extract_strided_slice %31 {offsets = [0, 80], sizes = [8, 16], strides = [1, 1]} : vector<8x128xf32> to vector<8x16xf32>
    %145 = arith.truncf %144 : vector<8x16xf32> to vector<8x16xbf16>
    %cst_39 = arith.constant dense<0.000000e+00> : vector<8x8xf32>
    %146 = tpu.matmul %141, %143, %cst_39 {dimension_numbers = #tpu.dot_dimension_numbers<[1], [1], [0], [0], [0, 0, 1, 0], [], []>} : vector<8x16xbf16>, vector<8x16xbf16>, vector<8x8xf32> -> vector<8x8xf32>
    %cst_40 = arith.constant 0xFF800000 : f32
    %147 = vector.broadcast %cst_40 : f32 to vector<8x8xf32>
    %148 = arith.select %34, %146, %147 : vector<8x8xi1>, vector<8x8xf32>
    %cst_41 = arith.constant dense<0xFF800000> : vector<8xf32>
    %149 = vector.multi_reduction <maximumf>, %148, %cst_41 [1] : vector<8x8xf32> to vector<8xf32>
    %150 = vector.shape_cast %149 : vector<8xf32> to vector<8x1xf32>
    %151 = vector.broadcast %150 : vector<8x1xf32> to vector<8x8xf32>
    %152 = arith.subf %148, %151 : vector<8x8xf32>
    %153 = math.exp %152 : vector<8x8xf32>
    %cst_42 = arith.constant dense<0.000000e+00> : vector<8xf32>
    %154 = vector.multi_reduction <add>, %153, %cst_42 [1] : vector<8x8xf32> to vector<8xf32>
    %155 = vector.shape_cast %154 : vector<8xf32> to vector<8x1xf32>
    %156 = tpu.reciprocal %155 {approx = true} : vector<8x1xf32> -> vector<8x1xf32>
    %157 = vector.broadcast %156 : vector<8x1xf32> to vector<8x8xf32>
    %158 = arith.mulf %153, %157 : vector<8x8xf32>
    %159 = arith.truncf %158 : vector<8x8xf32> to vector<8x8xbf16>
    %cst_43 = arith.constant dense<0.000000e+00> : vector<8x16xf32>
    %160 = tpu.matmul %159, %145, %cst_43 {dimension_numbers = #tpu.dot_dimension_numbers<[1], [0], [0], [1], [0, 0, 1, 1], [], []>} : vector<8x8xbf16>, vector<8x16xbf16>, vector<8x16xf32> -> vector<8x16xf32>
    %161 = vector.extract_strided_slice %29 {offsets = [0, 96], sizes = [8, 16], strides = [1, 1]} : vector<8x128xf32> to vector<8x16xf32>
    %162 = arith.truncf %161 : vector<8x16xf32> to vector<8x16xbf16>
    %163 = vector.extract_strided_slice %30 {offsets = [0, 96], sizes = [8, 16], strides = [1, 1]} : vector<8x128xf32> to vector<8x16xf32>
    %164 = arith.truncf %163 : vector<8x16xf32> to vector<8x16xbf16>
    %165 = vector.extract_strided_slice %31 {offsets = [0, 96], sizes = [8, 16], strides = [1, 1]} : vector<8x128xf32> to vector<8x16xf32>
    %166 = arith.truncf %165 : vector<8x16xf32> to vector<8x16xbf16>
    %cst_44 = arith.constant dense<0.000000e+00> : vector<8x8xf32>
    %167 = tpu.matmul %162, %164, %cst_44 {dimension_numbers = #tpu.dot_dimension_numbers<[1], [1], [0], [0], [0, 0, 1, 0], [], []>} : vector<8x16xbf16>, vector<8x16xbf16>, vector<8x8xf32> -> vector<8x8xf32>
    %cst_45 = arith.constant 0xFF800000 : f32
    %168 = vector.broadcast %cst_45 : f32 to vector<8x8xf32>
    %169 = arith.select %34, %167, %168 : vector<8x8xi1>, vector<8x8xf32>
    %cst_46 = arith.constant dense<0xFF800000> : vector<8xf32>
    %170 = vector.multi_reduction <maximumf>, %169, %cst_46 [1] : vector<8x8xf32> to vector<8xf32>
    %171 = vector.shape_cast %170 : vector<8xf32> to vector<8x1xf32>
    %172 = vector.broadcast %171 : vector<8x1xf32> to vector<8x8xf32>
    %173 = arith.subf %169, %172 : vector<8x8xf32>
    %174 = math.exp %173 : vector<8x8xf32>
    %cst_47 = arith.constant dense<0.000000e+00> : vector<8xf32>
    %175 = vector.multi_reduction <add>, %174, %cst_47 [1] : vector<8x8xf32> to vector<8xf32>
    %176 = vector.shape_cast %175 : vector<8xf32> to vector<8x1xf32>
    %177 = tpu.reciprocal %176 {approx = true} : vector<8x1xf32> -> vector<8x1xf32>
    %178 = vector.broadcast %177 : vector<8x1xf32> to vector<8x8xf32>
    %179 = arith.mulf %174, %178 : vector<8x8xf32>
    %180 = arith.truncf %179 : vector<8x8xf32> to vector<8x8xbf16>
    %cst_48 = arith.constant dense<0.000000e+00> : vector<8x16xf32>
    %181 = tpu.matmul %180, %166, %cst_48 {dimension_numbers = #tpu.dot_dimension_numbers<[1], [0], [0], [1], [0, 0, 1, 1], [], []>} : vector<8x8xbf16>, vector<8x16xbf16>, vector<8x16xf32> -> vector<8x16xf32>
    %182 = vector.extract_strided_slice %29 {offsets = [0, 112], sizes = [8, 16], strides = [1, 1]} : vector<8x128xf32> to vector<8x16xf32>
    %183 = arith.truncf %182 : vector<8x16xf32> to vector<8x16xbf16>
    %184 = vector.extract_strided_slice %30 {offsets = [0, 112], sizes = [8, 16], strides = [1, 1]} : vector<8x128xf32> to vector<8x16xf32>
    %185 = arith.truncf %184 : vector<8x16xf32> to vector<8x16xbf16>
    %186 = vector.extract_strided_slice %31 {offsets = [0, 112], sizes = [8, 16], strides = [1, 1]} : vector<8x128xf32> to vector<8x16xf32>
    %187 = arith.truncf %186 : vector<8x16xf32> to vector<8x16xbf16>
    %cst_49 = arith.constant dense<0.000000e+00> : vector<8x8xf32>
    %188 = tpu.matmul %183, %185, %cst_49 {dimension_numbers = #tpu.dot_dimension_numbers<[1], [1], [0], [0], [0, 0, 1, 0], [], []>} : vector<8x16xbf16>, vector<8x16xbf16>, vector<8x8xf32> -> vector<8x8xf32>
    %cst_50 = arith.constant 0xFF800000 : f32
    %189 = vector.broadcast %cst_50 : f32 to vector<8x8xf32>
    %190 = arith.select %34, %188, %189 : vector<8x8xi1>, vector<8x8xf32>
    %cst_51 = arith.constant dense<0xFF800000> : vector<8xf32>
    %191 = vector.multi_reduction <maximumf>, %190, %cst_51 [1] : vector<8x8xf32> to vector<8xf32>
    %192 = vector.shape_cast %191 : vector<8xf32> to vector<8x1xf32>
    %193 = vector.broadcast %192 : vector<8x1xf32> to vector<8x8xf32>
    %194 = arith.subf %190, %193 : vector<8x8xf32>
    %195 = math.exp %194 : vector<8x8xf32>
    %cst_52 = arith.constant dense<0.000000e+00> : vector<8xf32>
    %196 = vector.multi_reduction <add>, %195, %cst_52 [1] : vector<8x8xf32> to vector<8xf32>
    %197 = vector.shape_cast %196 : vector<8xf32> to vector<8x1xf32>
    %198 = tpu.reciprocal %197 {approx = true} : vector<8x1xf32> -> vector<8x1xf32>
    %199 = vector.broadcast %198 : vector<8x1xf32> to vector<8x8xf32>
    %200 = arith.mulf %195, %199 : vector<8x8xf32>
    %201 = arith.truncf %200 : vector<8x8xf32> to vector<8x8xbf16>
    %cst_53 = arith.constant dense<0.000000e+00> : vector<8x16xf32>
    %202 = tpu.matmul %201, %187, %cst_53 {dimension_numbers = #tpu.dot_dimension_numbers<[1], [0], [0], [1], [0, 0, 1, 1], [], []>} : vector<8x8xbf16>, vector<8x16xbf16>, vector<8x16xf32> -> vector<8x16xf32>
    %203 = tpu.concatenate %55, %76, %97, %118, %139, %160, %181, %202 in 1 : vector<8x16xf32>, vector<8x16xf32>, vector<8x16xf32>, vector<8x16xf32>, vector<8x16xf32>, vector<8x16xf32>, vector<8x16xf32>, vector<8x16xf32> -> vector<8x128xf32>
    %204 = arith.truncf %203 : vector<8x128xf32> to vector<8x128xbf16>
    %c0_54 = arith.constant 0 : index
    %c0_55 = arith.constant 0 : index
    %205 = vector.load %arg6[%c0_54, %c0_55] : memref<128x128xbf16, #tpu.memory_space<vmem>>, vector<128x128xbf16>
    %cst_56 = arith.constant dense<0.000000e+00> : vector<8x128xf32>
    %206 = tpu.matmul %204, %205, %cst_56 {dimension_numbers = #tpu.dot_dimension_numbers<[1], [0], [0], [1], [0, 0, 1, 1], [], []>} : vector<8x128xbf16>, vector<128x128xbf16>, vector<8x128xf32> -> vector<8x128xf32>
    %c0_57 = arith.constant 0 : index
    %c0_58 = arith.constant 0 : index
    %207 = vector.load %arg7[%c0_57, %c0_58] : memref<1x128xf32, #tpu.memory_space<vmem>>, vector<1x128xf32>
    %208 = vector.broadcast %207 : vector<1x128xf32> to vector<8x128xf32>
    %209 = arith.addf %206, %208 : vector<8x128xf32>
    %210 = arith.addf %1, %209 : vector<8x128xf32>
    %c0_59 = arith.constant 0 : index
    %c0_60 = arith.constant 0 : index
    %211 = vector.load %arg8[%c0_59, %c0_60] : memref<1x128xf32, #tpu.memory_space<vmem>>, vector<1x128xf32>
    %c0_61 = arith.constant 0 : index
    %c0_62 = arith.constant 0 : index
    %212 = vector.load %arg9[%c0_61, %c0_62] : memref<1x128xf32, #tpu.memory_space<vmem>>, vector<1x128xf32>
    %cst_63 = arith.constant dense<0.000000e+00> : vector<8xf32>
    %213 = vector.multi_reduction <add>, %210, %cst_63 [1] : vector<8x128xf32> to vector<8xf32>
    %214 = vector.shape_cast %213 : vector<8xf32> to vector<8x1xf32>
    %cst_64 = arith.constant 1.280000e+02 : f32
    %215 = vector.broadcast %cst_64 : f32 to vector<8x1xf32>
    %216 = arith.divf %214, %215 : vector<8x1xf32>
    %217 = vector.broadcast %216 : vector<8x1xf32> to vector<8x128xf32>
    %218 = arith.subf %210, %217 : vector<8x128xf32>
    %219 = arith.mulf %218, %218 : vector<8x128xf32>
    %cst_65 = arith.constant dense<0.000000e+00> : vector<8xf32>
    %220 = vector.multi_reduction <add>, %219, %cst_65 [1] : vector<8x128xf32> to vector<8xf32>
    %221 = vector.shape_cast %220 : vector<8xf32> to vector<8x1xf32>
    %cst_66 = arith.constant 1.280000e+02 : f32
    %222 = vector.broadcast %cst_66 : f32 to vector<8x1xf32>
    %223 = arith.divf %221, %222 : vector<8x1xf32>
    %cst_67 = arith.constant 9.99999974E-6 : f32
    %224 = vector.broadcast %cst_67 : f32 to vector<8x1xf32>
    %225 = arith.addf %223, %224 : vector<8x1xf32>
    %226 = math.rsqrt %225 : vector<8x1xf32>
    %227 = vector.broadcast %226 : vector<8x1xf32> to vector<8x128xf32>
    %228 = arith.mulf %218, %227 : vector<8x128xf32>
    %229 = vector.broadcast %211 : vector<1x128xf32> to vector<8x128xf32>
    %230 = arith.mulf %228, %229 : vector<8x128xf32>
    %231 = vector.broadcast %212 : vector<1x128xf32> to vector<8x128xf32>
    %232 = arith.addf %230, %231 : vector<8x128xf32>
    %233 = arith.truncf %232 : vector<8x128xf32> to vector<8x128xbf16>
    %c0_68 = arith.constant 0 : index
    %c0_69 = arith.constant 0 : index
    %234 = vector.load %arg10[%c0_68, %c0_69] : memref<128x512xbf16, #tpu.memory_space<vmem>>, vector<128x512xbf16>
    %cst_70 = arith.constant dense<0.000000e+00> : vector<8x512xf32>
    %235 = tpu.matmul %233, %234, %cst_70 {dimension_numbers = #tpu.dot_dimension_numbers<[1], [0], [0], [1], [0, 0, 1, 1], [], []>} : vector<8x128xbf16>, vector<128x512xbf16>, vector<8x512xf32> -> vector<8x512xf32>
    %c0_71 = arith.constant 0 : index
    %c0_72 = arith.constant 0 : index
    %236 = vector.load %arg11[%c0_71, %c0_72] : memref<1x512xf32, #tpu.memory_space<vmem>>, vector<1x512xf32>
    %237 = vector.broadcast %236 : vector<1x512xf32> to vector<8x512xf32>
    %238 = arith.addf %235, %237 : vector<8x512xf32>
    %cst_73 = arith.constant 0.000000e+00 : f32
    %239 = vector.broadcast %cst_73 : f32 to vector<8x512xf32>
    %240 = arith.maximumf %238, %239 : vector<8x512xf32>
    %241 = arith.truncf %240 : vector<8x512xf32> to vector<8x512xbf16>
    %c0_74 = arith.constant 0 : index
    %c0_75 = arith.constant 0 : index
    %242 = vector.load %arg12[%c0_74, %c0_75] : memref<512x128xbf16, #tpu.memory_space<vmem>>, vector<512x128xbf16>
    %cst_76 = arith.constant dense<0.000000e+00> : vector<8x128xf32>
    %243 = tpu.matmul %241, %242, %cst_76 {dimension_numbers = #tpu.dot_dimension_numbers<[1], [0], [0], [1], [0, 0, 1, 1], [], []>} : vector<8x512xbf16>, vector<512x128xbf16>, vector<8x128xf32> -> vector<8x128xf32>
    %c0_77 = arith.constant 0 : index
    %c0_78 = arith.constant 0 : index
    %244 = vector.load %arg13[%c0_77, %c0_78] : memref<1x128xf32, #tpu.memory_space<vmem>>, vector<1x128xf32>
    %245 = vector.broadcast %244 : vector<1x128xf32> to vector<8x128xf32>
    %246 = arith.addf %243, %245 : vector<8x128xf32>
    %247 = arith.addf %210, %246 : vector<8x128xf32>
    %c0_79 = arith.constant 0 : index
    %c0_80 = arith.constant 0 : index
    %c0_81 = arith.constant 0 : index
    %248 = vector.load %arg14[%c0_79, %c0_80, %c0_81] : memref<1x8x128xf32, #tpu.memory_space<vmem>>, vector<1x8x128xf32>
    %249 = vector.shape_cast %248 : vector<1x8x128xf32> to vector<8x128xf32>
    %250 = vector.shape_cast %247 : vector<8x128xf32> to vector<1x8x128xf32>
    tpu.vector_store %arg14[%c0_79, %c0_80, %c0_81], %250 {strides = array<i32>} : memref<1x8x128xf32, #tpu.memory_space<vmem>>, vector<1x8x128xf32>,
    return
  }
  func.func @transform_0(%arg0: i32, %arg1: memref<1xi32, #tpu.memory_space<smem>>) -> (i32, i32, i32) {
    %c0_i32 = arith.constant 0 : i32
    %c0_i32_0 = arith.constant 0 : i32
    %c0_i32_1 = arith.constant 0 : i32
    return %arg0, %c0_i32, %c0_i32_0 : i32, i32, i32
  }
  func.func @transform_1(%arg0: i32, %arg1: memref<1xi32, #tpu.memory_space<smem>>) -> (i32, i32) {
    %c0_i32 = arith.constant 0 : i32
    %c0_i32_0 = arith.constant 0 : i32
    %c0_i32_1 = arith.constant 0 : i32
    return %c0_i32, %c0_i32_0 : i32, i32
  }
  func.func @transform_2(%arg0: i32, %arg1: memref<1xi32, #tpu.memory_space<smem>>) -> (i32, i32) {
    %c0_i32 = arith.constant 0 : i32
    %c0_i32_0 = arith.constant 0 : i32
    %c0_i32_1 = arith.constant 0 : i32
    return %c0_i32, %c0_i32_0 : i32, i32
  }
  func.func @transform_3(%arg0: i32, %arg1: memref<1xi32, #tpu.memory_space<smem>>) -> (i32, i32) {
    %c0_i32 = arith.constant 0 : i32
    %c0_i32_0 = arith.constant 0 : i32
    %c0_i32_1 = arith.constant 0 : i32
    return %c0_i32, %c0_i32_0 : i32, i32
  }
  func.func @transform_4(%arg0: i32, %arg1: memref<1xi32, #tpu.memory_space<smem>>) -> (i32, i32) {
    %c0_i32 = arith.constant 0 : i32
    %c0_i32_0 = arith.constant 0 : i32
    %c0_i32_1 = arith.constant 0 : i32
    return %c0_i32, %c0_i32_0 : i32, i32
  }
  func.func @transform_5(%arg0: i32, %arg1: memref<1xi32, #tpu.memory_space<smem>>) -> (i32, i32) {
    %c0_i32 = arith.constant 0 : i32
    %c0_i32_0 = arith.constant 0 : i32
    %c0_i32_1 = arith.constant 0 : i32
    return %c0_i32, %c0_i32_0 : i32, i32
  }
  func.func @transform_6(%arg0: i32, %arg1: memref<1xi32, #tpu.memory_space<smem>>) -> (i32, i32) {
    %c0_i32 = arith.constant 0 : i32
    %c0_i32_0 = arith.constant 0 : i32
    %c0_i32_1 = arith.constant 0 : i32
    return %c0_i32, %c0_i32_0 : i32, i32
  }
  func.func @transform_7(%arg0: i32, %arg1: memref<1xi32, #tpu.memory_space<smem>>) -> (i32, i32) {
    %c0_i32 = arith.constant 0 : i32
    %c0_i32_0 = arith.constant 0 : i32
    %c0_i32_1 = arith.constant 0 : i32
    return %c0_i32, %c0_i32_0 : i32, i32
  }
  func.func @transform_8(%arg0: i32, %arg1: memref<1xi32, #tpu.memory_space<smem>>) -> (i32, i32) {
    %c0_i32 = arith.constant 0 : i32
    %c0_i32_0 = arith.constant 0 : i32
    %c0_i32_1 = arith.constant 0 : i32
    return %c0_i32, %c0_i32_0 : i32, i32
  }
  func.func @transform_9(%arg0: i32, %arg1: memref<1xi32, #tpu.memory_space<smem>>) -> (i32, i32) {
    %c0_i32 = arith.constant 0 : i32
    %c0_i32_0 = arith.constant 0 : i32
    %c0_i32_1 = arith.constant 0 : i32
    return %c0_i32, %c0_i32_0 : i32, i32
  }
  func.func @transform_10(%arg0: i32, %arg1: memref<1xi32, #tpu.memory_space<smem>>) -> (i32, i32) {
    %c0_i32 = arith.constant 0 : i32
    %c0_i32_0 = arith.constant 0 : i32
    %c0_i32_1 = arith.constant 0 : i32
    return %c0_i32, %c0_i32_0 : i32, i32
  }
  func.func @transform_11(%arg0: i32, %arg1: memref<1xi32, #tpu.memory_space<smem>>) -> (i32, i32) {
    %c0_i32 = arith.constant 0 : i32
    %c0_i32_0 = arith.constant 0 : i32
    %c0_i32_1 = arith.constant 0 : i32
    return %c0_i32, %c0_i32_0 : i32, i32
  }
  func.func @transform_12(%arg0: i32, %arg1: memref<1xi32, #tpu.memory_space<smem>>) -> (i32, i32, i32) {
    %c0_i32 = arith.constant 0 : i32
    %c0_i32_0 = arith.constant 0 : i32
    %c0_i32_1 = arith.constant 0 : i32
    return %arg0, %c0_i32, %c0_i32_0 : i32, i32, i32
  }
}

</mosaic_0001>

<bundles_post_ra>
// kernel: decoder_forward.9
= control target key start
LH: loop header
LB: loop body
LE: loop exit
PB: predicated region body
PF: predicated region fallthrough
CT: control target
= control target key end

     0   :  { %10 = vsyncpa [#allocation3], 0  ;;  %s266_s21 = smov [#allocation2]   ;;  %s267_s23 = smov 64   ;;  %s324_s0 = inlined_call_operand.vmem [shape: f32[16,128], index: 0, kind: input, shape index: {}]   ;;  %s325_s1 = inlined_call_operand.vmem [shape: f32[1,128], index: 1, kind: input, shape index: {}]   ;;  %s326_s2 = inlined_call_operand.vmem [shape: f32[1,128], index: 2, kind: input, shape index: {}]   ;;  %s327_s3 = inlined_call_operand.hbm [shape: bf16[128,128], index: 3, kind: input, shape index: {}]   ;;  %s328_s4 = inlined_call_operand.vmem [shape: f32[1,128], index: 4, kind: input, shape index: {}]   ;;  %s329_s5 = inlined_call_operand.vmem [shape: f32[16,128], index: 5, kind: output, shape index: {}]  }
   0x1   :  { %s21_s20 = sshll.u32 %s327_s3, 4  ;;  %s23_s22 = sshll.u32 %s266_s21, 4  ;;  %s22_s20 = int_to_ptr.hbm [resolvable:$true] %s21_s20  ;;  %s24_s22 = int_to_ptr.vmem [resolvable:$true] %s23_s22 }
   0x2   :  { %s268_s24 = smov 4  }
   0x3   :  { %29 = dma.hbm_to_vmem [thread:$0]  %s22_s20, 1024, %s24_s22, [#allocation3], %s267_s23, %s267_s23, %s268_s24  }
   0x4   :  { %264 = dma.done.wait [#allocation3], 1024  }
   0x5   :  { %265 = vsyncadd [#allocation3], 4294966272  ;;  %v36_v0 = vld [vmem:[%s324_s0] sm:$0xff]  ;;  %v37_v1 = vld [vmem:[%s324_s0 + $0x8] sm:$0xff]  ;;  %v269_v2 = vmov 128.0  }
   0x6   :  { %40 = vadd.xlane.f32.xlu0 %v36_v0  ;;  %234 = vrcp.f32 %v269_v2  ;;  %v226_v17 = vld [vmem:[#allocation2 + $0x38] sm:$0xff]  ;;  %v225_v18 = vld [vmem:[#allocation2 + $0x30] sm:$0xff]  ;;  %v224_v19 = vld [vmem:[#allocation2 + $0x28] sm:$0xff] }
   0x7   :  { %166 = vmatpush.bf16.msra.mxu0 %v226_v17  ;;  %v223_v20 = vld [vmem:[#allocation2 + $0x20] sm:$0xff]  ;;  %v222_v21 = vld [vmem:[#allocation2 + $0x18] sm:$0xff]  ;;  %v221_v22 = vld [vmem:[#allocation2 + $0x10] sm:$0xff] }
   0x8   :  { %v220_v23 = vld [vmem:[#allocation2 + $0x8] sm:$0xff]  ;;  %v219_v25 = vld [vmem:[#allocation2] sm:$0xff] }
   0x9   :  { %v231_v44 = vld [vmem:[%s325_s1] ss:$0 sm:$0xff] }
   0xa   :  { %v232_v49 = vld [vmem:[%s326_s2] ss:$0 sm:$0xff] }
   0xb   :  { %167 = vmatpush.bf16.msra.mxu0 %v225_v18  ;;  %v233_v54 = vld [vmem:[%s328_s4] ss:$0 sm:$0xff] }
   0xc   :  { %v235_v3 = vpop.eup %234 }
   0xd   :  { %v45_v4 = vmul.f32 128.0, %v235_v3  ;;  %vm49_vm0 = vweird.f32 %v235_v3 }
   0xe   :  { %42 = vadd.xlane.f32.xlu0 %v37_v1 }
   0xf   :  { %v46_v5 = vsub.f32 1.0, %v45_v4  ;;  %168 = vmatpush.bf16.msra.mxu0 %v224_v19 }
  0x11   :  { %v47_v6 = vmul.f32 %v235_v3, %v46_v5 }
  0x13   :  { %v48_v7 = vadd.f32 %v235_v3, %v47_v6  ;;  %169 = vmatpush.bf16.msra.mxu0 %v223_v20 }
  0x15   :  { %v50_v8 = vsel %vm49_vm0, %v235_v3, %v48_v7 }
  0x17   :  { %170 = vmatpush.bf16.msra.mxu0 %v222_v21 }
  0x1b   :  { %171 = vmatpush.bf16.msra.mxu0 %v221_v22 }
  0x1f   :  { %172 = vmatpush.bf16.msra.mxu0 %v220_v23 }
  0x23   :  { %173 = vmatpush.bf16.msra.mxu0 %v219_v25 }
  0x79   :  { %v41_v9 = vpop.xlane.xlu0 %40 }
  0x7a   :  { %v51_v10 = vmul.f32 %v50_v8, %v41_v9 }
  0x7c   :  { %v53_v11 = vsub.f32 %v36_v0, %v51_v10 }
  0x7e   :  { %v55_v12 = vmul.f32 %v53_v11, %v53_v11 }
  0x80   :  { %57 = vadd.xlane.f32.xlu1 %v55_v12 }
  0x81   :  { %v43_v13 = vpop.xlane.xlu0 %42 }
  0x82   :  { %v52_v14 = vmul.f32 %v50_v8, %v43_v13 }
  0x84   :  { %v54_v15 = vsub.f32 %v37_v1, %v52_v14 }
  0x86   :  { %v56_v16 = vmul.f32 %v54_v15, %v54_v15 }
  0x88   :  { %59 = vadd.xlane.f32.xlu1 %v56_v16 }
  0xf3   :  { %v58_v24 = vpop.xlane.xlu1 %57 }
  0xf4   :  { %v61_v26 = vmul.f32 %v58_v24, %v50_v8 }
  0xf6   :  { %v63_v27 = vadd.f32 1e-05, %v61_v26 }
  0xf8   :  { %236 = vrsqrt.f32 %v63_v27  ;;  %vm71_vm2 = vweird.f32 %v63_v27 }
  0xfb   :  { %v60_v28 = vpop.xlane.xlu1 %59 }
  0xfc   :  { %v62_v29 = vmul.f32 %v60_v28, %v50_v8 }
  0xfe   :  { %v237_v30 = vpop.eup %236  ;;  %v64_v31 = vadd.f32 1e-05, %v62_v29 }
  0xff   :  { %v66_v32 = vmul.f32 %v237_v30, %v63_v27  ;;  %vm72_vm1 = vweird.f32 %v237_v30 }
 0x100   :  { %238 = vrsqrt.f32 %v64_v31  ;;  %vm73_vm3 = vmor %vm71_vm2, %vm72_vm1  ;;  %vm81_vm5 = vweird.f32 %v64_v31 }
 0x101   :  { %v67_v33 = vmul.f32 %v237_v30, %v66_v32 }
 0x103   :  { %v68_v34 = vmul.f32 0.5, %v67_v33 }
 0x105   :  { %v69_v35 = vsub.f32 1.5, %v68_v34 }
 0x106   :  { %v239_v36 = vpop.eup %238 }
 0x107   :  { %v70_v37 = vmul.f32 %v237_v30, %v69_v35  ;;  %v76_v38 = vmul.f32 %v239_v36, %v64_v31  ;;  %vm82_vm4 = vweird.f32 %v239_v36 }
 0x108   :  { %vm83_vm6 = vmor %vm81_vm5, %vm82_vm4 }
 0x109   :  { %v77_v39 = vmul.f32 %v239_v36, %v76_v38  ;;  %v74_v41 = vsel %vm73_vm3, %v237_v30, %v70_v37 }
 0x10a   :  { %v85_v43 = vmul.f32 %v74_v41, %v53_v11 }
 0x10b   :  { %v78_v40 = vmul.f32 0.5, %v77_v39 }
 0x10c   :  { %v90_v48 = vmul.f32 %v231_v44, %v85_v43 }
 0x10d   :  { %v79_v42 = vsub.f32 1.5, %v78_v40 }
 0x10e   :  { %v95_v51 = vadd.f32 %v232_v49, %v90_v48 }
 0x10f   :  { %v80_v45 = vmul.f32 %v239_v36, %v79_v42 }
 0x111   :  { %v84_v46 = vsel %vm83_vm6, %v239_v36, %v80_v45 }
 0x112   :  { %v86_v47 = vmul.f32 %v84_v46, %v54_v15 }
 0x114   :  { %v91_v50 = vmul.f32 %v231_v44, %v86_v47 }
 0x116   :  { %v96_v52 = vadd.f32 %v232_v49, %v91_v50 }
 0x118   :  { %v97_v53 = vpack.c.bf16 %v96_v52, %v95_v51 }
 0x11a   :  { %174 = vmatmul.bf16.vlgmr.msra.gmra.mxu0 %v97_v53 }
 0x197   :  { %v175_v55 = vpop.f32.mrf.mxu0 }
 0x198   :  { %v176_v56 = vadd.f32 %v233_v54, %v175_v55 }
 0x19a   :  { %180 = vst [vmem:[%s329_s5] sm:$0xff] %v176_v56 }
 0x19f   :  { %v177_v57 = vpop.f32.mrf.mxu0 }
 0x1a0   :  { %v178_v58 = vadd.f32 %v233_v54, %v177_v57 }
 0x1a2   :  { %181 = vst [vmem:[%s329_s5 + $0x8] sm:$0xff] %v178_v58 }
 0x1a3   :  { %186 = vsyncpa [#allocation3], 1 }

// kernel: decoder_forward.5
= control target key start
LH: loop header
LB: loop body
LE: loop exit
PB: predicated region body
PF: predicated region fallthrough
CT: control target
= control target key end

     0   :  { %s3060_s0 = inlined_call_operand.<no memory space> [shape: s32[1], index: 0, kind: input, shape index: {}]   ;;  %s3061_s1 = inlined_call_operand.vmem [shape: f32[2,8,128], index: 1, kind: input, shape index: {}]   ;;  %s3062_s2 = inlined_call_operand.vmem [shape: f32[1,128], index: 2, kind: input, shape index: {}]   ;;  %s3063_s3 = inlined_call_operand.vmem [shape: f32[1,128], index: 3, kind: input, shape index: {}]   ;;  %s3064_s4 = inlined_call_operand.hbm [shape: bf16[128,384], index: 4, kind: input, shape index: {}]   ;;  %s3065_s5 = inlined_call_operand.vmem [shape: bf16[128,128], index: 5, kind: input, shape index: {}]   ;;  %s3066_s6 = inlined_call_operand.vmem [shape: f32[1,128], index: 6, kind: input, shape index: {}]   ;;  %s3067_s7 = inlined_call_operand.vmem [shape: f32[1,128], index: 7, kind: input, shape index: {}]   ;;  %s3068_s8 = inlined_call_operand.vmem [shape: f32[1,128], index: 8, kind: input, shape index: {}]   ;;  %s3069_s9 = inlined_call_operand.hbm [shape: bf16[128,512], index: 9, kind: input, shape index: {}]   ;;  %s3070_s10 = inlined_call_operand.vmem [shape: f32[1,512], index: 10, kind: input, shape index: {}]   ;;  %s3071_s11 = inlined_call_operand.hbm [shape: bf16[512,128], index: 11, kind: input, shape index: {}]   ;;  %s3072_s12 = inlined_call_operand.vmem [shape: f32[1,128], index: 12, kind: input, shape index: {}]   ;;  %s3073_s13 = inlined_call_operand.vmem [shape: f32[2,8,128], index: 13, kind: output, shape index: {}]  }
   0x1   :  { %3074 = sst [smem:[#allocation11_spill]] %s3064_s4 }
   0x2   :  { %3075 = sst [smem:[#allocation12_spill]] %s3069_s9 }
   0x3   :  { %19 = vsyncpa [#allocation5], 0 }
   0x4   :  { %20 = vsyncpa [#allocation7], 0  ;;  %s2781_s24 = smov 0  }
   0x5 LB: > { %s3076_s9 = sld [smem:[#allocation12_spill]]  ;;  %s2790_s28 = sadd.s32 4294967295, %s2692_s24   ;;  %s2692_s24 = sphi %s2781_s24, %s26_s24  }
   0x6   : > { %p1982_p0 = scmp.ge.s32.totalorder %s2692_s24, 1  ;;  %p314_p1 = scmp.lt.s32.totalorder %s2692_s24, 3 }
   0x7   : > { %p2513_p2 = scmp.eq.s32.totalorder %s2790_s28, 0  ;;  %s2694_s29 = smov [#allocation6]  }
   0x8   : > { %p2795_p3 = pnand %p1982_p0, %p314_p1  ;;  %s359_s30 = sshll.u32 %s2694_s29, 4  ;;  %s360_s30 = int_to_ptr.vmem [resolvable:$true] %s359_s30 }
   0x9   : > { %s3078_s4 = sld [smem:[#allocation11_spill]]  ;;  %s2695_s18 = smov [#allocation4]  }
   0xa   : > { %p2503_p4 = pneg %p2795_p3  ;;  %s333_s19 = sshll.u32 %s2695_s18, 4  ;;  %s334_s19 = int_to_ptr.vmem [resolvable:$true] %s333_s19 }
   0xb   : > { %s357_s27 = sshll.u32 %s3076_s9, 4  ;;  %s2696_s20 = smov 256   ;;  %s358_s27 = int_to_ptr.hbm [resolvable:$true] %s357_s27 }
   0xc   : > { %p2806_p5 = pnand %p2513_p2, %p2503_p4  ;;  %s2697_s21 = smov 16  }
   0xd   : > { %s374_s25 = sshll.u32 %s3071_s11, 4  ;;  %s2698_s26 = smov 192   ;;  %s375_s25 = int_to_ptr.hbm [resolvable:$true] %s374_s25 }
   0xe   : > { %2509 = dma.hbm_to_vmem [thread:$0]  (!%p2806_p5), %s358_s27, 4096, %s360_s30, [#allocation7], %s2696_s20, %s2696_s20, %s2697_s21  }
   0xf   : > { %s331_s16 = sshll.u32 %s3078_s4, 4  ;;  %s2699_s29 = smov 12   ;;  %s332_s16 = int_to_ptr.hbm [resolvable:$true] %s331_s16 }
  0x10   : > { %2506 = dma.hbm_to_vmem [thread:$0]  (!%p2806_p5), %s332_s16, 3072, %s334_s19, [#allocation5], %s2698_s26, %s2698_s26, %s2699_s29  }
  0x11   : > { %s2700_s14 = smov [#allocation8]   ;;  %s2701_s4 = smov 64  }
  0x12   : > { %s376_s15 = sshll.u32 %s2700_s14, 4  ;;  %s2702_s9 = smov 4   ;;  %s377_s15 = int_to_ptr.vmem [resolvable:$true] %s376_s15 }
  0x13   : > { %2512 = dma.hbm_to_vmem [thread:$0]  (!%p2806_p5), %s375_s25, 4096, %s377_s15, [#allocation7], %s2701_s4, %s2701_s4, %s2702_s9  }
  0x14   : > { %402 = sbr.rel (%p2795_p3) target bundleno = 2223 (0x8af), region = 68 }
  0x19   : > { %2683 = dma.done.wait (%p2513_p2), [#allocation5], 3072  }
  0x1a   : > { %2685 = vsyncadd (%p2513_p2), [#allocation5], 4294964224 }
  0x1b   : > { %2687 = dma.done.wait (%p2513_p2), [#allocation7], 8192  }
  0x1c   : > { %2689 = vsyncadd (%p2513_p2), [#allocation7], 4294959104  ;;  %p453_p6 = scmp.lt.s32.totalorder %s2790_s28, 1  ;;  %v2703_v1 = vmov 128.0   ;;  %v2079_v2 = vld [vmem:[#allocation4 + $0xa8] sm:$0xf] }
  0x1d   : > { %2550 = vrcp.f32 %v2703_v1  ;;  %v2417_v3 = vld [vmem:[#allocation4 + $0xb0] sm:$0xf0]  ;;  %v2416_v4 = vld [vmem:[#allocation4 + $0xac] sm:$0xf]  ;;  %v2081_v6 = vld [vmem:[#allocation4 + $0xb4] sm:$0xf0] }
  0x1e   : > { %s3083_s28 = smov (!%p453_p6, %s2790_s28), 1  ;;  %v2080_v5 = vor.u32 %v2417_v3, %v2079_v2  ;;  %v2087_v7 = vld [vmem:[#allocation4 + $0xb0] sm:$0xf]  ;;  %v2418_v8 = vld [vmem:[#allocation4 + $0xb8] sm:$0xf0]  ;;  %v2084_v9 = vor.u32 %v2416_v4, %v2081_v6  ;;  %vm709_vm4 = vcmask 130048  }
  0x1f   : > { %s1991_s4 = sshll.u32 %s3083_s28, 3  ;;  %v2088_v10 = vor.u32 %v2418_v8, %v2087_v7  ;;  %v2067_v21 = vld [vmem:[#allocation4 + $0x90] sm:$0xf]  ;;  %v2414_v22 = vld [vmem:[#allocation4 + $0x98] sm:$0xf0]  ;;  %s2704_s19 = smov 96  }
  0x20   : > { %s456_s0 = scalar_lea.vmem %s3061_s1, %s1991_s4  ;;  %661 = vmatpush.bf16.msra.mxu0 %v2080_v5  ;;  %674 = vmatpush.bf16.msra.mxu1 %v2084_v9  ;;  %v2413_v23 = vld [vmem:[#allocation4 + $0x94] sm:$0xf]  ;;  %v2068_v24 = vor.u32 %v2414_v22, %v2067_v21  ;;  %v2069_v25 = vld [vmem:[#allocation4 + $0x9c] sm:$0xf0]  ;;  %v2075_v26 = vld [vmem:[#allocation4 + $0x98] sm:$0xf] }
  0x21   : > { %v2839_v0 = vld [vmem:[%s456_s0] sm:$0xff]  ;;  %687 = vmatpush.bf16.msra.mxu2 %v2088_v10  ;;  %v2072_v28 = vor.u32 %v2413_v23, %v2069_v25  ;;  %v2055_v30 = vld [vmem:[#allocation4 + $0x78] sm:$0xf]  ;;  %v2410_v32 = vld [vmem:[#allocation4 + $0x7c] sm:$0xf]  ;;  %s2705_s20 = smov 112  }
  0x22   : > { %465 = vadd.xlane.f32.xlu0 %v2839_v0  ;;  %v2415_v27 = vld [vmem:[#allocation4 + $0xa0] sm:$0xf0]  ;;  %v2057_v34 = vld [vmem:[#allocation4 + $0x84] sm:$0xf0]  ;;  %v2063_v35 = vld [vmem:[#allocation4 + $0x80] sm:$0xf] }
  0x23   : > { %v2551_v11 = vpop.eup %2550  ;;  %v2076_v29 = vor.u32 %v2415_v27, %v2075_v26  ;;  %v2411_v31 = vld [vmem:[#allocation4 + $0x80] sm:$0xf0]  ;;  %v2412_v36 = vld [vmem:[#allocation4 + $0x88] sm:$0xf0]  ;;  %v2060_v37 = vor.u32 %v2410_v32, %v2057_v34  ;;  %v2043_v39 = vld [vmem:[#allocation4 + $0x60] sm:$0xf] }
  0x24   : > { %v468_v12 = vmul.f32 128.0, %v2551_v11  ;;  %vm472_vm0 = vweird.f32 %v2551_v11  ;;  %662 = vmatpush.bf16.msra.mxu0 %v2068_v24  ;;  %675 = vmatpush.bf16.msra.mxu1 %v2072_v28  ;;  %v2056_v33 = vor.u32 %v2411_v31, %v2055_v30  ;;  %v2064_v38 = vor.u32 %v2412_v36, %v2063_v35  ;;  %v2408_v40 = vld [vmem:[#allocation4 + $0x68] sm:$0xf0]  ;;  %v2407_v41 = vld [vmem:[#allocation4 + $0x64] sm:$0xf]  ;;  %s2706_s21 = smov 48  }
  0x25   : > { %688 = vmatpush.bf16.msra.mxu2 %v2076_v29  ;;  %v2044_v42 = vor.u32 %v2408_v40, %v2043_v39  ;;  %v2045_v43 = vld [vmem:[#allocation4 + $0x6c] sm:$0xf0]  ;;  %v2051_v44 = vld [vmem:[#allocation4 + $0x68] sm:$0xf]  ;;  %v2409_v45 = vld [vmem:[#allocation4 + $0x70] sm:$0xf0] }
  0x26   : > { %v469_v13 = vsub.f32 1.0, %v468_v12  ;;  %v2048_v46 = vor.u32 %v2407_v41, %v2045_v43  ;;  %v2052_v47 = vor.u32 %v2409_v45, %v2051_v44  ;;  %v2031_v48 = vld [vmem:[#allocation4 + $0x48] sm:$0xf]  ;;  %v2405_v49 = vld [vmem:[#allocation4 + $0x50] sm:$0xf0]  ;;  %vm746_vm5 = vcmask 1043456  }
  0x27   : > { %v2404_v50 = vld [vmem:[#allocation4 + $0x4c] sm:$0xf]  ;;  %v2032_v51 = vor.u32 %v2405_v49, %v2031_v48  ;;  %v2033_v52 = vld [vmem:[#allocation4 + $0x54] sm:$0xf0]  ;;  %v2039_v53 = vld [vmem:[#allocation4 + $0x50] sm:$0xf] }
  0x28   : > { %v470_v14 = vmul.f32 %v2551_v11, %v469_v13  ;;  %663 = vmatpush.bf16.msra.mxu0 %v2056_v33  ;;  %676 = vmatpush.bf16.msra.mxu1 %v2060_v37  ;;  %v2406_v54 = vld [vmem:[#allocation4 + $0x58] sm:$0xf0]  ;;  %v2036_v55 = vor.u32 %v2404_v50, %v2033_v52  ;;  %v2019_v57 = vld [vmem:[#allocation4 + $0x30] sm:$0xf]  ;;  %v2401_v59 = vld [vmem:[#allocation4 + $0x34] sm:$0xf] }
  0x29   : > { %689 = vmatpush.bf16.msra.mxu2 %v2064_v38  ;;  %v2040_v56 = vor.u32 %v2406_v54, %v2039_v53  ;;  %v2402_v58 = vld [vmem:[#allocation4 + $0x38] sm:$0xf0]  ;;  %v2021_v61 = vld [vmem:[#allocation4 + $0x3c] sm:$0xf0]  ;;  %v2027_v62 = vld [vmem:[#allocation4 + $0x38] sm:$0xf] }
  0x2a   : > { %v471_v15 = vadd.f32 %v2551_v11, %v470_v14  ;;  %v2020_v60 = vor.u32 %v2402_v58, %v2019_v57  ;;  %v2403_v63 = vld [vmem:[#allocation4 + $0x40] sm:$0xf0]  ;;  %v2024_v1 = vor.u32 %v2401_v59, %v2021_v61  ;;  %v2007_v3 = vld [vmem:[#allocation4 + $0x18] sm:$0xf]  ;;  %v2398_v5 = vld [vmem:[#allocation4 + $0x1c] sm:$0xf]  ;;  %v701_v61 = vlaneseq }
  0x2b   : > { %v2028_v2 = vor.u32 %v2403_v63, %v2027_v62  ;;  %v2399_v4 = vld [vmem:[#allocation4 + $0x20] sm:$0xf0]  ;;  %v2009_v7 = vld [vmem:[#allocation4 + $0x24] sm:$0xf0]  ;;  %v2015_v8 = vld [vmem:[#allocation4 + $0x20] sm:$0xf] }
  0x2c   : > { %v2842_v16 = vsel %vm472_vm0, %v2551_v11, %v471_v15  ;;  %664 = vmatpush.bf16.msra.mxu0 %v2044_v42  ;;  %677 = vmatpush.bf16.msra.mxu1 %v2048_v46  ;;  %v2008_v6 = vor.u32 %v2399_v4, %v2007_v3  ;;  %v2400_v9 = vld [vmem:[#allocation4 + $0x28] sm:$0xf0]  ;;  %v2012_v10 = vor.u32 %v2398_v5, %v2009_v7  ;;  %v1995_v12 = vld [vmem:[#allocation4] sm:$0xf]  ;;  %v2395_v14 = vld [vmem:[#allocation4 + $0x4] sm:$0xf] }
  0x2d   : > { %690 = vmatpush.bf16.msra.mxu2 %v2052_v47  ;;  %v2016_v11 = vor.u32 %v2400_v9, %v2015_v8  ;;  %v2396_v13 = vld [vmem:[#allocation4 + $0x8] sm:$0xf0]  ;;  %v2544_v32 = vld [vmem:[%s3062_s2] ss:$0 sm:$0xff]  ;;  %s2707_s22 = smov 32   ;;  %s2708_s23 = smov 16  }
  0x2e   : > { %v1996_v15 = vor.u32 %v2396_v13, %v1995_v12  ;;  %v2545_v35 = vld [vmem:[%s3063_s3] ss:$0 sm:$0xff]  ;;  %s2709_s25 = smov 80   ;;  %s2710_s26 = smov 64   ;;  %vm730_vm7 = vcmask 64512   ;;  %vm1194_vm8 = vcmask 261120  }
  0x2f   : > { %vm1196_vm9 = vcmask 392192   ;;  %vm1198_vm10 = vcmask 523264   ;;  %vm1200_vm11 = vcmask 654336   ;;  %vm1202_vm12 = vcmask 785408  }
  0x30   : > { %665 = vmatpush.bf16.msra.mxu0 %v2032_v51  ;;  %678 = vmatpush.bf16.msra.mxu1 %v2036_v55  ;;  %vm1204_vm13 = vcmask 916480  }
  0x31   : > { %691 = vmatpush.bf16.msra.mxu2 %v2040_v56 }
  0x34   : > { %666 = vmatpush.bf16.msra.mxu0 %v2020_v60  ;;  %679 = vmatpush.bf16.msra.mxu1 %v2024_v1  ;;  %v702_v1 = vshrl.u32 %v701_v61, 7 }
  0x35   : > { %692 = vmatpush.bf16.msra.mxu2 %v2028_v2  ;;  %v704_v2 = vand.u32 127, %v701_v61 }
  0x37   : > { %vm2898_vm6 = vcmp.le.s32.totalorder %v704_v2, %v702_v1 }
  0x38   : > { %667 = vmatpush.bf16.msra.mxu0 %v2008_v6  ;;  %680 = vmatpush.bf16.msra.mxu1 %v2012_v10 }
  0x39   : > { %693 = vmatpush.bf16.msra.mxu2 %v2016_v11 }
  0x3c   : > { %668 = vmatpush.bf16.msra.mxu0 %v1996_v15 }
  0x95   : > { %v466_v17 = vpop.xlane.xlu0 %465 }
  0x96   : > { %v474_v18 = vmul.f32 %v2842_v16, %v466_v17  ;;  %v1997_v17 = vld [vmem:[#allocation4 + $0xc] sm:$0xf0] }
  0x97   : > { %v2000_v21 = vor.u32 %v2395_v14, %v1997_v17 }
  0x98   : > { %v2846_v19 = vsub.f32 %v2839_v0, %v474_v18  ;;  %v2003_v18 = vld [vmem:[#allocation4 + $0x8] sm:$0xf] }
  0x99   : > { %681 = vmatpush.bf16.msra.mxu1 %v2000_v21 }
  0x9a   : > { %v476_v20 = vmul.f32 %v2846_v19, %v2846_v19 }
  0x9c   : > { %477 = vadd.xlane.f32.xlu0 %v476_v20  ;;  %v2397_v20 = vld [vmem:[#allocation4 + $0x10] sm:$0xf0] }
  0x9d   : > { %v2004_v22 = vor.u32 %v2397_v20, %v2003_v18 }
  0x9f   : > { %694 = vmatpush.bf16.msra.mxu2 %v2004_v22 }
 0x10f   : > { %v478_v23 = vpop.xlane.xlu0 %477 }
 0x110   : > { %v479_v24 = vmul.f32 %v478_v23, %v2842_v16 }
 0x112   : > { %v480_v25 = vadd.f32 1e-05, %v479_v24 }
 0x114   : > { %2552 = vrsqrt.f32 %v480_v25  ;;  %vm487_vm2 = vweird.f32 %v480_v25 }
 0x11a   : > { %v2553_v26 = vpop.eup %2552 }
 0x11b   : > { %v482_v27 = vmul.f32 %v2553_v26, %v480_v25  ;;  %vm488_vm1 = vweird.f32 %v2553_v26 }
 0x11c   : > { %vm489_vm3 = vmor %vm487_vm2, %vm488_vm1 }
 0x11d   : > { %v483_v28 = vmul.f32 %v2553_v26, %v482_v27 }
 0x11f   : > { %v484_v29 = vmul.f32 0.5, %v483_v28 }
 0x121   : > { %v485_v30 = vsub.f32 1.5, %v484_v29 }
 0x123   : > { %v486_v31 = vmul.f32 %v2553_v26, %v485_v30 }
 0x125   : > { %v490_v33 = vsel %vm489_vm3, %v2553_v26, %v486_v31 }
 0x126   : > { %v491_v34 = vmul.f32 %v490_v33, %v2846_v19 }
 0x128   : > { %v495_v36 = vmul.f32 %v2544_v32, %v491_v34 }
 0x12a   : > { %v499_v37 = vadd.f32 %v2545_v35, %v495_v36 }
 0x12c   : > { %v500_v38 = vpack.c.bf16 %v499_v37, %v499_v37 }
 0x12e   : > { %669 = vmatmul.bf16.vlgmr.msra.gmra.mxu0 %v500_v38  ;;  %682 = vmatmul.bf16.vlgmr.msra.gmra.mxu1 %v500_v38 }
 0x12f   : > { %695 = vmatmul.bf16.vlgmr.msra.gmra.mxu2 %v500_v38 }
 0x1ab   : > { %v670_v39 = vpop.f32.mrf.mxu0  ;;  %v683_v40 = vpop.f32.mrf.mxu1 }
 0x1ac   : > { %v2858_v41 = vpack.c.bf16 %v683_v40, %v683_v40  ;;  %v700_v42 = vmul.f32 0.25, %v670_v39 }
 0x1ae   : > { %825 = vrot.lane.b32.xlu0 %v2858_v41, %s2704_s19  ;;  %767 = vrot.lane.b32.xlu2 %v2858_v41, %s2705_s20  ;;  %v714_v19 = vsel %vm709_vm4, %v2858_v41, 0  ;;  %v2868_v47 = vpack.c.bf16 %v700_v42, %v700_v42 }
 0x1af   : > { %723 = vmatpush.bf16.xpose.msra.mxu3 %v714_v19 }
 0x1b2   : > { %v696_v43 = vpop.f32.mrf.mxu2 }
 0x1b3   : > { %v2866_v44 = vpack.c.bf16 %v696_v43, %v696_v43  ;;  %v672_v45 = vpop.f32.mrf.mxu0  ;;  %v685_v46 = vpop.f32.mrf.mxu1 }
 0x1b5   : > { %v748_v48 = vsel %vm746_vm5, %v2866_v44, 0 }
 0x1b6   : > { %996 = vrot.lane.b32.xlu0 %v2858_v41, %s2706_s21  ;;  %764 = vrot.lane.b32.xlu2 %v2868_v47, %s2705_s20 }
 0x1b7   : > { %757 = vmatpush.bf16.msrb.mxu3 %v748_v48 }
 0x1b8   : > { %2089 = vmatmul.msk.bf16.vlgmr.msra.gmra.mxu3 %vm709_vm4, %v2868_v47 }
 0x1ba   : > { %v698_v49 = vpop.f32.mrf.mxu2 }
 0x1be   : > { %1053 = vrot.lane.b32.xlu0 %v2858_v41, %s2707_s22  ;;  %823 = vrot.lane.b32.xlu2 %v2868_v47, %s2704_s19 }
 0x1c6   : > { %1108 = vrot.lane.b32.xlu0 %v2868_v47, %s2708_s23  ;;  %880 = vrot.lane.b32.xlu2 %v2868_v47, %s2709_s25 }
 0x1ce   : > { %939 = vrot.lane.b32.xlu2 %v2858_v41, %s2710_s26 }
 0x1d6   : > { %937 = vrot.lane.b32.xlu2 %v2868_v47, %s2710_s26 }
 0x1de   : > { %1110 = vrot.lane.b32.xlu2 %v2858_v41, %s2708_s23 }
 0x208   : > { %v768_v50 = vpop.permute.xlu2 %767 }
 0x209   : > { %v773_v51 = vsel %vm709_vm4, %v768_v50, 0 }
 0x20a   : > { %782 = vmatpush.bf16.xpose.msra.mxu3 %v773_v51 }
 0x210   : > { %v765_v52 = vpop.permute.xlu2 %764 }
 0x218   : > { %v824_v53 = vpop.permute.xlu2 %823 }
 0x220   : > { %v826_v54 = vpop.permute.xlu0 %825  ;;  %v881_v55 = vpop.permute.xlu2 %880 }
 0x221   : > { %v831_v56 = vsel %vm709_vm4, %v826_v54, 0 }
 0x222   : > { %840 = vmatpush.bf16.xpose.msrb.mxu2 %v831_v56 }
 0x228   : > { %v997_v57 = vpop.permute.xlu0 %996  ;;  %v940_v58 = vpop.permute.xlu2 %939 }
 0x229   : > { %2093 = vmatmul.msk.bf16.vlgmr.msrb.gmra.mxu2 %vm709_vm4, %v824_v53  ;;  %v945_v59 = vsel %vm709_vm4, %v940_v58, 0  ;;  %v1002_v29 = vsel %vm709_vm4, %v997_v57, 0 }
 0x22a   : > { %954 = vmatpush.bf16.xpose.msrb.mxu1 %v945_v59 }
 0x230   : > { %v1054_v60 = vpop.permute.xlu0 %1053  ;;  %v938_v63 = vpop.permute.xlu2 %937 }
 0x231   : > { %v1059_v62 = vsel %vm709_vm4, %v1054_v60, 0  ;;  %2097 = vmatmul.msk.bf16.vlgmr.msrb.gmra.mxu1 %vm709_vm4, %v938_v63 }
 0x232   : > { %1068 = vmatpush.bf16.xpose.msra.mxu1 %v1059_v62 }
 0x238   : > { %v1111_v32 = vpop.permute.xlu2 %1110  ;;  %v1109_v34 = vpop.permute.xlu0 %1108 }
 0x239   : > { %v1116_v33 = vsel %vm709_vm4, %v1111_v32, 0 }
 0x23b   : > { %v725_v4 = vpop.f32.mrf.mxu3 }
 0x23c   : > { %v729_v5 = vsel %vm2898_vm6, %v725_v4, -inf }
 0x23d   : > { %v731_v6 = vsel %vm730_vm7, %v729_v5, -inf }
 0x23e   : > { %732 = vmax.xlane.f32.xlu1 %v731_v6 }
 0x243   : > { %v727_v7 = vpop.f32.mrf.mxu3 }
 0x2ac   : > { %v842_v8 = vpop.f32.mrf.mxu2 }
 0x2ad   : > { %v846_v21 = vsel %vm2898_vm6, %v842_v8, -inf }
 0x2ae   : > { %v956_v9 = vpop.f32.mrf.mxu1  ;;  %v847_v22 = vsel %vm730_vm7, %v846_v21, -inf }
 0x2af   : > { %v2907_v10 = vsel %vm2898_vm6, %v956_v9, -inf }
 0x2b0   : > { %v961_v13 = vsel %vm730_vm7, %v2907_v10, -inf }
 0x2b1   : > { %v733_v11 = vpop.xlane.xlu1 %732  ;;  %962 = vmax.xlane.f32.xlu2 %v961_v13 }
 0x2b2   : > { %v734_v12 = vsub.f32 %v729_v5, %v733_v11 }
 0x2b4   : > { %v735_v14 = vmul.f32 1.442695, %v734_v12  ;;  %v844_v15 = vpop.f32.mrf.mxu2 }
 0x2b6   : > { %2554 = vpow2.f32 %v735_v14  ;;  %v958_v17 = vpop.f32.mrf.mxu1 }
 0x2bc   : > { %v2555_v18 = vpop.eup %2554 }
 0x2bd   : > { %v737_v20 = vsel %vm730_vm7, %v2555_v18, 0.0 }
 0x2be   : > { %738 = vadd.xlane.f32.xlu1 %v737_v20 }
 0x2d7   : > { %882 = vrot.lane.b32.xlu1 %v2858_v41, %s2709_s25 }
 0x2df   : > { %994 = vrot.lane.b32.xlu1 %v2868_v47, %s2706_s21 }
 0x2e7   : > { %1051 = vrot.lane.b32.xlu1 %v2868_v47, %s2707_s22 }
 0x311   : > { %848 = vmax.xlane.f32.xlu1 %v847_v22 }
 0x324   : > { %v963_v62 = vpop.xlane.xlu2 %962 }
 0x325   : > { %v964_v63 = vsub.f32 %v2907_v10, %v963_v62 }
 0x327   : > { %v965_v1 = vmul.f32 1.442695, %v964_v63 }
 0x331   : > { %v739_v23 = vpop.xlane.xlu1 %738 }
 0x332   : > { %2556 = vrcp.f32 %v739_v23 }
 0x338   : > { %v2557_v24 = vpop.eup %2556 }
 0x339   : > { %v741_v25 = vmul.f32 %v2557_v24, %v2555_v18 }
 0x33b   : > { %v742_v26 = vpack.c.bf16 %v741_v25, %v741_v25 }
 0x33d   : > { %2090 = vmatmul.msk.bf16.vlgmr.msrb.gmra.mxu3 %vm730_vm7, %v742_v26 }
 0x349   : > { %v883_v27 = vpop.permute.xlu1 %882 }
 0x34a   : > { %v888_v28 = vsel %vm709_vm4, %v883_v27, 0 }
 0x34b   : > { %897 = vmatpush.bf16.xpose.msrb.mxu3 %v888_v28 }
 0x34d   : > { %2091 = vmatmul.msk.bf16.vlgmr.msra.gmra.mxu3 %vm709_vm4, %v765_v52 }
 0x351   : > { %v995_v30 = vpop.permute.xlu1 %994 }
 0x353   : > { %1011 = vmatpush.bf16.xpose.msra.mxu3 %v1002_v29 }
 0x359   : > { %v1052_v31 = vpop.permute.xlu1 %1051 }
 0x35a   : > { %2101 = vmatmul.msk.bf16.vlgmr.msra.gmra.mxu1 %vm709_vm4, %v1052_v31 }
 0x35d   : > { %2095 = vmatmul.msk.bf16.vlgmr.msrb.gmra.mxu3 %vm709_vm4, %v881_v55 }
 0x35e   : > { %1125 = vmatpush.bf16.xpose.msrb.mxu3 %v1116_v33 }
 0x36d   : > { %2099 = vmatmul.msk.bf16.vlgmr.msra.gmra.mxu3 %vm709_vm4, %v995_v30 }
 0x37d   : > { %2103 = vmatmul.msk.bf16.vlgmr.msrb.gmra.mxu3 %vm709_vm4, %v1109_v34 }
 0x384   : > { %v849_v36 = vpop.xlane.xlu1 %848 }
 0x385   : > { %v850_v38 = vsub.f32 %v846_v21, %v849_v36 }
 0x387   : > { %v851_v39 = vmul.f32 1.442695, %v850_v38 }
 0x389   : > { %2558 = vpow2.f32 %v851_v39 }
 0x38a   : > { %2560 = vpow2.f32 %v965_v1 }
 0x38f   : > { %v2935_v42 = vpop.eup %2558 }
 0x390   : > { %v853_v48 = vsel %vm730_vm7, %v2935_v42, 0.0  ;;  %v2561_v2 = vpop.eup %2560 }
 0x391   : > { %v967_v3 = vsel %vm730_vm7, %v2561_v2, 0.0 }
 0x3c0   : > { %v2930_v35 = vpop.f32.mrf.mxu3 }
 0x3c8   : > { %v761_v37 = vpop.f32.mrf.mxu3 }
 0x3d0   : > { %v784_v40 = vpop.f32.mrf.mxu3 }
 0x3d1   : > { %v788_v41 = vsel %vm2898_vm6, %v784_v40, -inf }
 0x3d2   : > { %v789_v19 = vsel %vm730_vm7, %v788_v41, -inf }
 0x3d3   : > { %790 = vmax.xlane.f32.xlu2 %v789_v19 }
 0x3d7   : > { %v1070_v43 = vpop.f32.mrf.mxu1 }
 0x3d8   : > { %v2939_v45 = vsel %vm2898_vm6, %v1070_v43, -inf  ;;  %v786_v46 = vpop.f32.mrf.mxu3 }
 0x3d9   : > { %v1075_v47 = vsel %vm730_vm7, %v2939_v45, -inf }
 0x3da   : > { %1076 = vmax.xlane.f32.xlu0 %v1075_v47 }
 0x3db   : > { %854 = vadd.xlane.f32.xlu2 %v853_v48 }
 0x3df   : > { %v1072_v49 = vpop.f32.mrf.mxu1 }
 0x3e0   : > { %v899_v50 = vpop.f32.mrf.mxu3 }
 0x3e1   : > { %v903_v51 = vsel %vm2898_vm6, %v899_v50, -inf }
 0x3e2   : > { %v904_v52 = vsel %vm730_vm7, %v903_v51, -inf }
 0x3e3   : > { %905 = vmax.xlane.f32.xlu0 %v904_v52 }
 0x3e8   : > { %v901_v53 = vpop.f32.mrf.mxu3 }
 0x3f0   : > { %v1013_v54 = vpop.f32.mrf.mxu3 }
 0x3f1   : > { %v1017_v55 = vsel %vm2898_vm6, %v1013_v54, -inf }
 0x3f2   : > { %v1018_v56 = vsel %vm730_vm7, %v1017_v55, -inf }
 0x3f3   : > { %1019 = vmax.xlane.f32.xlu1 %v1018_v56 }
 0x3f7   : > { %802 = vrot.lane.b32.xlu0 %v2866_v44, %s2705_s20 }
 0x3f8   : > { %v1015_v57 = vpop.f32.mrf.mxu3 }
 0x400   : > { %v1127_v58 = vpop.f32.mrf.mxu3 }
 0x401   : > { %v1131_v59 = vsel %vm2898_vm6, %v1127_v58, -inf }
 0x402   : > { %v1132_v60 = vsel %vm730_vm7, %v1131_v59, -inf }
 0x403   : > { %1133 = vmax.xlane.f32.xlu2 %v1132_v60 }
 0x408   : > { %v1129_v61 = vpop.f32.mrf.mxu3 }
 0x40c   : > { %916 = vrot.lane.b32.xlu1 %v2866_v44, %s2709_s25 }
 0x414   : > { %973 = vrot.lane.b32.xlu1 %v2866_v44, %s2710_s26 }
 0x41b   : > { %859 = vrot.lane.b32.xlu2 %v2866_v44, %s2704_s19 }
 0x421   : > { %968 = vadd.xlane.f32.xlu0 %v967_v3 }
 0x446   : > { %v791_v4 = vpop.xlane.xlu2 %790 }
 0x447   : > { %v792_v5 = vsub.f32 %v788_v41, %v791_v4 }
 0x449   : > { %v793_v6 = vmul.f32 1.442695, %v792_v5 }
 0x44b   : > { %2562 = vpow2.f32 %v793_v6 }
 0x44d   : > { %v1077_v7 = vpop.xlane.xlu0 %1076 }
 0x44e   : > { %v855_v22 = vpop.xlane.xlu2 %854  ;;  %v1078_v40 = vsub.f32 %v2939_v45, %v1077_v7 }
 0x450   : > { %v1079_v19 = vmul.f32 1.442695, %v1078_v40 }
 0x451   : > { %v2563_v8 = vpop.eup %2562 }
 0x452   : > { %v795_v9 = vsel %vm730_vm7, %v2563_v8, 0.0 }
 0x453   : > { %796 = vadd.xlane.f32.xlu1 %v795_v9 }
 0x456   : > { %v906_v10 = vpop.xlane.xlu0 %905 }
 0x457   : > { %v907_v11 = vsub.f32 %v903_v51, %v906_v10 }
 0x459   : > { %v908_v12 = vmul.f32 1.442695, %v907_v11 }
 0x45b   : > { %2564 = vpow2.f32 %v908_v12 }
 0x461   : > { %v2565_v13 = vpop.eup %2564 }
 0x462   : > { %v910_v14 = vsel %vm730_vm7, %v2565_v13, 0.0 }
 0x463   : > { %911 = vadd.xlane.f32.xlu1 %v910_v14 }
 0x466   : > { %v1020_v15 = vpop.xlane.xlu1 %1019 }
 0x467   : > { %v1021_v17 = vsub.f32 %v1017_v55, %v1020_v15 }
 0x469   : > { %v1022_v18 = vmul.f32 1.442695, %v1021_v17  ;;  %v803_v20 = vpop.permute.xlu0 %802 }
 0x46a   : > { %v808_v21 = vsel %vm746_vm5, %v803_v20, 0 }
 0x46b   : > { %2566 = vpow2.f32 %v1022_v18  ;;  %817 = vmatpush.bf16.msrb.mxu0 %v808_v21 }
 0x46c   : > { %2568 = vrcp.f32 %v855_v22 }
 0x471   : > { %v2567_v23 = vpop.eup %2566 }
 0x472   : > { %v1024_v24 = vsel %vm730_vm7, %v2567_v23, 0.0  ;;  %v2569_v28 = vpop.eup %2568 }
 0x473   : > { %1025 = vadd.xlane.f32.xlu2 %v1024_v24  ;;  %v857_v29 = vmul.f32 %v2569_v28, %v2935_v42  ;;  %v2424_v28 = vld [vmem:[%s3065_s5 + $0x28] sm:$0xff] }
 0x475   : > { %v858_v36 = vpack.c.bf16 %v857_v29, %v857_v29  ;;  %v2423_v29 = vld [vmem:[%s3065_s5 + $0x20] sm:$0xff] }
 0x476   : > { %v1134_v25 = vpop.xlane.xlu2 %1133 }
 0x477   : > { %v1135_v26 = vsub.f32 %v1131_v59, %v1134_v25 }
 0x479   : > { %v1136_v27 = vmul.f32 1.442695, %v1135_v26  ;;  %v2426_v26 = vld [vmem:[%s3065_s5 + $0x38] sm:$0xff] }
 0x47a   : > { %1275 = vmatpush.bf16.msrb.mxu1 %v2426_v26 }
 0x47b   : > { %2570 = vpow2.f32 %v1136_v27  ;;  %v2425_v27 = vld [vmem:[%s3065_s5 + $0x30] sm:$0xff] }
 0x47c   : > { %1030 = vrot.lane.b32.xlu1 %v2866_v44, %s2706_s21 }
 0x47e   : > { %v917_v30 = vpop.permute.xlu1 %916  ;;  %v860_v31 = vpop.permute.xlu2 %859  ;;  %1276 = vmatpush.bf16.msrb.mxu1 %v2425_v27 }
 0x47f   : > { %v922_v32 = vsel %vm746_vm5, %v917_v30, 0  ;;  %v865_v33 = vsel %vm746_vm5, %v860_v31, 0  ;;  %v2422_v30 = vld [vmem:[%s3065_s5 + $0x18] sm:$0xff]  ;;  %v2421_v31 = vld [vmem:[%s3065_s5 + $0x10] sm:$0xff] }
 0x480   : > { %874 = vmatpush.bf16.msra.mxu2 %v865_v33  ;;  %931 = vmatpush.bf16.msra.mxu0 %v922_v32  ;;  %v2420_v32 = vld [vmem:[%s3065_s5 + $0x8] sm:$0xff]  ;;  %v2419_v33 = vld [vmem:[%s3065_s5] sm:$0xff] }
 0x481   : > { %v2571_v34 = vpop.eup %2570 }
 0x482   : > { %v1138_v37 = vsel %vm730_vm7, %v2571_v34, 0.0  ;;  %1277 = vmatpush.bf16.msrb.mxu1 %v2424_v28  ;;  %v2448_v28 = vld [vmem:[#allocation6 + $0xac] sm:$0xf] }
 0x483   : > { %1139 = vadd.xlane.f32.xlu0 %v1138_v37  ;;  %2094 = vmatmul.msk.bf16.vlgmr.msra.gmra.mxu2 %vm730_vm7, %v858_v36 }
 0x486   : > { %v974_v38 = vpop.permute.xlu1 %973  ;;  %1278 = vmatpush.bf16.msrb.mxu1 %v2423_v29  ;;  %v2229_v29 = vld [vmem:[#allocation6 + $0xb8] sm:$0xf0] }
 0x487   : > { %v979_v39 = vsel %vm746_vm5, %v974_v38, 0 }
 0x488   : > { %988 = vmatpush.bf16.msrb.mxu2 %v979_v39 }
 0x48a   : > { %1279 = vmatpush.bf16.msrb.mxu1 %v2422_v30  ;;  %v2232_v30 = vor.u32 %v2448_v28, %v2229_v29  ;;  %v2149_v28 = vld [vmem:[#allocation6 + $0x18] sm:$0xf0] }
 0x48b   : > { %1144 = vrot.lane.b32.xlu2 %v2866_v44, %s2708_s23 }
 0x48e   : > { %1280 = vmatpush.bf16.msrb.mxu1 %v2421_v31  ;;  %v2203_v31 = vld [vmem:[#allocation6 + $0x80] sm:$0xf] }
 0x492   : > { %1281 = vmatpush.bf16.msrb.mxu1 %v2420_v32  ;;  %v2445_v32 = vld [vmem:[#allocation6 + $0x8c] sm:$0xf0] }
 0x494   : > { %v969_v41 = vpop.xlane.xlu0 %968 }
 0x495   : > { %2572 = vrcp.f32 %v969_v41 }
 0x496   : > { %2574 = vpow2.f32 %v1079_v19  ;;  %1282 = vmatpush.bf16.msrb.mxu1 %v2419_v33  ;;  %v2443_v33 = vld [vmem:[#allocation6 + $0x84] sm:$0xf] }
 0x497   : > { %1087 = vrot.lane.b32.xlu0 %v2866_v44, %s2707_s22 }
 0x49b   : > { %v2573_v42 = vpop.eup %2572 }
 0x49c   : > { %v971_v43 = vmul.f32 %v2573_v42, %v2561_v2  ;;  %v2575_v47 = vpop.eup %2574 }
 0x49d   : > { %v1081_v48 = vsel %vm730_vm7, %v2575_v47, 0.0 }
 0x49e   : > { %v972_v46 = vpack.c.bf16 %v971_v43, %v971_v43 }
 0x4a0   : > { %2098 = vmatmul.msk.bf16.vlgmr.msrb.gmra.mxu2 %vm730_vm7, %v972_v46 }
 0x4a6   : > { %1082 = vadd.xlane.f32.xlu1 %v1081_v48 }
 0x4c6   : > { %v797_v49 = vpop.xlane.xlu1 %796 }
 0x4c7   : > { %2576 = vrcp.f32 %v797_v49 }
 0x4cd   : > { %v2577_v50 = vpop.eup %2576 }
 0x4ce   : > { %v799_v45 = vmul.f32 %v2577_v50, %v2563_v8 }
 0x4d0   : > { %v800_v51 = vpack.c.bf16 %v799_v45, %v799_v45 }
 0x4d2   : > { %2092 = vmatmul.msk.bf16.vlgmr.msrb.gmra.mxu0 %vm730_vm7, %v800_v51 }
 0x4d6   : > { %v912_v52 = vpop.xlane.xlu1 %911 }
 0x4d7   : > { %2578 = vrcp.f32 %v912_v52 }
 0x4dd   : > { %v2579_v44 = vpop.eup %2578 }
 0x4de   : > { %v914_v53 = vmul.f32 %v2579_v44, %v2565_v13 }
 0x4e0   : > { %v915_v54 = vpack.c.bf16 %v914_v53, %v914_v53  ;;  %v2251_v53 = vld [vmem:[#allocation6 + $0xe0] sm:$0xf] }
 0x4e2   : > { %2096 = vmatmul.msk.bf16.vlgmr.msra.gmra.mxu0 %vm730_vm7, %v915_v54  ;;  %v2457_v54 = vld [vmem:[#allocation6 + $0xec] sm:$0xf0] }
 0x4e6   : > { %v1026_v55 = vpop.xlane.xlu2 %1025 }
 0x4e7   : > { %2580 = vrcp.f32 %v1026_v55  ;;  %v2455_v55 = vld [vmem:[#allocation6 + $0xe4] sm:$0xf] }
 0x4ed   : > { %v2581_v56 = vpop.eup %2580 }
 0x4ee   : > { %v1028_v57 = vmul.f32 %v2581_v56, %v2567_v23  ;;  %v1031_v58 = vpop.permute.xlu1 %1030  ;;  %v1145_v59 = vpop.permute.xlu2 %1144  ;;  %v2252_v56 = vor.u32 %v2457_v54, %v2251_v53  ;;  %v2197_v53 = vld [vmem:[#allocation6 + $0x78] sm:$0xf0] }
 0x4ef   : > { %v1036_v60 = vsel %vm746_vm5, %v1031_v58, 0  ;;  %v1150_v61 = vsel %vm746_vm5, %v1145_v59, 0  ;;  %v2259_v58 = vld [vmem:[#allocation6 + $0xe8] sm:$0xf]  ;;  %v2458_v59 = vld [vmem:[#allocation6 + $0xf4] sm:$0xf0] }
 0x4f0   : > { %v1029_v62 = vpack.c.bf16 %v1028_v57, %v1028_v57  ;;  %1045 = vmatpush.bf16.msrb.mxu0 %v1036_v60  ;;  %v2253_v57 = vld [vmem:[#allocation6 + $0xf0] sm:$0xf0] }
 0x4f1   : > { %v2256_v60 = vor.u32 %v2455_v55, %v2253_v57  ;;  %v2171_v55 = vld [vmem:[#allocation6 + $0x40] sm:$0xf]  ;;  %v2435_v57 = vld [vmem:[#allocation6 + $0x44] sm:$0xf] }
 0x4f3   : > { %2100 = vmatmul.msk.bf16.vlgmr.msrb.gmra.mxu0 %vm730_vm7, %v1029_v62  ;;  %v2456_v62 = vld [vmem:[#allocation6 + $0xec] sm:$0xf]  ;;  %1535 = vmatpush.bf16.msra.mxu3 %v2256_v60  ;;  %v2179_v60 = vld [vmem:[#allocation6 + $0x48] sm:$0xf] }
 0x4f4   : > { %1159 = vmatpush.bf16.msra.mxu0 %v1150_v61  ;;  %v2260_v61 = vor.u32 %v2458_v59, %v2259_v58  ;;  %v2173_v59 = vld [vmem:[#allocation6 + $0x50] sm:$0xf0] }
 0x4f6   : > { %v1140_v63 = vpop.xlane.xlu0 %1139 }
 0x4f7   : > { %2582 = vrcp.f32 %v1140_v63  ;;  %v2261_v63 = vld [vmem:[#allocation6 + $0xf8] sm:$0xf0] }
 0x4f8   : > { %1548 = vmatpush.bf16.msrb.mxu0 %v2260_v61  ;;  %v2438_v61 = vld [vmem:[#allocation6 + $0x54] sm:$0xf0] }
 0x4fd   : > { %v2583_v1 = vpop.eup %2582 }
 0x4fe   : > { %v1142_v2 = vmul.f32 %v2583_v1, %v2571_v34  ;;  %v2264_v1 = vor.u32 %v2456_v62, %v2261_v63  ;;  %v2176_v62 = vor.u32 %v2435_v57, %v2173_v59  ;;  %v2180_v63 = vor.u32 %v2438_v61, %v2179_v60  ;;  %v2477_v57 = vld [vmem:[#allocation8 + $0x90] sm:$0xff]  ;;  %v2547_v60 = vld [vmem:[%s3067_s7] ss:$0 sm:$0xff] }
 0x500   : > { %v1143_v3 = vpack.c.bf16 %v1142_v2, %v1142_v2  ;;  %1561 = vmatpush.bf16.msra.mxu1 %v2264_v1  ;;  %v2436_v1 = vld [vmem:[#allocation6 + $0x4c] sm:$0xf] }
 0x503   : > { %2104 = vmatmul.msk.bf16.vlgmr.msra.gmra.mxu0 %vm730_vm7, %v1143_v3 }
 0x506   : > { %v876_v4 = vpop.f32.mrf.mxu2 }
 0x507   : > { %1170 = vrot.lane.b32.xlu1 %v876_v4, %s2707_s22 }
 0x509   : > { %v1088_v5 = vpop.permute.xlu0 %1087 }
 0x50a   : > { %v1093_v6 = vsel %vm746_vm5, %v1088_v5, 0  ;;  %v2235_v5 = vld [vmem:[#allocation6 + $0xc0] sm:$0xf] }
 0x50b   : > { %1102 = vmatpush.bf16.msra.mxu2 %v1093_v6  ;;  %v2453_v6 = vld [vmem:[#allocation6 + $0xcc] sm:$0xf0] }
 0x50e   : > { %v878_v7 = vpop.f32.mrf.mxu2 }
 0x50f   : > { %1522 = vmatpush.bf16.msrb.mxu2 %v2252_v56  ;;  %v2451_v7 = vld [vmem:[#allocation6 + $0xc4] sm:$0xf]  ;;  %v2437_v56 = vld [vmem:[#allocation6 + $0x4c] sm:$0xf0] }
 0x510   : > { %v2172_v58 = vor.u32 %v2437_v56, %v2171_v55 }
 0x519   : > { %v1083_v8 = vpop.xlane.xlu1 %1082 }
 0x51a   : > { %2584 = vrcp.f32 %v1083_v8  ;;  %v2236_v8 = vor.u32 %v2453_v6, %v2235_v5  ;;  %v2433_v5 = vld [vmem:[#allocation6 + $0x2c] sm:$0xf0]  ;;  %v2431_v6 = vld [vmem:[#allocation6 + $0x24] sm:$0xf] }
 0x51c   : > { %1523 = vmatpush.bf16.msrb.mxu2 %v2236_v8  ;;  %v2157_v8 = vld [vmem:[#allocation6 + $0x30] sm:$0xf0] }
 0x520   : > { %v2585_v9 = vpop.eup %2584 }
 0x521   : > { %v1085_v10 = vmul.f32 %v2585_v9, %v2575_v47  ;;  %v2237_v9 = vld [vmem:[#allocation6 + $0xd0] sm:$0xf0] }
 0x523   : > { %v1086_v11 = vpack.c.bf16 %v1085_v10, %v1085_v10  ;;  %v990_v12 = vpop.f32.mrf.mxu2  ;;  %v2243_v10 = vld [vmem:[#allocation6 + $0xc8] sm:$0xf] }
 0x524   : > { %1178 = vrot.lane.b32.xlu2 %v990_v12, %s2710_s26  ;;  %v2240_v12 = vor.u32 %v2451_v7, %v2237_v9  ;;  %v2163_v9 = vld [vmem:[#allocation6 + $0x28] sm:$0xf] }
 0x525   : > { %2102 = vmatmul.msk.bf16.vlgmr.msra.gmra.mxu2 %vm730_vm7, %v1086_v11  ;;  %v2454_v11 = vld [vmem:[#allocation6 + $0xd4] sm:$0xf0] }
 0x526   : > { %1536 = vmatpush.bf16.msra.mxu3 %v2240_v12 }
 0x52b   : > { %v992_v13 = vpop.f32.mrf.mxu2 }
 0x52c   : > { %v2244_v13 = vor.u32 %v2454_v11, %v2243_v10  ;;  %v2434_v10 = vld [vmem:[#allocation6 + $0x34] sm:$0xf0]  ;;  %v2160_v11 = vor.u32 %v2431_v6, %v2157_v8  ;;  %v2461_v6 = vld [vmem:[#allocation8 + $0x10] sm:$0xff]  ;;  %v2483_v8 = vld [vmem:[#allocation8 + $0xc0] sm:$0xff] }
 0x52d   : > { %v2164_v12 = vor.u32 %v2434_v10, %v2163_v9  ;;  %v2460_v9 = vld [vmem:[#allocation8 + $0x8] sm:$0xff] }
 0x52e   : > { %1549 = vmatpush.bf16.msrb.mxu0 %v2244_v13  ;;  %v2432_v13 = vld [vmem:[#allocation6 + $0x2c] sm:$0xf] }
 0x52f   : > { %v2468_v10 = vld [vmem:[#allocation8 + $0x48] sm:$0xff] }
 0x54f   : > { %v819_v14 = vpop.f32.mrf.mxu0 }
 0x550   : > { %1166 = vrot.lane.b32.xlu0 %v819_v14, %s2708_s23  ;;  %v2452_v14 = vld [vmem:[#allocation6 + $0xcc] sm:$0xf] }
 0x557   : > { %v821_v15 = vpop.f32.mrf.mxu0 }
 0x558   : > { %v2245_v15 = vld [vmem:[#allocation6 + $0xd8] sm:$0xf0] }
 0x55f   : > { %v933_v17 = vpop.f32.mrf.mxu0 }
 0x560   : > { %1174 = vrot.lane.b32.xlu0 %v933_v17, %s2706_s21  ;;  %v2248_v17 = vor.u32 %v2452_v14, %v2245_v15  ;;  %v2165_v14 = vld [vmem:[#allocation6 + $0x38] sm:$0xf0]  ;;  %v2139_v15 = vld [vmem:[#allocation6] sm:$0xf] }
 0x562   : > { %1562 = vmatpush.bf16.msra.mxu1 %v2248_v17  ;;  %v2168_v17 = vor.u32 %v2432_v13, %v2165_v14  ;;  %v1352_v13 = vld [vmem:[%s3070_s10] sm:$0xf] }
 0x563   : > { %v1356_v14 = vperm.slane %v1352_v13, 2 }
 0x566   : > { %1563 = vmatpush.bf16.msra.mxu1 %v2232_v30 }
 0x567   : > { %v935_v18 = vpop.f32.mrf.mxu0 }
 0x568   : > { %v2219_v18 = vld [vmem:[#allocation6 + $0xa0] sm:$0xf] }
 0x570   : > { %v1047_v20 = vpop.f32.mrf.mxu0 }
 0x571   : > { %1182 = vrot.lane.b32.xlu0 %v1047_v20, %s2709_s25  ;;  %v2449_v20 = vld [vmem:[#allocation6 + $0xac] sm:$0xf0] }
 0x578   : > { %v1049_v21 = vpop.f32.mrf.mxu0 }
 0x579   : > { %v1171_v40 = vpop.permute.xlu1 %1170  ;;  %v2447_v21 = vld [vmem:[#allocation6 + $0xa4] sm:$0xf] }
 0x57e   : > { %v1179_v37 = vpop.permute.xlu2 %1178 }
 0x580   : > { %v1161_v22 = vpop.f32.mrf.mxu0 }
 0x581   : > { %1190 = vrot.lane.b32.xlu0 %v1161_v22, %s2705_s20  ;;  %v2220_v22 = vor.u32 %v2449_v20, %v2219_v18  ;;  %v2429_v18 = vld [vmem:[#allocation6 + $0xc] sm:$0xf0]  ;;  %v2427_v20 = vld [vmem:[#allocation6 + $0x4] sm:$0xf]  ;;  %s460_s20 = scalar_lea.vmem %s3073_s13, %s1991_s4 }
 0x583   : > { %1524 = vmatpush.bf16.msrb.mxu2 %v2220_v22  ;;  %v2140_v22 = vor.u32 %v2429_v18, %v2139_v15  ;;  %v1357_v15 = vperm.slane %v1352_v13, 3 }
 0x588   : > { %v1163_v23 = vpop.f32.mrf.mxu0 }
 0x589   : > { %v2221_v23 = vld [vmem:[#allocation6 + $0xb0] sm:$0xf0] }
 0x58a   : > { %v2224_v26 = vor.u32 %v2447_v21, %v2221_v23  ;;  %v2141_v21 = vld [vmem:[#allocation6 + $0x10] sm:$0xf0] }
 0x58b   : > { %v2144_v23 = vor.u32 %v2427_v20, %v2141_v21 }
 0x58c   : > { %1537 = vmatpush.bf16.msra.mxu3 %v2224_v26  ;;  %v2428_v26 = vld [vmem:[#allocation6 + $0xc] sm:$0xf] }
 0x58d   : > { %v2152_v29 = vor.u32 %v2428_v26, %v2149_v28 }
 0x5a8   : > { %v1104_v24 = vpop.f32.mrf.mxu2 }
 0x5a9   : > { %1186 = vrot.lane.b32.xlu2 %v1104_v24, %s2704_s19  ;;  %v2227_v24 = vld [vmem:[#allocation6 + $0xa8] sm:$0xf] }
 0x5b0   : > { %v1106_v25 = vpop.f32.mrf.mxu2 }
 0x5b1   : > { %v2450_v25 = vld [vmem:[#allocation6 + $0xb4] sm:$0xf0] }
 0x5b2   : > { %v2228_v27 = vor.u32 %v2450_v25, %v2227_v24  ;;  %v2147_v24 = vld [vmem:[#allocation6 + $0x8] sm:$0xf]  ;;  %v2430_v25 = vld [vmem:[#allocation6 + $0x14] sm:$0xf0] }
 0x5b4   : > { %1550 = vmatpush.bf16.msrb.mxu0 %v2228_v27  ;;  %v2148_v27 = vor.u32 %v2430_v25, %v2147_v24 }
 0x5c2   : > { %v1167_v34 = vpop.permute.xlu0 %1166 }
 0x5c3   : > { %v1193_v38 = vsel %vm709_vm4, %v2930_v35, %v1167_v34  ;;  %v2546_v35 = vld [vmem:[%s3066_s6] ss:$0 sm:$0xff]  ;;  %v2204_v34 = vor.u32 %v2445_v32, %v2203_v31  ;;  %v2482_v31 = vld [vmem:[#allocation8 + $0xb8] sm:$0xff] }
 0x5c4   : > { %v1195_v41 = vsel %vm1194_vm8, %v1193_v38, %v1171_v40  ;;  %v2446_v38 = vld [vmem:[#allocation6 + $0x94] sm:$0xf0] }
 0x5c5   : > { %1525 = vmatpush.bf16.msrb.mxu2 %v2204_v34  ;;  %v2490_v32 = vld [vmem:[#allocation8 + $0xf8] sm:$0xff] }
 0x5c6   : > { %v2466_v34 = vld [vmem:[#allocation8 + $0x38] sm:$0xff] }
 0x5d2   : > { %v1175_v36 = vpop.permute.xlu0 %1174 }
 0x5d3   : > { %v1197_v19 = vsel %vm1196_vm9, %v1195_v41, %v1175_v36  ;;  %v2205_v36 = vld [vmem:[#allocation6 + $0x90] sm:$0xf0]  ;;  %v2444_v41 = vld [vmem:[#allocation6 + $0x8c] sm:$0xf] }
 0x5d4   : > { %v1199_v42 = vsel %vm1198_vm10, %v1197_v19, %v1179_v37  ;;  %v2211_v37 = vld [vmem:[#allocation6 + $0x88] sm:$0xf]  ;;  %v2213_v19 = vld [vmem:[#allocation6 + $0x98] sm:$0xf0] }
 0x5d5   : > { %v2212_v40 = vor.u32 %v2446_v38, %v2211_v37  ;;  %v2481_v37 = vld [vmem:[#allocation8 + $0xb0] sm:$0xff] }
 0x5d6   : > { %v2489_v38 = vld [vmem:[#allocation8 + $0xf0] sm:$0xff] }
 0x5d7   : > { %1551 = vmatpush.bf16.msrb.mxu0 %v2212_v40  ;;  %v2465_v40 = vld [vmem:[#allocation8 + $0x30] sm:$0xff] }
 0x5e3   : > { %v1183_v39 = vpop.permute.xlu0 %1182 }
 0x5e4   : > { %v1201_v43 = vsel %vm1200_vm11, %v1199_v42, %v1183_v39  ;;  %v2208_v39 = vor.u32 %v2443_v33, %v2205_v36  ;;  %v2216_v42 = vor.u32 %v2444_v41, %v2213_v19  ;;  %v2474_v36 = vld [vmem:[#allocation8 + $0x78] sm:$0xff]  ;;  %v2473_v41 = vld [vmem:[#allocation8 + $0x70] sm:$0xff]  ;;  %v2480_v19 = vld [vmem:[#allocation8 + $0xa8] sm:$0xff] }
 0x5e6   : > { %1538 = vmatpush.bf16.msra.mxu3 %v2208_v39  ;;  %1564 = vmatpush.bf16.msra.mxu1 %v2216_v42  ;;  %v2488_v42 = vld [vmem:[#allocation8 + $0xe8] sm:$0xff] }
 0x5f3   : > { %v1191_v47 = vpop.permute.xlu0 %1190 }
 0x603   : > { %v1187_v46 = vpop.permute.xlu2 %1186 }
 0x604   : > { %v1203_v48 = vsel %vm1202_vm12, %v1201_v43, %v1187_v46  ;;  %v2187_v43 = vld [vmem:[#allocation6 + $0x60] sm:$0xf]  ;;  %v2441_v46 = vld [vmem:[#allocation6 + $0x6c] sm:$0xf0] }
 0x605   : > { %v1205_v49 = vsel %vm1204_vm13, %v1203_v48, %v1191_v47  ;;  %v2439_v47 = vld [vmem:[#allocation6 + $0x64] sm:$0xf]  ;;  %v2188_v48 = vor.u32 %v2441_v46, %v2187_v43  ;;  %v2464_v43 = vld [vmem:[#allocation8 + $0x28] sm:$0xff] }
 0x606   : > { %v1206_v50 = vpack.c.bf16 %v1205_v49, %v1205_v49  ;;  %v2189_v49 = vld [vmem:[#allocation6 + $0x70] sm:$0xf0]  ;;  %v2479_v46 = vld [vmem:[#allocation8 + $0xa0] sm:$0xff] }
 0x607   : > { %1526 = vmatpush.bf16.msrb.mxu2 %v2188_v48 }
 0x608   : > { %1283 = vmatmul.bf16.vlgmr.msrb.gmra.mxu1 %v1206_v50  ;;  %v2195_v50 = vld [vmem:[#allocation6 + $0x68] sm:$0xf] }
 0x60b   : > { %1527 = vmatpush.bf16.msrb.mxu2 %v2172_v58  ;;  %v2485_v58 = vld [vmem:[#allocation8 + $0xd0] sm:$0xff] }
 0x685   : > { %v1284_v45 = vpop.f32.mrf.mxu1 }
 0x686   : > { %v1285_v51 = vadd.f32 %v2546_v35, %v1284_v45  ;;  %v2442_v35 = vld [vmem:[#allocation6 + $0x74] sm:$0xf0]  ;;  %v2192_v45 = vor.u32 %v2439_v47, %v2189_v49  ;;  %v2487_v47 = vld [vmem:[#allocation8 + $0xe0] sm:$0xff] }
 0x687   : > { %v2463_v49 = vld [vmem:[#allocation8 + $0x20] sm:$0xff] }
 0x688   : > { %v3028_v52 = vadd.f32 %v1285_v51, %v2839_v0  ;;  %v2196_v51 = vor.u32 %v2442_v35, %v2195_v50  ;;  %1539 = vmatpush.bf16.msra.mxu3 %v2192_v45  ;;  %v2471_v50 = vld [vmem:[#allocation8 + $0x60] sm:$0xff] }
 0x68a   : > { %1291 = vadd.xlane.f32.xlu2 %v3028_v52  ;;  %1552 = vmatpush.bf16.msrb.mxu0 %v2196_v51  ;;  %v2478_v51 = vld [vmem:[#allocation8 + $0x98] sm:$0xff] }
 0x68c   : > { %1540 = vmatpush.bf16.msra.mxu3 %v2176_v62 }
 0x68d   : > { %v1286_v44 = vpop.f32.mrf.mxu1 }
 0x68e   : > { %v2440_v44 = vld [vmem:[#allocation6 + $0x6c] sm:$0xf]  ;;  %1553 = vmatpush.bf16.msrb.mxu0 %v2180_v63  ;;  %v2548_v63 = vld [vmem:[%s3068_s8] ss:$0 sm:$0xff] }
 0x68f   : > { %v2200_v54 = vor.u32 %v2440_v44, %v2197_v53  ;;  %v2486_v44 = vld [vmem:[#allocation8 + $0xd8] sm:$0xff] }
 0x690   : > { %1541 = vmatpush.bf16.msra.mxu3 %v2160_v11  ;;  %v2462_v53 = vld [vmem:[#allocation8 + $0x18] sm:$0xff]  ;;  %v2459_v11 = vld [vmem:[#allocation8] sm:$0xff] }
 0x691   : > { %1565 = vmatpush.bf16.msra.mxu1 %v2200_v54  ;;  %v2470_v54 = vld [vmem:[#allocation8 + $0x58] sm:$0xff] }
 0x692   : > { %1554 = vmatpush.bf16.msrb.mxu0 %v2164_v12  ;;  %v2467_v12 = vld [vmem:[#allocation8 + $0x40] sm:$0xff] }
 0x694   : > { %1542 = vmatpush.bf16.msra.mxu3 %v2144_v23  ;;  %v1355_v23 = vperm.slane %v1352_v13, 1 }
 0x696   : > { %1555 = vmatpush.bf16.msrb.mxu0 %v2148_v27 }
 0x698   : > { %1855 = vmatpush.bf16.msrb.mxu3 %v2474_v36 }
 0x69a   : > { %1868 = vmatpush.bf16.msra.mxu0 %v2482_v31 }
 0x69c   : > { %1856 = vmatpush.bf16.msrb.mxu3 %v2473_v41 }
 0x69e   : > { %1869 = vmatpush.bf16.msra.mxu0 %v2481_v37 }
 0x6a2   : > { %1870 = vmatpush.bf16.msra.mxu0 %v2480_v19 }
 0x6a6   : > { %1871 = vmatpush.bf16.msra.mxu0 %v2479_v46 }
 0x6aa   : > { %1872 = vmatpush.bf16.msra.mxu0 %v2478_v51 }
 0x6ae   : > { %1873 = vmatpush.bf16.msra.mxu0 %v2477_v57 }
 0x6fd   : > { %v1292_v0 = vpop.xlane.xlu2 %1291 }
 0x6fe   : > { %v1293_v2 = vmul.f32 %v1292_v0, %v2842_v16  ;;  %v2181_v0 = vld [vmem:[#allocation6 + $0x58] sm:$0xf0] }
 0x700   : > { %v3033_v3 = vsub.f32 %v3028_v52, %v1293_v2  ;;  %v2184_v2 = vor.u32 %v2436_v1, %v2181_v0 }
 0x702   : > { %v1295_v4 = vmul.f32 %v3033_v3, %v3033_v3  ;;  %1566 = vmatpush.bf16.msra.mxu1 %v2184_v2 }
 0x704   : > { %1296 = vadd.xlane.f32.xlu1 %v1295_v4  ;;  %v2155_v4 = vld [vmem:[#allocation6 + $0x20] sm:$0xf] }
 0x705   : > { %v2156_v7 = vor.u32 %v2433_v5, %v2155_v4  ;;  %v2476_v4 = vld [vmem:[#allocation8 + $0x88] sm:$0xff] }
 0x706   : > { %1567 = vmatpush.bf16.msra.mxu1 %v2168_v17  ;;  %v2484_v5 = vld [vmem:[#allocation8 + $0xc8] sm:$0xff]  ;;  %1874 = vmatpush.bf16.msra.mxu0 %v2476_v4 }
 0x707   : > { %1528 = vmatpush.bf16.msrb.mxu2 %v2156_v7  ;;  %v2469_v7 = vld [vmem:[#allocation8 + $0x50] sm:$0xff] }
 0x70a   : > { %1568 = vmatpush.bf16.msra.mxu1 %v2152_v29 }
 0x70b   : > { %1529 = vmatpush.bf16.msrb.mxu2 %v2140_v22  ;;  %v1354_v22 = vperm.slane %v1352_v13, 0 }
 0x70e   : > { %1881 = vmatpush.bf16.msrb.mxu1 %v2490_v32 }
 0x70f   : > { %1842 = vmatpush.bf16.msra.mxu2 %v2466_v34 }
 0x712   : > { %1882 = vmatpush.bf16.msrb.mxu1 %v2489_v38 }
 0x713   : > { %1843 = vmatpush.bf16.msra.mxu2 %v2465_v40 }
 0x716   : > { %1883 = vmatpush.bf16.msrb.mxu1 %v2488_v42 }
 0x717   : > { %1844 = vmatpush.bf16.msra.mxu2 %v2464_v43 }
 0x71a   : > { %1884 = vmatpush.bf16.msrb.mxu1 %v2487_v47 }
 0x71b   : > { %1845 = vmatpush.bf16.msra.mxu2 %v2463_v49 }
 0x71e   : > { %1885 = vmatpush.bf16.msrb.mxu1 %v2486_v44 }
 0x71f   : > { %1846 = vmatpush.bf16.msra.mxu2 %v2462_v53 }
 0x722   : > { %1886 = vmatpush.bf16.msrb.mxu1 %v2485_v58 }
 0x723   : > { %1847 = vmatpush.bf16.msra.mxu2 %v2461_v6 }
 0x726   : > { %1887 = vmatpush.bf16.msrb.mxu1 %v2484_v5 }
 0x727   : > { %1848 = vmatpush.bf16.msra.mxu2 %v2460_v9 }
 0x72a   : > { %1888 = vmatpush.bf16.msrb.mxu1 %v2483_v8 }
 0x72b   : > { %1849 = vmatpush.bf16.msra.mxu2 %v2459_v11 }
 0x777   : > { %v1297_v30 = vpop.xlane.xlu1 %1296 }
 0x778   : > { %v1298_v33 = vmul.f32 %v1297_v30, %v2842_v16  ;;  %v2472_v16 = vld [vmem:[#allocation8 + $0x68] sm:$0xff] }
 0x779   : > { %1857 = vmatpush.bf16.msrb.mxu3 %v2472_v16  ;;  %v2549_v16 = vld [vmem:[%s3072_s12] ss:$0 sm:$0xff] }
 0x77a   : > { %v1299_v39 = vadd.f32 1e-05, %v1298_v33 }
 0x77c   : > { %2586 = vrsqrt.f32 %v1299_v39  ;;  %vm1306_vm15 = vweird.f32 %v1299_v39 }
 0x77d   : > { %1858 = vmatpush.bf16.msrb.mxu3 %v2471_v50 }
 0x781   : > { %1859 = vmatpush.bf16.msrb.mxu3 %v2470_v54 }
 0x782   : > { %v2587_v48 = vpop.eup %2586 }
 0x783   : > { %v1301_v35 = vmul.f32 %v2587_v48, %v1299_v39  ;;  %vm1307_vm14 = vweird.f32 %v2587_v48 }
 0x784   : > { %vm1308_vm0 = vmor %vm1306_vm15, %vm1307_vm14 }
 0x785   : > { %v1302_v45 = vmul.f32 %v2587_v48, %v1301_v35  ;;  %1860 = vmatpush.bf16.msrb.mxu3 %v2469_v7 }
 0x787   : > { %v1303_v55 = vmul.f32 0.5, %v1302_v45 }
 0x789   : > { %v1304_v56 = vsub.f32 1.5, %v1303_v55  ;;  %1861 = vmatpush.bf16.msrb.mxu3 %v2468_v10 }
 0x78b   : > { %v1305_v59 = vmul.f32 %v2587_v48, %v1304_v56 }
 0x78d   : > { %v1309_v61 = vsel %vm1308_vm0, %v2587_v48, %v1305_v59  ;;  %1862 = vmatpush.bf16.msrb.mxu3 %v2467_v12 }
 0x78e   : > { %v1310_v62 = vmul.f32 %v1309_v61, %v3033_v3  ;;  %v2475_v3 = vld [vmem:[#allocation8 + $0x80] sm:$0xff] }
 0x78f   : > { %1875 = vmatpush.bf16.msra.mxu0 %v2475_v3 }
 0x790   : > { %v1314_v1 = vmul.f32 %v2547_v60, %v1310_v62 }
 0x792   : > { %v1318_v0 = vadd.f32 %v2548_v63, %v1314_v1 }
 0x794   : > { %v1319_v2 = vpack.c.bf16 %v1318_v0, %v1318_v0 }
 0x796   : > { %1530 = vmatmul.bf16.vlgmr.msrb.gmra.mxu2 %v1319_v2  ;;  %1543 = vmatmul.bf16.vlgmr.msra.gmra.mxu3 %v1319_v2 }
 0x797   : > { %1556 = vmatmul.bf16.vlgmr.msrb.gmra.mxu0 %v1319_v2  ;;  %1569 = vmatmul.bf16.vlgmr.msra.gmra.mxu1 %v1319_v2 }
 0x814   : > { %v1557_v17 = vpop.f32.mrf.mxu0  ;;  %v1570_v18 = vpop.f32.mrf.mxu1 }
 0x815   : > { %v1558_v20 = vadd.f32 %v1557_v17, %v1356_v14  ;;  %v1571_v21 = vadd.f32 %v1570_v18, %v1357_v15 }
 0x817   : > { %v1576_v24 = vmax.f32 %v1558_v20, 0.0  ;;  %v1577_v25 = vmax.f32 %v1571_v21, 0.0 }
 0x819   : > { %v1580_v26 = vpack.c.bf16 %v1576_v24, %v1576_v24  ;;  %v1581_v27 = vpack.c.bf16 %v1577_v25, %v1577_v25  ;;  %v1531_v28 = vpop.f32.mrf.mxu2  ;;  %v1544_v29 = vpop.f32.mrf.mxu3 }
 0x81a   : > { %v1532_v30 = vadd.f32 %v1531_v28, %v1354_v22  ;;  %v1545_v31 = vadd.f32 %v1544_v29, %v1355_v23 }
 0x81b   : > { %1876 = vmatmul.bf16.vlgmr.msra.gmra.mxu0 %v1580_v26  ;;  %1889 = vmatmul.bf16.vlgmr.msrb.gmra.mxu1 %v1581_v27 }
 0x81c   : > { %v1574_v32 = vmax.f32 %v1532_v30, 0.0  ;;  %v1575_v33 = vmax.f32 %v1545_v31, 0.0  ;;  %v1559_v34 = vpop.f32.mrf.mxu0  ;;  %v1572_v36 = vpop.f32.mrf.mxu1 }
 0x81e   : > { %v1578_v37 = vpack.c.bf16 %v1574_v32, %v1574_v32  ;;  %v1579_v38 = vpack.c.bf16 %v1575_v33, %v1575_v33 }
 0x820   : > { %1850 = vmatmul.bf16.vlgmr.msra.gmra.mxu2 %v1578_v37  ;;  %1863 = vmatmul.bf16.vlgmr.msrb.gmra.mxu3 %v1579_v38 }
 0x821   : > { %v1533_v39 = vpop.f32.mrf.mxu2  ;;  %v1546_v40 = vpop.f32.mrf.mxu3 }
 0x898   : > { %v1877_v41 = vpop.f32.mrf.mxu0  ;;  %v1890_v19 = vpop.f32.mrf.mxu1 }
 0x8a0   : > { %v1879_v42 = vpop.f32.mrf.mxu0  ;;  %v1892_v43 = vpop.f32.mrf.mxu1 }
 0x8a3   : > { %v1851_v46 = vpop.f32.mrf.mxu2  ;;  %v1864_v47 = vpop.f32.mrf.mxu3 }
 0x8a4   : > { %v1852_v48 = vadd.f32 %v2549_v16, %v1851_v46 }
 0x8a6   : > { %v1865_v49 = vadd.f32 %v1864_v47, %v1852_v48 }
 0x8a8   : > { %v1878_v50 = vadd.f32 %v1877_v41, %v1865_v49 }
 0x8aa   : > { %v1891_v35 = vadd.f32 %v1890_v19, %v1878_v50 }
 0x8ab   : > { %v1853_v45 = vpop.f32.mrf.mxu2  ;;  %v1866_v51 = vpop.f32.mrf.mxu3 }
 0x8ac   : > { %v1894_v44 = vadd.f32 %v1891_v35, %v3028_v52 }
 0x8ae   : > { %1895 = vst [vmem:[%s460_s20] sm:$0xff] %v1894_v44 }
 0x8af PF: > { %s26_s24 = sadd.s32 1, %s2692_s24  }
 0x8b0   : > { %p23_p7 = scmp.ge.s32.totalorder %s26_s24, 4  }
 0x8b2   :  { %25 = sbr.rel (!%p23_p7) target bundleno = 5 (0x5), region = 111 }
 0x8b7   :  { %1915 = vsyncpa [#allocation5], 1 }
 0x8b8   :  { %1917 = vsyncpa [#allocation5 + $0x1], 1 }
 0x8b9   :  { %1918 = vsyncpa [#allocation7], 1 }

// kernel: decoder_forward.7
= control target key start
LH: loop header
LB: loop body
LE: loop exit
PB: predicated region body
PF: predicated region fallthrough
CT: control target
= control target key end

     0   :  { %s3119_s0 = inlined_call_operand.<no memory space> [shape: s32[1], index: 0, kind: input, shape index: {}]   ;;  %s3120_s1 = inlined_call_operand.vmem [shape: f32[2,8,128], index: 1, kind: input, shape index: {}]   ;;  %s3121_s2 = inlined_call_operand.vmem [shape: f32[1,128], index: 2, kind: input, shape index: {}]   ;;  %s3122_s3 = inlined_call_operand.vmem [shape: f32[1,128], index: 3, kind: input, shape index: {}]   ;;  %s3123_s4 = inlined_call_operand.hbm [shape: bf16[128,384], index: 4, kind: input, shape index: {}]   ;;  %s3124_s5 = inlined_call_operand.hbm [shape: bf16[128,128], index: 5, kind: input, shape index: {}]   ;;  %s3125_s6 = inlined_call_operand.vmem [shape: f32[1,128], index: 6, kind: input, shape index: {}]   ;;  %s3126_s7 = inlined_call_operand.vmem [shape: f32[1,128], index: 7, kind: input, shape index: {}]   ;;  %s3127_s8 = inlined_call_operand.vmem [shape: f32[1,128], index: 8, kind: input, shape index: {}]   ;;  %s3128_s9 = inlined_call_operand.hbm [shape: bf16[128,512], index: 9, kind: input, shape index: {}]   ;;  %s3129_s10 = inlined_call_operand.vmem [shape: f32[1,512], index: 10, kind: input, shape index: {}]   ;;  %s3130_s11 = inlined_call_operand.hbm [shape: bf16[512,128], index: 11, kind: input, shape index: {}]   ;;  %s3131_s12 = inlined_call_operand.vmem [shape: f32[1,128], index: 12, kind: input, shape index: {}]   ;;  %s3132_s13 = inlined_call_operand.vmem [shape: f32[2,8,128], index: 13, kind: output, shape index: {}]  }
   0x1   :  { %3134 = sst [smem:[#allocation15_spill]] %s3123_s4 }
   0x2   :  { %3135 = sst [smem:[#allocation16_spill]] %s3124_s5 }
   0x3   :  { %19 = vsyncpa [#allocation5], 0 }
   0x4   :  { %20 = vsyncpa [#allocation7], 0 }
   0x5   :  { %21 = vsyncpa [#allocation10], 0  ;;  %s2855_s24 = smov 0  }
   0x6 LB: > { %3136 = sst [smem:[#allocation14_spill]] %s2765_s24  ;;  %s2864_s28 = sadd.s32 4294967295, %s2765_s24   ;;  %s2765_s24 = sphi %s2855_s24, %s27_s24  }
   0x7   : > { %s3137_s5 = sld [smem:[#allocation16_spill]]  ;;  %p2009_p0 = scmp.ge.s32.totalorder %s2765_s24, 1 }
   0x8   : > { %p315_p1 = scmp.lt.s32.totalorder %s2765_s24, 3  ;;  %p2549_p2 = scmp.eq.s32.totalorder %s2864_s28, 0 }
   0x9   : > { %s2767_s29 = smov [#allocation6]   ;;  %s3139_s4 = sld [smem:[#allocation15_spill]] }
   0xa   : > { %p2869_p3 = pnand %p2009_p0, %p315_p1  ;;  %s348_s30 = sshll.u32 %s2767_s29, 4  ;;  %s349_s30 = int_to_ptr.vmem [resolvable:$true] %s348_s30 }
   0xb   : > { %s2768_s18 = smov [#allocation4]   ;;  %s2769_s20 = smov 64  }
   0xc   : > { %p2536_p4 = pneg %p2869_p3  ;;  %s334_s19 = sshll.u32 %s2768_s18, 4  ;;  %s335_s19 = int_to_ptr.vmem [resolvable:$true] %s334_s19 }
   0xd   : > { %s346_s27 = sshll.u32 %s3137_s5, 4  ;;  %s2770_s21 = smov 4   ;;  %s347_s27 = int_to_ptr.hbm [resolvable:$true] %s346_s27 }
   0xe   : > { %p2880_p5 = pnand %p2549_p2, %p2536_p4  ;;  %s369_s25 = sshll.u32 %s3128_s9, 4  ;;  %s370_s25 = int_to_ptr.hbm [resolvable:$true] %s369_s25 }
   0xf   : > { %s332_s16 = sshll.u32 %s3139_s4, 4  ;;  %s2771_s26 = smov 192   ;;  %s333_s16 = int_to_ptr.hbm [resolvable:$true] %s332_s16 }
  0x10   : > { %2542 = dma.hbm_to_vmem [thread:$0]  (!%p2880_p5), %s347_s27, 1024, %s349_s30, [#allocation7], %s2769_s20, %s2769_s20, %s2770_s21  }
  0x11   : > { %s2772_s29 = smov 12   ;;  %s2773_s14 = smov [#allocation8]  }
  0x12   : > { %2539 = dma.hbm_to_vmem [thread:$0]  (!%p2880_p5), %s333_s16, 3072, %s335_s19, [#allocation5], %s2771_s26, %s2771_s26, %s2772_s29  }
  0x13   : > { %s371_s15 = sshll.u32 %s2773_s14, 4  ;;  %s2774_s4 = smov 256   ;;  %s372_s15 = int_to_ptr.vmem [resolvable:$true] %s371_s15 }
  0x14   : > { %s2775_s18 = smov 16   ;;  %s386_s27 = sshll.u32 %s3130_s11, 4  ;;  %s387_s27 = int_to_ptr.hbm [resolvable:$true] %s386_s27 }
  0x15   : > { %2545 = dma.hbm_to_vmem [thread:$0]  (!%p2880_p5), %s370_s25, 4096, %s372_s15, [#allocation7], %s2774_s4, %s2774_s4, %s2775_s18  }
  0x16   : > { %s2776_s30 = smov [#allocation9]   ;;  %414 = sbr.rel (%p2869_p3) target bundleno = 2227 (0x8b3), region = 68 }
  0x17   : > { %s388_s22 = sshll.u32 %s2776_s30, 4  ;;  %s389_s22 = int_to_ptr.vmem [resolvable:$true] %s388_s22 }
  0x18   : > { %2548 = dma.hbm_to_vmem [thread:$0]  (!%p2880_p5), %s387_s27, 4096, %s389_s22, [#allocation10], %s2769_s20, %s2769_s20, %s2770_s21  }
  0x1b   : > { %2752 = dma.done.wait (%p2549_p2), [#allocation5], 3072  }
  0x1c   : > { %2754 = vsyncadd (%p2549_p2), [#allocation5], 4294964224 }
  0x1d   : > { %2756 = dma.done.wait (%p2549_p2), [#allocation7], 5120  }
  0x1e   : > { %2758 = vsyncadd (%p2549_p2), [#allocation7], 4294962176 }
  0x1f   : > { %2760 = dma.done.wait (%p2549_p2), [#allocation10], 4096  }
  0x20   : > { %2762 = vsyncadd (%p2549_p2), [#allocation10], 4294963200  ;;  %p470_p6 = scmp.lt.s32.totalorder %s2864_s28, 1  ;;  %v2777_v1 = vmov 128.0   ;;  %v2108_v2 = vld [vmem:[#allocation4 + $0xa8] sm:$0xf] }
  0x21   : > { %2589 = vrcp.f32 %v2777_v1  ;;  %v2446_v3 = vld [vmem:[#allocation4 + $0xb0] sm:$0xf0]  ;;  %v2445_v4 = vld [vmem:[#allocation4 + $0xac] sm:$0xf]  ;;  %v2110_v6 = vld [vmem:[#allocation4 + $0xb4] sm:$0xf0] }
  0x22   : > { %s3145_s28 = smov (!%p470_p6, %s2864_s28), 1  ;;  %v2109_v5 = vor.u32 %v2446_v3, %v2108_v2  ;;  %v2116_v7 = vld [vmem:[#allocation4 + $0xb0] sm:$0xf]  ;;  %v2447_v8 = vld [vmem:[#allocation4 + $0xb8] sm:$0xf0]  ;;  %v2113_v9 = vor.u32 %v2445_v4, %v2110_v6  ;;  %vm726_vm4 = vcmask 130048  }
  0x23   : > { %s2020_s4 = sshll.u32 %s3145_s28, 3  ;;  %v2117_v10 = vor.u32 %v2447_v8, %v2116_v7  ;;  %v2096_v21 = vld [vmem:[#allocation4 + $0x90] sm:$0xf]  ;;  %v2443_v22 = vld [vmem:[#allocation4 + $0x98] sm:$0xf0]  ;;  %s2778_s21 = smov 96  }
  0x24   : > { %s473_s0 = scalar_lea.vmem %s3120_s1, %s2020_s4  ;;  %678 = vmatpush.bf16.msra.mxu0 %v2109_v5  ;;  %691 = vmatpush.bf16.msra.mxu1 %v2113_v9  ;;  %v2442_v23 = vld [vmem:[#allocation4 + $0x94] sm:$0xf]  ;;  %v2097_v24 = vor.u32 %v2443_v22, %v2096_v21  ;;  %v2098_v25 = vld [vmem:[#allocation4 + $0x9c] sm:$0xf0]  ;;  %v2104_v26 = vld [vmem:[#allocation4 + $0x98] sm:$0xf] }
  0x25   : > { %v2922_v0 = vld [vmem:[%s473_s0] sm:$0xff]  ;;  %704 = vmatpush.bf16.msra.mxu2 %v2117_v10  ;;  %v2101_v28 = vor.u32 %v2442_v23, %v2098_v25  ;;  %v2084_v30 = vld [vmem:[#allocation4 + $0x78] sm:$0xf]  ;;  %v2439_v32 = vld [vmem:[#allocation4 + $0x7c] sm:$0xf]  ;;  %s2779_s23 = smov 112  }
  0x26   : > { %482 = vadd.xlane.f32.xlu0 %v2922_v0  ;;  %v2444_v27 = vld [vmem:[#allocation4 + $0xa0] sm:$0xf0]  ;;  %v2086_v34 = vld [vmem:[#allocation4 + $0x84] sm:$0xf0]  ;;  %v2092_v35 = vld [vmem:[#allocation4 + $0x80] sm:$0xf] }
  0x27   : > { %v2590_v11 = vpop.eup %2589  ;;  %v2105_v29 = vor.u32 %v2444_v27, %v2104_v26  ;;  %v2440_v31 = vld [vmem:[#allocation4 + $0x80] sm:$0xf0]  ;;  %v2441_v36 = vld [vmem:[#allocation4 + $0x88] sm:$0xf0]  ;;  %v2089_v37 = vor.u32 %v2439_v32, %v2086_v34  ;;  %v2072_v39 = vld [vmem:[#allocation4 + $0x60] sm:$0xf] }
  0x28   : > { %v485_v12 = vmul.f32 128.0, %v2590_v11  ;;  %vm489_vm0 = vweird.f32 %v2590_v11  ;;  %679 = vmatpush.bf16.msra.mxu0 %v2097_v24  ;;  %692 = vmatpush.bf16.msra.mxu1 %v2101_v28  ;;  %v2085_v33 = vor.u32 %v2440_v31, %v2084_v30  ;;  %v2093_v38 = vor.u32 %v2441_v36, %v2092_v35  ;;  %v2437_v40 = vld [vmem:[#allocation4 + $0x68] sm:$0xf0]  ;;  %v2436_v41 = vld [vmem:[#allocation4 + $0x64] sm:$0xf]  ;;  %s2780_s25 = smov 48  }
  0x29   : > { %705 = vmatpush.bf16.msra.mxu2 %v2105_v29  ;;  %v2073_v42 = vor.u32 %v2437_v40, %v2072_v39  ;;  %v2074_v43 = vld [vmem:[#allocation4 + $0x6c] sm:$0xf0]  ;;  %v2080_v44 = vld [vmem:[#allocation4 + $0x68] sm:$0xf]  ;;  %v2438_v45 = vld [vmem:[#allocation4 + $0x70] sm:$0xf0] }
  0x2a   : > { %v486_v13 = vsub.f32 1.0, %v485_v12  ;;  %v2077_v46 = vor.u32 %v2436_v41, %v2074_v43  ;;  %v2081_v47 = vor.u32 %v2438_v45, %v2080_v44  ;;  %v2060_v48 = vld [vmem:[#allocation4 + $0x48] sm:$0xf]  ;;  %v2434_v49 = vld [vmem:[#allocation4 + $0x50] sm:$0xf0]  ;;  %vm763_vm5 = vcmask 1043456  }
  0x2b   : > { %v2433_v50 = vld [vmem:[#allocation4 + $0x4c] sm:$0xf]  ;;  %v2061_v51 = vor.u32 %v2434_v49, %v2060_v48  ;;  %v2062_v52 = vld [vmem:[#allocation4 + $0x54] sm:$0xf0]  ;;  %v2068_v53 = vld [vmem:[#allocation4 + $0x50] sm:$0xf] }
  0x2c   : > { %v487_v14 = vmul.f32 %v2590_v11, %v486_v13  ;;  %680 = vmatpush.bf16.msra.mxu0 %v2085_v33  ;;  %693 = vmatpush.bf16.msra.mxu1 %v2089_v37  ;;  %v2435_v54 = vld [vmem:[#allocation4 + $0x58] sm:$0xf0]  ;;  %v2065_v55 = vor.u32 %v2433_v50, %v2062_v52  ;;  %v2048_v57 = vld [vmem:[#allocation4 + $0x30] sm:$0xf]  ;;  %v2430_v59 = vld [vmem:[#allocation4 + $0x34] sm:$0xf] }
  0x2d   : > { %706 = vmatpush.bf16.msra.mxu2 %v2093_v38  ;;  %v2069_v56 = vor.u32 %v2435_v54, %v2068_v53  ;;  %v2431_v58 = vld [vmem:[#allocation4 + $0x38] sm:$0xf0]  ;;  %v2050_v61 = vld [vmem:[#allocation4 + $0x3c] sm:$0xf0]  ;;  %v2056_v62 = vld [vmem:[#allocation4 + $0x38] sm:$0xf] }
  0x2e   : > { %v488_v15 = vadd.f32 %v2590_v11, %v487_v14  ;;  %v2049_v60 = vor.u32 %v2431_v58, %v2048_v57  ;;  %v2432_v63 = vld [vmem:[#allocation4 + $0x40] sm:$0xf0]  ;;  %v2053_v1 = vor.u32 %v2430_v59, %v2050_v61  ;;  %v2036_v3 = vld [vmem:[#allocation4 + $0x18] sm:$0xf]  ;;  %v2427_v5 = vld [vmem:[#allocation4 + $0x1c] sm:$0xf]  ;;  %v718_v61 = vlaneseq }
  0x2f   : > { %v2057_v2 = vor.u32 %v2432_v63, %v2056_v62  ;;  %v2428_v4 = vld [vmem:[#allocation4 + $0x20] sm:$0xf0]  ;;  %v2038_v7 = vld [vmem:[#allocation4 + $0x24] sm:$0xf0]  ;;  %v2044_v8 = vld [vmem:[#allocation4 + $0x20] sm:$0xf] }
  0x30   : > { %v2925_v16 = vsel %vm489_vm0, %v2590_v11, %v488_v15  ;;  %681 = vmatpush.bf16.msra.mxu0 %v2073_v42  ;;  %694 = vmatpush.bf16.msra.mxu1 %v2077_v46  ;;  %v2037_v6 = vor.u32 %v2428_v4, %v2036_v3  ;;  %v2429_v9 = vld [vmem:[#allocation4 + $0x28] sm:$0xf0]  ;;  %v2041_v10 = vor.u32 %v2427_v5, %v2038_v7  ;;  %v2024_v12 = vld [vmem:[#allocation4] sm:$0xf]  ;;  %v2424_v14 = vld [vmem:[#allocation4 + $0x4] sm:$0xf] }
  0x31   : > { %707 = vmatpush.bf16.msra.mxu2 %v2081_v47  ;;  %v2045_v11 = vor.u32 %v2429_v9, %v2044_v8  ;;  %v2425_v13 = vld [vmem:[#allocation4 + $0x8] sm:$0xf0]  ;;  %v2583_v32 = vld [vmem:[%s3121_s2] ss:$0 sm:$0xff]  ;;  %s2781_s26 = smov 32   ;;  %s2782_s29 = smov 16  }
  0x32   : > { %v2025_v15 = vor.u32 %v2425_v13, %v2024_v12  ;;  %v2584_v35 = vld [vmem:[%s3122_s3] ss:$0 sm:$0xff]  ;;  %s2783_s14 = smov 80   ;;  %s2784_s15 = smov 64   ;;  %vm747_vm7 = vcmask 64512   ;;  %vm1211_vm8 = vcmask 261120  }
  0x33   : > { %vm1213_vm9 = vcmask 392192   ;;  %vm1215_vm10 = vcmask 523264   ;;  %vm1217_vm11 = vcmask 654336   ;;  %vm1219_vm12 = vcmask 785408  }
  0x34   : > { %682 = vmatpush.bf16.msra.mxu0 %v2061_v51  ;;  %695 = vmatpush.bf16.msra.mxu1 %v2065_v55  ;;  %vm1221_vm13 = vcmask 916480  }
  0x35   : > { %708 = vmatpush.bf16.msra.mxu2 %v2069_v56 }
  0x38   : > { %683 = vmatpush.bf16.msra.mxu0 %v2049_v60  ;;  %696 = vmatpush.bf16.msra.mxu1 %v2053_v1  ;;  %v719_v1 = vshrl.u32 %v718_v61, 7 }
  0x39   : > { %709 = vmatpush.bf16.msra.mxu2 %v2057_v2  ;;  %v721_v2 = vand.u32 127, %v718_v61 }
  0x3b   : > { %vm2981_vm6 = vcmp.le.s32.totalorder %v721_v2, %v719_v1 }
  0x3c   : > { %684 = vmatpush.bf16.msra.mxu0 %v2037_v6  ;;  %697 = vmatpush.bf16.msra.mxu1 %v2041_v10 }
  0x3d   : > { %710 = vmatpush.bf16.msra.mxu2 %v2045_v11 }
  0x40   : > { %685 = vmatpush.bf16.msra.mxu0 %v2025_v15 }
  0x99   : > { %v483_v17 = vpop.xlane.xlu0 %482 }
  0x9a   : > { %v491_v18 = vmul.f32 %v2925_v16, %v483_v17  ;;  %v2026_v17 = vld [vmem:[#allocation4 + $0xc] sm:$0xf0] }
  0x9b   : > { %v2029_v21 = vor.u32 %v2424_v14, %v2026_v17 }
  0x9c   : > { %v2929_v19 = vsub.f32 %v2922_v0, %v491_v18  ;;  %v2032_v18 = vld [vmem:[#allocation4 + $0x8] sm:$0xf] }
  0x9d   : > { %698 = vmatpush.bf16.msra.mxu1 %v2029_v21 }
  0x9e   : > { %v493_v20 = vmul.f32 %v2929_v19, %v2929_v19 }
  0xa0   : > { %494 = vadd.xlane.f32.xlu0 %v493_v20  ;;  %v2426_v20 = vld [vmem:[#allocation4 + $0x10] sm:$0xf0] }
  0xa1   : > { %v2033_v22 = vor.u32 %v2426_v20, %v2032_v18 }
  0xa3   : > { %711 = vmatpush.bf16.msra.mxu2 %v2033_v22 }
 0x113   : > { %v495_v23 = vpop.xlane.xlu0 %494 }
 0x114   : > { %v496_v24 = vmul.f32 %v495_v23, %v2925_v16 }
 0x116   : > { %v497_v25 = vadd.f32 1e-05, %v496_v24 }
 0x118   : > { %2591 = vrsqrt.f32 %v497_v25  ;;  %vm504_vm2 = vweird.f32 %v497_v25 }
 0x11e   : > { %v2592_v26 = vpop.eup %2591 }
 0x11f   : > { %v499_v27 = vmul.f32 %v2592_v26, %v497_v25  ;;  %vm505_vm1 = vweird.f32 %v2592_v26 }
 0x120   : > { %vm506_vm3 = vmor %vm504_vm2, %vm505_vm1 }
 0x121   : > { %v500_v28 = vmul.f32 %v2592_v26, %v499_v27 }
 0x123   : > { %v501_v29 = vmul.f32 0.5, %v500_v28 }
 0x125   : > { %v502_v30 = vsub.f32 1.5, %v501_v29 }
 0x127   : > { %v503_v31 = vmul.f32 %v2592_v26, %v502_v30 }
 0x129   : > { %v507_v33 = vsel %vm506_vm3, %v2592_v26, %v503_v31 }
 0x12a   : > { %v508_v34 = vmul.f32 %v507_v33, %v2929_v19 }
 0x12c   : > { %v512_v36 = vmul.f32 %v2583_v32, %v508_v34 }
 0x12e   : > { %v516_v37 = vadd.f32 %v2584_v35, %v512_v36 }
 0x130   : > { %v517_v38 = vpack.c.bf16 %v516_v37, %v516_v37 }
 0x132   : > { %686 = vmatmul.bf16.vlgmr.msra.gmra.mxu0 %v517_v38  ;;  %699 = vmatmul.bf16.vlgmr.msra.gmra.mxu1 %v517_v38 }
 0x133   : > { %712 = vmatmul.bf16.vlgmr.msra.gmra.mxu2 %v517_v38 }
 0x1af   : > { %v687_v39 = vpop.f32.mrf.mxu0  ;;  %v700_v40 = vpop.f32.mrf.mxu1 }
 0x1b0   : > { %v2941_v41 = vpack.c.bf16 %v700_v40, %v700_v40  ;;  %v717_v42 = vmul.f32 0.25, %v687_v39 }
 0x1b2   : > { %842 = vrot.lane.b32.xlu0 %v2941_v41, %s2778_s21  ;;  %784 = vrot.lane.b32.xlu2 %v2941_v41, %s2779_s23  ;;  %v731_v19 = vsel %vm726_vm4, %v2941_v41, 0  ;;  %v2951_v47 = vpack.c.bf16 %v717_v42, %v717_v42 }
 0x1b3   : > { %740 = vmatpush.bf16.xpose.msra.mxu3 %v731_v19 }
 0x1b6   : > { %v713_v43 = vpop.f32.mrf.mxu2 }
 0x1b7   : > { %v2949_v44 = vpack.c.bf16 %v713_v43, %v713_v43  ;;  %v689_v45 = vpop.f32.mrf.mxu0  ;;  %v702_v46 = vpop.f32.mrf.mxu1 }
 0x1b9   : > { %v765_v48 = vsel %vm763_vm5, %v2949_v44, 0 }
 0x1ba   : > { %1013 = vrot.lane.b32.xlu0 %v2941_v41, %s2780_s25  ;;  %781 = vrot.lane.b32.xlu2 %v2951_v47, %s2779_s23 }
 0x1bb   : > { %774 = vmatpush.bf16.msrb.mxu3 %v765_v48 }
 0x1bc   : > { %2118 = vmatmul.msk.bf16.vlgmr.msra.gmra.mxu3 %vm726_vm4, %v2951_v47 }
 0x1be   : > { %v715_v49 = vpop.f32.mrf.mxu2 }
 0x1c2   : > { %1070 = vrot.lane.b32.xlu0 %v2941_v41, %s2781_s26  ;;  %840 = vrot.lane.b32.xlu2 %v2951_v47, %s2778_s21 }
 0x1ca   : > { %1125 = vrot.lane.b32.xlu0 %v2951_v47, %s2782_s29  ;;  %897 = vrot.lane.b32.xlu2 %v2951_v47, %s2783_s14 }
 0x1d2   : > { %956 = vrot.lane.b32.xlu2 %v2941_v41, %s2784_s15 }
 0x1da   : > { %954 = vrot.lane.b32.xlu2 %v2951_v47, %s2784_s15 }
 0x1e2   : > { %1127 = vrot.lane.b32.xlu2 %v2941_v41, %s2782_s29 }
 0x20c   : > { %v785_v50 = vpop.permute.xlu2 %784 }
 0x20d   : > { %v790_v51 = vsel %vm726_vm4, %v785_v50, 0 }
 0x20e   : > { %799 = vmatpush.bf16.xpose.msra.mxu3 %v790_v51 }
 0x214   : > { %v782_v52 = vpop.permute.xlu2 %781 }
 0x21c   : > { %v841_v53 = vpop.permute.xlu2 %840 }
 0x224   : > { %v843_v54 = vpop.permute.xlu0 %842  ;;  %v898_v55 = vpop.permute.xlu2 %897 }
 0x225   : > { %v848_v56 = vsel %vm726_vm4, %v843_v54, 0 }
 0x226   : > { %857 = vmatpush.bf16.xpose.msrb.mxu2 %v848_v56 }
 0x22c   : > { %v1014_v57 = vpop.permute.xlu0 %1013  ;;  %v957_v58 = vpop.permute.xlu2 %956 }
 0x22d   : > { %2122 = vmatmul.msk.bf16.vlgmr.msrb.gmra.mxu2 %vm726_vm4, %v841_v53  ;;  %v962_v59 = vsel %vm726_vm4, %v957_v58, 0  ;;  %v1019_v29 = vsel %vm726_vm4, %v1014_v57, 0 }
 0x22e   : > { %971 = vmatpush.bf16.xpose.msrb.mxu1 %v962_v59 }
 0x234   : > { %v1071_v60 = vpop.permute.xlu0 %1070  ;;  %v955_v63 = vpop.permute.xlu2 %954 }
 0x235   : > { %v1076_v62 = vsel %vm726_vm4, %v1071_v60, 0  ;;  %2126 = vmatmul.msk.bf16.vlgmr.msrb.gmra.mxu1 %vm726_vm4, %v955_v63 }
 0x236   : > { %1085 = vmatpush.bf16.xpose.msra.mxu1 %v1076_v62 }
 0x23c   : > { %v1128_v32 = vpop.permute.xlu2 %1127  ;;  %v1126_v34 = vpop.permute.xlu0 %1125 }
 0x23d   : > { %v1133_v33 = vsel %vm726_vm4, %v1128_v32, 0 }
 0x23f   : > { %v742_v4 = vpop.f32.mrf.mxu3 }
 0x240   : > { %v746_v5 = vsel %vm2981_vm6, %v742_v4, -inf }
 0x241   : > { %v748_v6 = vsel %vm747_vm7, %v746_v5, -inf }
 0x242   : > { %749 = vmax.xlane.f32.xlu1 %v748_v6 }
 0x247   : > { %v744_v7 = vpop.f32.mrf.mxu3 }
 0x2b0   : > { %v859_v8 = vpop.f32.mrf.mxu2 }
 0x2b1   : > { %v863_v21 = vsel %vm2981_vm6, %v859_v8, -inf }
 0x2b2   : > { %v973_v9 = vpop.f32.mrf.mxu1  ;;  %v864_v22 = vsel %vm747_vm7, %v863_v21, -inf }
 0x2b3   : > { %v2990_v10 = vsel %vm2981_vm6, %v973_v9, -inf }
 0x2b4   : > { %v978_v13 = vsel %vm747_vm7, %v2990_v10, -inf }
 0x2b5   : > { %v750_v11 = vpop.xlane.xlu1 %749  ;;  %979 = vmax.xlane.f32.xlu2 %v978_v13 }
 0x2b6   : > { %v751_v12 = vsub.f32 %v746_v5, %v750_v11 }
 0x2b8   : > { %v752_v14 = vmul.f32 1.442695, %v751_v12  ;;  %v861_v15 = vpop.f32.mrf.mxu2 }
 0x2ba   : > { %2593 = vpow2.f32 %v752_v14  ;;  %v975_v17 = vpop.f32.mrf.mxu1 }
 0x2c0   : > { %v2594_v18 = vpop.eup %2593 }
 0x2c1   : > { %v754_v20 = vsel %vm747_vm7, %v2594_v18, 0.0 }
 0x2c2   : > { %755 = vadd.xlane.f32.xlu1 %v754_v20 }
 0x2db   : > { %899 = vrot.lane.b32.xlu1 %v2941_v41, %s2783_s14 }
 0x2e3   : > { %1011 = vrot.lane.b32.xlu1 %v2951_v47, %s2780_s25 }
 0x2eb   : > { %1068 = vrot.lane.b32.xlu1 %v2951_v47, %s2781_s26 }
 0x315   : > { %865 = vmax.xlane.f32.xlu1 %v864_v22 }
 0x328   : > { %v980_v62 = vpop.xlane.xlu2 %979 }
 0x329   : > { %v981_v63 = vsub.f32 %v2990_v10, %v980_v62 }
 0x32b   : > { %v982_v1 = vmul.f32 1.442695, %v981_v63 }
 0x335   : > { %v756_v23 = vpop.xlane.xlu1 %755 }
 0x336   : > { %2595 = vrcp.f32 %v756_v23 }
 0x33c   : > { %v2596_v24 = vpop.eup %2595 }
 0x33d   : > { %v758_v25 = vmul.f32 %v2596_v24, %v2594_v18 }
 0x33f   : > { %v759_v26 = vpack.c.bf16 %v758_v25, %v758_v25 }
 0x341   : > { %2119 = vmatmul.msk.bf16.vlgmr.msrb.gmra.mxu3 %vm747_vm7, %v759_v26 }
 0x34d   : > { %v900_v27 = vpop.permute.xlu1 %899 }
 0x34e   : > { %v905_v28 = vsel %vm726_vm4, %v900_v27, 0 }
 0x34f   : > { %914 = vmatpush.bf16.xpose.msrb.mxu3 %v905_v28 }
 0x351   : > { %2120 = vmatmul.msk.bf16.vlgmr.msra.gmra.mxu3 %vm726_vm4, %v782_v52 }
 0x355   : > { %v1012_v30 = vpop.permute.xlu1 %1011 }
 0x357   : > { %1028 = vmatpush.bf16.xpose.msra.mxu3 %v1019_v29 }
 0x35d   : > { %v1069_v31 = vpop.permute.xlu1 %1068 }
 0x35e   : > { %2130 = vmatmul.msk.bf16.vlgmr.msra.gmra.mxu1 %vm726_vm4, %v1069_v31 }
 0x361   : > { %2124 = vmatmul.msk.bf16.vlgmr.msrb.gmra.mxu3 %vm726_vm4, %v898_v55 }
 0x362   : > { %1142 = vmatpush.bf16.xpose.msrb.mxu3 %v1133_v33 }
 0x371   : > { %2128 = vmatmul.msk.bf16.vlgmr.msra.gmra.mxu3 %vm726_vm4, %v1012_v30 }
 0x381   : > { %2132 = vmatmul.msk.bf16.vlgmr.msrb.gmra.mxu3 %vm726_vm4, %v1126_v34 }
 0x388   : > { %v866_v36 = vpop.xlane.xlu1 %865 }
 0x389   : > { %v867_v38 = vsub.f32 %v863_v21, %v866_v36 }
 0x38b   : > { %v868_v39 = vmul.f32 1.442695, %v867_v38 }
 0x38d   : > { %2597 = vpow2.f32 %v868_v39 }
 0x38e   : > { %2599 = vpow2.f32 %v982_v1 }
 0x393   : > { %v3018_v42 = vpop.eup %2597 }
 0x394   : > { %v870_v48 = vsel %vm747_vm7, %v3018_v42, 0.0  ;;  %v2600_v2 = vpop.eup %2599 }
 0x395   : > { %v984_v3 = vsel %vm747_vm7, %v2600_v2, 0.0 }
 0x3c4   : > { %v3013_v35 = vpop.f32.mrf.mxu3 }
 0x3cc   : > { %v778_v37 = vpop.f32.mrf.mxu3 }
 0x3d4   : > { %v801_v40 = vpop.f32.mrf.mxu3 }
 0x3d5   : > { %v805_v41 = vsel %vm2981_vm6, %v801_v40, -inf }
 0x3d6   : > { %v806_v19 = vsel %vm747_vm7, %v805_v41, -inf }
 0x3d7   : > { %807 = vmax.xlane.f32.xlu2 %v806_v19 }
 0x3db   : > { %v1087_v43 = vpop.f32.mrf.mxu1 }
 0x3dc   : > { %v3022_v45 = vsel %vm2981_vm6, %v1087_v43, -inf  ;;  %v803_v46 = vpop.f32.mrf.mxu3 }
 0x3dd   : > { %v1092_v47 = vsel %vm747_vm7, %v3022_v45, -inf }
 0x3de   : > { %1093 = vmax.xlane.f32.xlu0 %v1092_v47 }
 0x3df   : > { %871 = vadd.xlane.f32.xlu2 %v870_v48 }
 0x3e3   : > { %v1089_v49 = vpop.f32.mrf.mxu1 }
 0x3e4   : > { %v916_v50 = vpop.f32.mrf.mxu3 }
 0x3e5   : > { %v920_v51 = vsel %vm2981_vm6, %v916_v50, -inf }
 0x3e6   : > { %v921_v52 = vsel %vm747_vm7, %v920_v51, -inf }
 0x3e7   : > { %922 = vmax.xlane.f32.xlu0 %v921_v52 }
 0x3ec   : > { %v918_v53 = vpop.f32.mrf.mxu3 }
 0x3f4   : > { %v1030_v54 = vpop.f32.mrf.mxu3 }
 0x3f5   : > { %v1034_v55 = vsel %vm2981_vm6, %v1030_v54, -inf }
 0x3f6   : > { %v1035_v56 = vsel %vm747_vm7, %v1034_v55, -inf }
 0x3f7   : > { %1036 = vmax.xlane.f32.xlu1 %v1035_v56 }
 0x3fb   : > { %819 = vrot.lane.b32.xlu0 %v2949_v44, %s2779_s23 }
 0x3fc   : > { %v1032_v57 = vpop.f32.mrf.mxu3 }
 0x404   : > { %v1144_v58 = vpop.f32.mrf.mxu3 }
 0x405   : > { %v1148_v59 = vsel %vm2981_vm6, %v1144_v58, -inf }
 0x406   : > { %v1149_v60 = vsel %vm747_vm7, %v1148_v59, -inf }
 0x407   : > { %1150 = vmax.xlane.f32.xlu2 %v1149_v60 }
 0x40c   : > { %v1146_v61 = vpop.f32.mrf.mxu3 }
 0x410   : > { %933 = vrot.lane.b32.xlu1 %v2949_v44, %s2783_s14 }
 0x418   : > { %990 = vrot.lane.b32.xlu1 %v2949_v44, %s2784_s15 }
 0x41f   : > { %876 = vrot.lane.b32.xlu2 %v2949_v44, %s2778_s21 }
 0x425   : > { %985 = vadd.xlane.f32.xlu0 %v984_v3 }
 0x44a   : > { %v808_v4 = vpop.xlane.xlu2 %807 }
 0x44b   : > { %v809_v5 = vsub.f32 %v805_v41, %v808_v4 }
 0x44d   : > { %v810_v6 = vmul.f32 1.442695, %v809_v5 }
 0x44f   : > { %2601 = vpow2.f32 %v810_v6 }
 0x451   : > { %v1094_v7 = vpop.xlane.xlu0 %1093 }
 0x452   : > { %v872_v22 = vpop.xlane.xlu2 %871  ;;  %v1095_v40 = vsub.f32 %v3022_v45, %v1094_v7 }
 0x454   : > { %v1096_v19 = vmul.f32 1.442695, %v1095_v40 }
 0x455   : > { %v2602_v8 = vpop.eup %2601 }
 0x456   : > { %v812_v9 = vsel %vm747_vm7, %v2602_v8, 0.0 }
 0x457   : > { %813 = vadd.xlane.f32.xlu1 %v812_v9 }
 0x45a   : > { %v923_v10 = vpop.xlane.xlu0 %922 }
 0x45b   : > { %v924_v11 = vsub.f32 %v920_v51, %v923_v10 }
 0x45d   : > { %v925_v12 = vmul.f32 1.442695, %v924_v11 }
 0x45f   : > { %2603 = vpow2.f32 %v925_v12 }
 0x465   : > { %v2604_v13 = vpop.eup %2603 }
 0x466   : > { %v927_v14 = vsel %vm747_vm7, %v2604_v13, 0.0 }
 0x467   : > { %928 = vadd.xlane.f32.xlu1 %v927_v14 }
 0x46a   : > { %v1037_v15 = vpop.xlane.xlu1 %1036 }
 0x46b   : > { %v1038_v17 = vsub.f32 %v1034_v55, %v1037_v15 }
 0x46d   : > { %v1039_v18 = vmul.f32 1.442695, %v1038_v17  ;;  %v820_v20 = vpop.permute.xlu0 %819 }
 0x46e   : > { %v825_v21 = vsel %vm763_vm5, %v820_v20, 0 }
 0x46f   : > { %2605 = vpow2.f32 %v1039_v18  ;;  %834 = vmatpush.bf16.msrb.mxu0 %v825_v21 }
 0x470   : > { %2607 = vrcp.f32 %v872_v22 }
 0x475   : > { %v2606_v23 = vpop.eup %2605 }
 0x476   : > { %v1041_v24 = vsel %vm747_vm7, %v2606_v23, 0.0  ;;  %v2608_v28 = vpop.eup %2607 }
 0x477   : > { %1042 = vadd.xlane.f32.xlu2 %v1041_v24  ;;  %v874_v29 = vmul.f32 %v2608_v28, %v3018_v42  ;;  %v2453_v28 = vld [vmem:[#allocation6 + $0x28] sm:$0xff] }
 0x479   : > { %v875_v36 = vpack.c.bf16 %v874_v29, %v874_v29  ;;  %v2452_v29 = vld [vmem:[#allocation6 + $0x20] sm:$0xff] }
 0x47a   : > { %v1151_v25 = vpop.xlane.xlu2 %1150 }
 0x47b   : > { %v1152_v26 = vsub.f32 %v1148_v59, %v1151_v25 }
 0x47d   : > { %v1153_v27 = vmul.f32 1.442695, %v1152_v26  ;;  %v2455_v26 = vld [vmem:[#allocation6 + $0x38] sm:$0xff] }
 0x47e   : > { %1292 = vmatpush.bf16.msrb.mxu1 %v2455_v26 }
 0x47f   : > { %2609 = vpow2.f32 %v1153_v27  ;;  %v2454_v27 = vld [vmem:[#allocation6 + $0x30] sm:$0xff] }
 0x480   : > { %1047 = vrot.lane.b32.xlu1 %v2949_v44, %s2780_s25 }
 0x482   : > { %v934_v30 = vpop.permute.xlu1 %933  ;;  %v877_v31 = vpop.permute.xlu2 %876  ;;  %1293 = vmatpush.bf16.msrb.mxu1 %v2454_v27 }
 0x483   : > { %v939_v32 = vsel %vm763_vm5, %v934_v30, 0  ;;  %v882_v33 = vsel %vm763_vm5, %v877_v31, 0  ;;  %v2451_v30 = vld [vmem:[#allocation6 + $0x18] sm:$0xff]  ;;  %v2450_v31 = vld [vmem:[#allocation6 + $0x10] sm:$0xff] }
 0x484   : > { %891 = vmatpush.bf16.msra.mxu2 %v882_v33  ;;  %948 = vmatpush.bf16.msra.mxu0 %v939_v32  ;;  %v2449_v32 = vld [vmem:[#allocation6 + $0x8] sm:$0xff]  ;;  %v2448_v33 = vld [vmem:[#allocation6] sm:$0xff] }
 0x485   : > { %v2610_v34 = vpop.eup %2609 }
 0x486   : > { %v1155_v37 = vsel %vm747_vm7, %v2610_v34, 0.0  ;;  %1294 = vmatpush.bf16.msrb.mxu1 %v2453_v28  ;;  %v2477_v28 = vld [vmem:[#allocation8 + $0xac] sm:$0xf] }
 0x487   : > { %1156 = vadd.xlane.f32.xlu0 %v1155_v37  ;;  %2123 = vmatmul.msk.bf16.vlgmr.msra.gmra.mxu2 %vm747_vm7, %v875_v36 }
 0x48a   : > { %v991_v38 = vpop.permute.xlu1 %990  ;;  %1295 = vmatpush.bf16.msrb.mxu1 %v2452_v29  ;;  %v2258_v29 = vld [vmem:[#allocation8 + $0xb8] sm:$0xf0] }
 0x48b   : > { %v996_v39 = vsel %vm763_vm5, %v991_v38, 0 }
 0x48c   : > { %1005 = vmatpush.bf16.msrb.mxu2 %v996_v39 }
 0x48e   : > { %1296 = vmatpush.bf16.msrb.mxu1 %v2451_v30  ;;  %v2261_v30 = vor.u32 %v2477_v28, %v2258_v29  ;;  %v2178_v28 = vld [vmem:[#allocation8 + $0x18] sm:$0xf0] }
 0x48f   : > { %1161 = vrot.lane.b32.xlu2 %v2949_v44, %s2782_s29 }
 0x492   : > { %1297 = vmatpush.bf16.msrb.mxu1 %v2450_v31  ;;  %v2232_v31 = vld [vmem:[#allocation8 + $0x80] sm:$0xf] }
 0x496   : > { %1298 = vmatpush.bf16.msrb.mxu1 %v2449_v32  ;;  %v2474_v32 = vld [vmem:[#allocation8 + $0x8c] sm:$0xf0] }
 0x498   : > { %v986_v41 = vpop.xlane.xlu0 %985 }
 0x499   : > { %2611 = vrcp.f32 %v986_v41 }
 0x49a   : > { %2613 = vpow2.f32 %v1096_v19  ;;  %1299 = vmatpush.bf16.msrb.mxu1 %v2448_v33  ;;  %v2472_v33 = vld [vmem:[#allocation8 + $0x84] sm:$0xf] }
 0x49b   : > { %1104 = vrot.lane.b32.xlu0 %v2949_v44, %s2781_s26 }
 0x49f   : > { %v2612_v42 = vpop.eup %2611 }
 0x4a0   : > { %v988_v43 = vmul.f32 %v2612_v42, %v2600_v2  ;;  %v2614_v47 = vpop.eup %2613 }
 0x4a1   : > { %v1098_v48 = vsel %vm747_vm7, %v2614_v47, 0.0 }
 0x4a2   : > { %v989_v46 = vpack.c.bf16 %v988_v43, %v988_v43 }
 0x4a4   : > { %2127 = vmatmul.msk.bf16.vlgmr.msrb.gmra.mxu2 %vm747_vm7, %v989_v46 }
 0x4aa   : > { %1099 = vadd.xlane.f32.xlu1 %v1098_v48 }
 0x4ca   : > { %v814_v49 = vpop.xlane.xlu1 %813 }
 0x4cb   : > { %2615 = vrcp.f32 %v814_v49 }
 0x4d1   : > { %v2616_v50 = vpop.eup %2615 }
 0x4d2   : > { %v816_v45 = vmul.f32 %v2616_v50, %v2602_v8 }
 0x4d4   : > { %v817_v51 = vpack.c.bf16 %v816_v45, %v816_v45 }
 0x4d6   : > { %2121 = vmatmul.msk.bf16.vlgmr.msrb.gmra.mxu0 %vm747_vm7, %v817_v51 }
 0x4da   : > { %v929_v52 = vpop.xlane.xlu1 %928 }
 0x4db   : > { %2617 = vrcp.f32 %v929_v52 }
 0x4e1   : > { %v2618_v44 = vpop.eup %2617 }
 0x4e2   : > { %v931_v53 = vmul.f32 %v2618_v44, %v2604_v13 }
 0x4e4   : > { %v932_v54 = vpack.c.bf16 %v931_v53, %v931_v53  ;;  %v2280_v53 = vld [vmem:[#allocation8 + $0xe0] sm:$0xf] }
 0x4e6   : > { %2125 = vmatmul.msk.bf16.vlgmr.msra.gmra.mxu0 %vm747_vm7, %v932_v54  ;;  %v2486_v54 = vld [vmem:[#allocation8 + $0xec] sm:$0xf0] }
 0x4ea   : > { %v1043_v55 = vpop.xlane.xlu2 %1042 }
 0x4eb   : > { %2619 = vrcp.f32 %v1043_v55  ;;  %v2484_v55 = vld [vmem:[#allocation8 + $0xe4] sm:$0xf] }
 0x4f1   : > { %v2620_v56 = vpop.eup %2619 }
 0x4f2   : > { %v1045_v57 = vmul.f32 %v2620_v56, %v2606_v23  ;;  %v1048_v58 = vpop.permute.xlu1 %1047  ;;  %v1162_v59 = vpop.permute.xlu2 %1161  ;;  %v2281_v56 = vor.u32 %v2486_v54, %v2280_v53  ;;  %v2226_v53 = vld [vmem:[#allocation8 + $0x78] sm:$0xf0] }
 0x4f3   : > { %v1053_v60 = vsel %vm763_vm5, %v1048_v58, 0  ;;  %v1167_v61 = vsel %vm763_vm5, %v1162_v59, 0  ;;  %v2288_v58 = vld [vmem:[#allocation8 + $0xe8] sm:$0xf]  ;;  %v2487_v59 = vld [vmem:[#allocation8 + $0xf4] sm:$0xf0] }
 0x4f4   : > { %v1046_v62 = vpack.c.bf16 %v1045_v57, %v1045_v57  ;;  %1062 = vmatpush.bf16.msrb.mxu0 %v1053_v60  ;;  %v2282_v57 = vld [vmem:[#allocation8 + $0xf0] sm:$0xf0] }
 0x4f5   : > { %v2285_v60 = vor.u32 %v2484_v55, %v2282_v57  ;;  %v2200_v55 = vld [vmem:[#allocation8 + $0x40] sm:$0xf]  ;;  %v2464_v57 = vld [vmem:[#allocation8 + $0x44] sm:$0xf] }
 0x4f7   : > { %2129 = vmatmul.msk.bf16.vlgmr.msrb.gmra.mxu0 %vm747_vm7, %v1046_v62  ;;  %v2485_v62 = vld [vmem:[#allocation8 + $0xec] sm:$0xf]  ;;  %1552 = vmatpush.bf16.msra.mxu3 %v2285_v60  ;;  %v2208_v60 = vld [vmem:[#allocation8 + $0x48] sm:$0xf] }
 0x4f8   : > { %1176 = vmatpush.bf16.msra.mxu0 %v1167_v61  ;;  %v2289_v61 = vor.u32 %v2487_v59, %v2288_v58  ;;  %v2202_v59 = vld [vmem:[#allocation8 + $0x50] sm:$0xf0] }
 0x4fa   : > { %v1157_v63 = vpop.xlane.xlu0 %1156 }
 0x4fb   : > { %2621 = vrcp.f32 %v1157_v63  ;;  %v2290_v63 = vld [vmem:[#allocation8 + $0xf8] sm:$0xf0] }
 0x4fc   : > { %1565 = vmatpush.bf16.msrb.mxu0 %v2289_v61  ;;  %v2467_v61 = vld [vmem:[#allocation8 + $0x54] sm:$0xf0] }
 0x501   : > { %v2622_v1 = vpop.eup %2621 }
 0x502   : > { %v1159_v2 = vmul.f32 %v2622_v1, %v2610_v34  ;;  %v2293_v1 = vor.u32 %v2485_v62, %v2290_v63  ;;  %v2205_v62 = vor.u32 %v2464_v57, %v2202_v59  ;;  %v2209_v63 = vor.u32 %v2467_v61, %v2208_v60  ;;  %v2506_v57 = vld [vmem:[#allocation9 + $0x90] sm:$0xff]  ;;  %v2586_v60 = vld [vmem:[%s3126_s7] ss:$0 sm:$0xff] }
 0x504   : > { %v1160_v3 = vpack.c.bf16 %v1159_v2, %v1159_v2  ;;  %1578 = vmatpush.bf16.msra.mxu1 %v2293_v1  ;;  %v2465_v1 = vld [vmem:[#allocation8 + $0x4c] sm:$0xf] }
 0x507   : > { %2133 = vmatmul.msk.bf16.vlgmr.msra.gmra.mxu0 %vm747_vm7, %v1160_v3 }
 0x50a   : > { %v893_v4 = vpop.f32.mrf.mxu2 }
 0x50b   : > { %1187 = vrot.lane.b32.xlu1 %v893_v4, %s2781_s26 }
 0x50d   : > { %v1105_v5 = vpop.permute.xlu0 %1104 }
 0x50e   : > { %v1110_v6 = vsel %vm763_vm5, %v1105_v5, 0  ;;  %v2264_v5 = vld [vmem:[#allocation8 + $0xc0] sm:$0xf] }
 0x50f   : > { %1119 = vmatpush.bf16.msra.mxu2 %v1110_v6  ;;  %v2482_v6 = vld [vmem:[#allocation8 + $0xcc] sm:$0xf0] }
 0x512   : > { %v895_v7 = vpop.f32.mrf.mxu2 }
 0x513   : > { %1539 = vmatpush.bf16.msrb.mxu2 %v2281_v56  ;;  %v2480_v7 = vld [vmem:[#allocation8 + $0xc4] sm:$0xf]  ;;  %v2466_v56 = vld [vmem:[#allocation8 + $0x4c] sm:$0xf0] }
 0x514   : > { %v2201_v58 = vor.u32 %v2466_v56, %v2200_v55 }
 0x51d   : > { %v1100_v8 = vpop.xlane.xlu1 %1099 }
 0x51e   : > { %2623 = vrcp.f32 %v1100_v8  ;;  %v2265_v8 = vor.u32 %v2482_v6, %v2264_v5  ;;  %v2462_v5 = vld [vmem:[#allocation8 + $0x2c] sm:$0xf0]  ;;  %v2460_v6 = vld [vmem:[#allocation8 + $0x24] sm:$0xf] }
 0x520   : > { %1540 = vmatpush.bf16.msrb.mxu2 %v2265_v8  ;;  %v2186_v8 = vld [vmem:[#allocation8 + $0x30] sm:$0xf0] }
 0x524   : > { %v2624_v9 = vpop.eup %2623 }
 0x525   : > { %v1102_v10 = vmul.f32 %v2624_v9, %v2614_v47  ;;  %v2266_v9 = vld [vmem:[#allocation8 + $0xd0] sm:$0xf0] }
 0x527   : > { %v1103_v11 = vpack.c.bf16 %v1102_v10, %v1102_v10  ;;  %v1007_v12 = vpop.f32.mrf.mxu2  ;;  %v2272_v10 = vld [vmem:[#allocation8 + $0xc8] sm:$0xf] }
 0x528   : > { %1195 = vrot.lane.b32.xlu2 %v1007_v12, %s2784_s15  ;;  %v2269_v12 = vor.u32 %v2480_v7, %v2266_v9  ;;  %v2192_v9 = vld [vmem:[#allocation8 + $0x28] sm:$0xf] }
 0x529   : > { %2131 = vmatmul.msk.bf16.vlgmr.msra.gmra.mxu2 %vm747_vm7, %v1103_v11  ;;  %v2483_v11 = vld [vmem:[#allocation8 + $0xd4] sm:$0xf0] }
 0x52a   : > { %1553 = vmatpush.bf16.msra.mxu3 %v2269_v12 }
 0x52f   : > { %v1009_v13 = vpop.f32.mrf.mxu2 }
 0x530   : > { %v2273_v13 = vor.u32 %v2483_v11, %v2272_v10  ;;  %v2463_v10 = vld [vmem:[#allocation8 + $0x34] sm:$0xf0]  ;;  %v2189_v11 = vor.u32 %v2460_v6, %v2186_v8  ;;  %v2490_v6 = vld [vmem:[#allocation9 + $0x10] sm:$0xff]  ;;  %v2512_v8 = vld [vmem:[#allocation9 + $0xc0] sm:$0xff] }
 0x531   : > { %v2193_v12 = vor.u32 %v2463_v10, %v2192_v9  ;;  %v2489_v9 = vld [vmem:[#allocation9 + $0x8] sm:$0xff] }
 0x532   : > { %1566 = vmatpush.bf16.msrb.mxu0 %v2273_v13  ;;  %v2461_v13 = vld [vmem:[#allocation8 + $0x2c] sm:$0xf] }
 0x533   : > { %v2497_v10 = vld [vmem:[#allocation9 + $0x48] sm:$0xff] }
 0x553   : > { %v836_v14 = vpop.f32.mrf.mxu0 }
 0x554   : > { %1183 = vrot.lane.b32.xlu0 %v836_v14, %s2782_s29  ;;  %v2481_v14 = vld [vmem:[#allocation8 + $0xcc] sm:$0xf] }
 0x55b   : > { %v838_v15 = vpop.f32.mrf.mxu0 }
 0x55c   : > { %v2274_v15 = vld [vmem:[#allocation8 + $0xd8] sm:$0xf0] }
 0x563   : > { %v950_v17 = vpop.f32.mrf.mxu0 }
 0x564   : > { %1191 = vrot.lane.b32.xlu0 %v950_v17, %s2780_s25  ;;  %v2277_v17 = vor.u32 %v2481_v14, %v2274_v15  ;;  %v2194_v14 = vld [vmem:[#allocation8 + $0x38] sm:$0xf0]  ;;  %v2168_v15 = vld [vmem:[#allocation8] sm:$0xf] }
 0x566   : > { %1579 = vmatpush.bf16.msra.mxu1 %v2277_v17  ;;  %v2197_v17 = vor.u32 %v2461_v13, %v2194_v14  ;;  %v1369_v13 = vld [vmem:[%s3129_s10] sm:$0xf] }
 0x567   : > { %v1373_v14 = vperm.slane %v1369_v13, 2 }
 0x56a   : > { %1580 = vmatpush.bf16.msra.mxu1 %v2261_v30 }
 0x56b   : > { %v952_v18 = vpop.f32.mrf.mxu0 }
 0x56c   : > { %v2248_v18 = vld [vmem:[#allocation8 + $0xa0] sm:$0xf] }
 0x574   : > { %v1064_v20 = vpop.f32.mrf.mxu0 }
 0x575   : > { %1199 = vrot.lane.b32.xlu0 %v1064_v20, %s2783_s14  ;;  %v2478_v20 = vld [vmem:[#allocation8 + $0xac] sm:$0xf0] }
 0x57c   : > { %v1066_v21 = vpop.f32.mrf.mxu0 }
 0x57d   : > { %v1188_v40 = vpop.permute.xlu1 %1187  ;;  %v2476_v21 = vld [vmem:[#allocation8 + $0xa4] sm:$0xf] }
 0x582   : > { %v1196_v37 = vpop.permute.xlu2 %1195 }
 0x584   : > { %v1178_v22 = vpop.f32.mrf.mxu0 }
 0x585   : > { %1207 = vrot.lane.b32.xlu0 %v1178_v22, %s2779_s23  ;;  %v2249_v22 = vor.u32 %v2478_v20, %v2248_v18  ;;  %v2458_v18 = vld [vmem:[#allocation8 + $0xc] sm:$0xf0]  ;;  %v2456_v20 = vld [vmem:[#allocation8 + $0x4] sm:$0xf]  ;;  %s477_s23 = scalar_lea.vmem %s3132_s13, %s2020_s4 }
 0x587   : > { %1541 = vmatpush.bf16.msrb.mxu2 %v2249_v22  ;;  %v2169_v22 = vor.u32 %v2458_v18, %v2168_v15  ;;  %v1374_v15 = vperm.slane %v1369_v13, 3 }
 0x58c   : > { %v1180_v23 = vpop.f32.mrf.mxu0 }
 0x58d   : > { %v2250_v23 = vld [vmem:[#allocation8 + $0xb0] sm:$0xf0] }
 0x58e   : > { %v2253_v26 = vor.u32 %v2476_v21, %v2250_v23  ;;  %v2170_v21 = vld [vmem:[#allocation8 + $0x10] sm:$0xf0] }
 0x58f   : > { %v2173_v23 = vor.u32 %v2456_v20, %v2170_v21 }
 0x590   : > { %1554 = vmatpush.bf16.msra.mxu3 %v2253_v26  ;;  %v2457_v26 = vld [vmem:[#allocation8 + $0xc] sm:$0xf] }
 0x591   : > { %v2181_v29 = vor.u32 %v2457_v26, %v2178_v28 }
 0x5ac   : > { %v1121_v24 = vpop.f32.mrf.mxu2 }
 0x5ad   : > { %1203 = vrot.lane.b32.xlu2 %v1121_v24, %s2778_s21  ;;  %v2256_v24 = vld [vmem:[#allocation8 + $0xa8] sm:$0xf] }
 0x5b4   : > { %v1123_v25 = vpop.f32.mrf.mxu2 }
 0x5b5   : > { %v2479_v25 = vld [vmem:[#allocation8 + $0xb4] sm:$0xf0] }
 0x5b6   : > { %v2257_v27 = vor.u32 %v2479_v25, %v2256_v24  ;;  %v2176_v24 = vld [vmem:[#allocation8 + $0x8] sm:$0xf]  ;;  %v2459_v25 = vld [vmem:[#allocation8 + $0x14] sm:$0xf0] }
 0x5b8   : > { %1567 = vmatpush.bf16.msrb.mxu0 %v2257_v27  ;;  %v2177_v27 = vor.u32 %v2459_v25, %v2176_v24 }
 0x5c6   : > { %v1184_v34 = vpop.permute.xlu0 %1183 }
 0x5c7   : > { %v1210_v38 = vsel %vm726_vm4, %v3013_v35, %v1184_v34  ;;  %v2585_v35 = vld [vmem:[%s3125_s6] ss:$0 sm:$0xff]  ;;  %v2233_v34 = vor.u32 %v2474_v32, %v2232_v31  ;;  %v2511_v31 = vld [vmem:[#allocation9 + $0xb8] sm:$0xff] }
 0x5c8   : > { %v1212_v41 = vsel %vm1211_vm8, %v1210_v38, %v1188_v40  ;;  %v2475_v38 = vld [vmem:[#allocation8 + $0x94] sm:$0xf0] }
 0x5c9   : > { %1542 = vmatpush.bf16.msrb.mxu2 %v2233_v34  ;;  %v2519_v32 = vld [vmem:[#allocation9 + $0xf8] sm:$0xff] }
 0x5ca   : > { %v2495_v34 = vld [vmem:[#allocation9 + $0x38] sm:$0xff] }
 0x5d6   : > { %v1192_v36 = vpop.permute.xlu0 %1191 }
 0x5d7   : > { %v1214_v19 = vsel %vm1213_vm9, %v1212_v41, %v1192_v36  ;;  %v2234_v36 = vld [vmem:[#allocation8 + $0x90] sm:$0xf0]  ;;  %v2473_v41 = vld [vmem:[#allocation8 + $0x8c] sm:$0xf] }
 0x5d8   : > { %v1216_v42 = vsel %vm1215_vm10, %v1214_v19, %v1196_v37  ;;  %v2240_v37 = vld [vmem:[#allocation8 + $0x88] sm:$0xf]  ;;  %v2242_v19 = vld [vmem:[#allocation8 + $0x98] sm:$0xf0] }
 0x5d9   : > { %v2241_v40 = vor.u32 %v2475_v38, %v2240_v37  ;;  %v2510_v37 = vld [vmem:[#allocation9 + $0xb0] sm:$0xff] }
 0x5da   : > { %v2518_v38 = vld [vmem:[#allocation9 + $0xf0] sm:$0xff] }
 0x5db   : > { %1568 = vmatpush.bf16.msrb.mxu0 %v2241_v40  ;;  %v2494_v40 = vld [vmem:[#allocation9 + $0x30] sm:$0xff] }
 0x5e7   : > { %v1200_v39 = vpop.permute.xlu0 %1199 }
 0x5e8   : > { %v1218_v43 = vsel %vm1217_vm11, %v1216_v42, %v1200_v39  ;;  %v2237_v39 = vor.u32 %v2472_v33, %v2234_v36  ;;  %v2245_v42 = vor.u32 %v2473_v41, %v2242_v19  ;;  %v2503_v36 = vld [vmem:[#allocation9 + $0x78] sm:$0xff]  ;;  %v2502_v41 = vld [vmem:[#allocation9 + $0x70] sm:$0xff]  ;;  %v2509_v19 = vld [vmem:[#allocation9 + $0xa8] sm:$0xff] }
 0x5ea   : > { %1555 = vmatpush.bf16.msra.mxu3 %v2237_v39  ;;  %1581 = vmatpush.bf16.msra.mxu1 %v2245_v42  ;;  %v2517_v42 = vld [vmem:[#allocation9 + $0xe8] sm:$0xff] }
 0x5f7   : > { %v1208_v47 = vpop.permute.xlu0 %1207 }
 0x607   : > { %v1204_v46 = vpop.permute.xlu2 %1203 }
 0x608   : > { %v1220_v48 = vsel %vm1219_vm12, %v1218_v43, %v1204_v46  ;;  %v2216_v43 = vld [vmem:[#allocation8 + $0x60] sm:$0xf]  ;;  %v2470_v46 = vld [vmem:[#allocation8 + $0x6c] sm:$0xf0] }
 0x609   : > { %v1222_v49 = vsel %vm1221_vm13, %v1220_v48, %v1208_v47  ;;  %v2468_v47 = vld [vmem:[#allocation8 + $0x64] sm:$0xf]  ;;  %v2217_v48 = vor.u32 %v2470_v46, %v2216_v43  ;;  %v2493_v43 = vld [vmem:[#allocation9 + $0x28] sm:$0xff] }
 0x60a   : > { %v1223_v50 = vpack.c.bf16 %v1222_v49, %v1222_v49  ;;  %v2218_v49 = vld [vmem:[#allocation8 + $0x70] sm:$0xf0]  ;;  %v2508_v46 = vld [vmem:[#allocation9 + $0xa0] sm:$0xff] }
 0x60b   : > { %1543 = vmatpush.bf16.msrb.mxu2 %v2217_v48 }
 0x60c   : > { %1300 = vmatmul.bf16.vlgmr.msrb.gmra.mxu1 %v1223_v50  ;;  %v2224_v50 = vld [vmem:[#allocation8 + $0x68] sm:$0xf] }
 0x60f   : > { %1544 = vmatpush.bf16.msrb.mxu2 %v2201_v58  ;;  %v2514_v58 = vld [vmem:[#allocation9 + $0xd0] sm:$0xff] }
 0x689   : > { %v1301_v45 = vpop.f32.mrf.mxu1 }
 0x68a   : > { %v1302_v51 = vadd.f32 %v2585_v35, %v1301_v45  ;;  %v2471_v35 = vld [vmem:[#allocation8 + $0x74] sm:$0xf0]  ;;  %v2221_v45 = vor.u32 %v2468_v47, %v2218_v49  ;;  %v2516_v47 = vld [vmem:[#allocation9 + $0xe0] sm:$0xff] }
 0x68b   : > { %v2492_v49 = vld [vmem:[#allocation9 + $0x20] sm:$0xff] }
 0x68c   : > { %v3087_v52 = vadd.f32 %v1302_v51, %v2922_v0  ;;  %v2225_v51 = vor.u32 %v2471_v35, %v2224_v50  ;;  %1556 = vmatpush.bf16.msra.mxu3 %v2221_v45  ;;  %v2500_v50 = vld [vmem:[#allocation9 + $0x60] sm:$0xff] }
 0x68e   : > { %1308 = vadd.xlane.f32.xlu2 %v3087_v52  ;;  %1569 = vmatpush.bf16.msrb.mxu0 %v2225_v51  ;;  %v2507_v51 = vld [vmem:[#allocation9 + $0x98] sm:$0xff] }
 0x690   : > { %1557 = vmatpush.bf16.msra.mxu3 %v2205_v62 }
 0x691   : > { %v1303_v44 = vpop.f32.mrf.mxu1 }
 0x692   : > { %v2469_v44 = vld [vmem:[#allocation8 + $0x6c] sm:$0xf]  ;;  %1570 = vmatpush.bf16.msrb.mxu0 %v2209_v63  ;;  %v2587_v63 = vld [vmem:[%s3127_s8] ss:$0 sm:$0xff] }
 0x693   : > { %v2229_v54 = vor.u32 %v2469_v44, %v2226_v53  ;;  %v2515_v44 = vld [vmem:[#allocation9 + $0xd8] sm:$0xff] }
 0x694   : > { %1558 = vmatpush.bf16.msra.mxu3 %v2189_v11  ;;  %v2491_v53 = vld [vmem:[#allocation9 + $0x18] sm:$0xff]  ;;  %v2488_v11 = vld [vmem:[#allocation9] sm:$0xff] }
 0x695   : > { %1582 = vmatpush.bf16.msra.mxu1 %v2229_v54  ;;  %v2499_v54 = vld [vmem:[#allocation9 + $0x58] sm:$0xff] }
 0x696   : > { %1571 = vmatpush.bf16.msrb.mxu0 %v2193_v12  ;;  %v2496_v12 = vld [vmem:[#allocation9 + $0x40] sm:$0xff] }
 0x698   : > { %1559 = vmatpush.bf16.msra.mxu3 %v2173_v23  ;;  %v1372_v23 = vperm.slane %v1369_v13, 1 }
 0x69a   : > { %1572 = vmatpush.bf16.msrb.mxu0 %v2177_v27 }
 0x69c   : > { %1872 = vmatpush.bf16.msrb.mxu3 %v2503_v36 }
 0x69e   : > { %1885 = vmatpush.bf16.msra.mxu0 %v2511_v31 }
 0x6a0   : > { %1873 = vmatpush.bf16.msrb.mxu3 %v2502_v41 }
 0x6a2   : > { %1886 = vmatpush.bf16.msra.mxu0 %v2510_v37 }
 0x6a6   : > { %1887 = vmatpush.bf16.msra.mxu0 %v2509_v19 }
 0x6aa   : > { %1888 = vmatpush.bf16.msra.mxu0 %v2508_v46 }
 0x6ae   : > { %1889 = vmatpush.bf16.msra.mxu0 %v2507_v51 }
 0x6b2   : > { %1890 = vmatpush.bf16.msra.mxu0 %v2506_v57 }
 0x701   : > { %v1309_v0 = vpop.xlane.xlu2 %1308 }
 0x702   : > { %v1310_v2 = vmul.f32 %v1309_v0, %v2925_v16  ;;  %v2210_v0 = vld [vmem:[#allocation8 + $0x58] sm:$0xf0] }
 0x704   : > { %v3092_v3 = vsub.f32 %v3087_v52, %v1310_v2  ;;  %v2213_v2 = vor.u32 %v2465_v1, %v2210_v0 }
 0x706   : > { %v1312_v4 = vmul.f32 %v3092_v3, %v3092_v3  ;;  %1583 = vmatpush.bf16.msra.mxu1 %v2213_v2 }
 0x708   : > { %1313 = vadd.xlane.f32.xlu1 %v1312_v4  ;;  %v2184_v4 = vld [vmem:[#allocation8 + $0x20] sm:$0xf] }
 0x709   : > { %v2185_v7 = vor.u32 %v2462_v5, %v2184_v4  ;;  %v2505_v4 = vld [vmem:[#allocation9 + $0x88] sm:$0xff] }
 0x70a   : > { %1584 = vmatpush.bf16.msra.mxu1 %v2197_v17  ;;  %v2513_v5 = vld [vmem:[#allocation9 + $0xc8] sm:$0xff]  ;;  %1891 = vmatpush.bf16.msra.mxu0 %v2505_v4 }
 0x70b   : > { %1545 = vmatpush.bf16.msrb.mxu2 %v2185_v7  ;;  %v2498_v7 = vld [vmem:[#allocation9 + $0x50] sm:$0xff] }
 0x70e   : > { %1585 = vmatpush.bf16.msra.mxu1 %v2181_v29 }
 0x70f   : > { %1546 = vmatpush.bf16.msrb.mxu2 %v2169_v22  ;;  %v1371_v22 = vperm.slane %v1369_v13, 0 }
 0x712   : > { %1898 = vmatpush.bf16.msrb.mxu1 %v2519_v32 }
 0x713   : > { %1859 = vmatpush.bf16.msra.mxu2 %v2495_v34 }
 0x716   : > { %1899 = vmatpush.bf16.msrb.mxu1 %v2518_v38 }
 0x717   : > { %1860 = vmatpush.bf16.msra.mxu2 %v2494_v40 }
 0x71a   : > { %1900 = vmatpush.bf16.msrb.mxu1 %v2517_v42 }
 0x71b   : > { %1861 = vmatpush.bf16.msra.mxu2 %v2493_v43 }
 0x71e   : > { %1901 = vmatpush.bf16.msrb.mxu1 %v2516_v47 }
 0x71f   : > { %1862 = vmatpush.bf16.msra.mxu2 %v2492_v49 }
 0x722   : > { %1902 = vmatpush.bf16.msrb.mxu1 %v2515_v44 }
 0x723   : > { %1863 = vmatpush.bf16.msra.mxu2 %v2491_v53 }
 0x726   : > { %1903 = vmatpush.bf16.msrb.mxu1 %v2514_v58 }
 0x727   : > { %1864 = vmatpush.bf16.msra.mxu2 %v2490_v6 }
 0x72a   : > { %1904 = vmatpush.bf16.msrb.mxu1 %v2513_v5 }
 0x72b   : > { %1865 = vmatpush.bf16.msra.mxu2 %v2489_v9 }
 0x72e   : > { %1905 = vmatpush.bf16.msrb.mxu1 %v2512_v8 }
 0x72f   : > { %1866 = vmatpush.bf16.msra.mxu2 %v2488_v11 }
 0x77b   : > { %v1314_v30 = vpop.xlane.xlu1 %1313 }
 0x77c   : > { %v1315_v33 = vmul.f32 %v1314_v30, %v2925_v16  ;;  %v2501_v16 = vld [vmem:[#allocation9 + $0x68] sm:$0xff] }
 0x77d   : > { %1874 = vmatpush.bf16.msrb.mxu3 %v2501_v16  ;;  %v2588_v16 = vld [vmem:[%s3131_s12] ss:$0 sm:$0xff] }
 0x77e   : > { %v1316_v39 = vadd.f32 1e-05, %v1315_v33 }
 0x780   : > { %2625 = vrsqrt.f32 %v1316_v39  ;;  %vm1323_vm15 = vweird.f32 %v1316_v39 }
 0x781   : > { %1875 = vmatpush.bf16.msrb.mxu3 %v2500_v50 }
 0x785   : > { %1876 = vmatpush.bf16.msrb.mxu3 %v2499_v54 }
 0x786   : > { %v2626_v48 = vpop.eup %2625 }
 0x787   : > { %v1318_v35 = vmul.f32 %v2626_v48, %v1316_v39  ;;  %vm1324_vm14 = vweird.f32 %v2626_v48 }
 0x788   : > { %vm1325_vm0 = vmor %vm1323_vm15, %vm1324_vm14 }
 0x789   : > { %v1319_v45 = vmul.f32 %v2626_v48, %v1318_v35  ;;  %1877 = vmatpush.bf16.msrb.mxu3 %v2498_v7 }
 0x78b   : > { %v1320_v55 = vmul.f32 0.5, %v1319_v45 }
 0x78d   : > { %v1321_v56 = vsub.f32 1.5, %v1320_v55  ;;  %1878 = vmatpush.bf16.msrb.mxu3 %v2497_v10 }
 0x78f   : > { %v1322_v59 = vmul.f32 %v2626_v48, %v1321_v56 }
 0x791   : > { %v1326_v61 = vsel %vm1325_vm0, %v2626_v48, %v1322_v59  ;;  %1879 = vmatpush.bf16.msrb.mxu3 %v2496_v12 }
 0x792   : > { %v1327_v62 = vmul.f32 %v1326_v61, %v3092_v3  ;;  %v2504_v3 = vld [vmem:[#allocation9 + $0x80] sm:$0xff] }
 0x793   : > { %1892 = vmatpush.bf16.msra.mxu0 %v2504_v3 }
 0x794   : > { %v1331_v1 = vmul.f32 %v2586_v60, %v1327_v62 }
 0x796   : > { %v1335_v0 = vadd.f32 %v2587_v63, %v1331_v1 }
 0x798   : > { %v1336_v2 = vpack.c.bf16 %v1335_v0, %v1335_v0 }
 0x79a   : > { %1547 = vmatmul.bf16.vlgmr.msrb.gmra.mxu2 %v1336_v2  ;;  %1560 = vmatmul.bf16.vlgmr.msra.gmra.mxu3 %v1336_v2 }
 0x79b   : > { %1573 = vmatmul.bf16.vlgmr.msrb.gmra.mxu0 %v1336_v2  ;;  %1586 = vmatmul.bf16.vlgmr.msra.gmra.mxu1 %v1336_v2 }
 0x818   : > { %v1574_v17 = vpop.f32.mrf.mxu0  ;;  %v1587_v18 = vpop.f32.mrf.mxu1 }
 0x819   : > { %v1575_v20 = vadd.f32 %v1574_v17, %v1373_v14  ;;  %v1588_v21 = vadd.f32 %v1587_v18, %v1374_v15 }
 0x81b   : > { %v1593_v24 = vmax.f32 %v1575_v20, 0.0  ;;  %v1594_v25 = vmax.f32 %v1588_v21, 0.0 }
 0x81d   : > { %v1597_v26 = vpack.c.bf16 %v1593_v24, %v1593_v24  ;;  %v1598_v27 = vpack.c.bf16 %v1594_v25, %v1594_v25  ;;  %v1548_v28 = vpop.f32.mrf.mxu2  ;;  %v1561_v29 = vpop.f32.mrf.mxu3 }
 0x81e   : > { %v1549_v30 = vadd.f32 %v1548_v28, %v1371_v22  ;;  %v1562_v31 = vadd.f32 %v1561_v29, %v1372_v23 }
 0x81f   : > { %1893 = vmatmul.bf16.vlgmr.msra.gmra.mxu0 %v1597_v26  ;;  %1906 = vmatmul.bf16.vlgmr.msrb.gmra.mxu1 %v1598_v27 }
 0x820   : > { %v1591_v32 = vmax.f32 %v1549_v30, 0.0  ;;  %v1592_v33 = vmax.f32 %v1562_v31, 0.0  ;;  %v1576_v34 = vpop.f32.mrf.mxu0  ;;  %v1589_v36 = vpop.f32.mrf.mxu1 }
 0x822   : > { %v1595_v37 = vpack.c.bf16 %v1591_v32, %v1591_v32  ;;  %v1596_v38 = vpack.c.bf16 %v1592_v33, %v1592_v33 }
 0x824   : > { %1867 = vmatmul.bf16.vlgmr.msra.gmra.mxu2 %v1595_v37  ;;  %1880 = vmatmul.bf16.vlgmr.msrb.gmra.mxu3 %v1596_v38 }
 0x825   : > { %v1550_v39 = vpop.f32.mrf.mxu2  ;;  %v1563_v40 = vpop.f32.mrf.mxu3 }
 0x89c   : > { %v1894_v41 = vpop.f32.mrf.mxu0  ;;  %v1907_v19 = vpop.f32.mrf.mxu1 }
 0x8a4   : > { %v1896_v42 = vpop.f32.mrf.mxu0  ;;  %v1909_v43 = vpop.f32.mrf.mxu1 }
 0x8a7   : > { %v1868_v46 = vpop.f32.mrf.mxu2  ;;  %v1881_v47 = vpop.f32.mrf.mxu3 }
 0x8a8   : > { %v1869_v48 = vadd.f32 %v2588_v16, %v1868_v46 }
 0x8aa   : > { %v1882_v49 = vadd.f32 %v1881_v47, %v1869_v48 }
 0x8ac   : > { %v1895_v50 = vadd.f32 %v1894_v41, %v1882_v49 }
 0x8ae   : > { %v1908_v35 = vadd.f32 %v1907_v19, %v1895_v50 }
 0x8af   : > { %v1870_v45 = vpop.f32.mrf.mxu2  ;;  %v1883_v51 = vpop.f32.mrf.mxu3 }
 0x8b0   : > { %v1911_v44 = vadd.f32 %v1908_v35, %v3087_v52 }
 0x8b2   : > { %1912 = vst [vmem:[%s477_s23] sm:$0xff] %v1911_v44 }
 0x8b3 PF: > { %s3143_s25 = sld [smem:[#allocation14_spill]] }
 0x8b9   : > { %s27_s24 = sadd.s32 1, %s3143_s25  }
 0x8ba   : > { %p24_p7 = scmp.ge.s32.totalorder %s27_s24, 4  }
 0x8bc   :  { %26 = sbr.rel (!%p24_p7) target bundleno = 6 (0x6), region = 115 }
 0x8c1   :  { %1932 = vsyncpa [#allocation5], 1 }
 0x8c2   :  { %1934 = vsyncpa [#allocation5 + $0x1], 1 }
 0x8c3   :  { %1935 = vsyncpa [#allocation7], 1 }
 0x8c4   :  { %1936 = vsyncpa [#allocation10], 1 }

</bundles_post_ra>
